<compile_context>
chip_gen: v6e
topology: v6e:2x2x1
jax: 0.10.0
libtpu: 0.0.40
codegen_flags: <defaults>
</compile_context>

<pallas_src>
import functools

import jax
import jax.numpy as jnp
from jax.experimental import pallas as pl
from jax.experimental.pallas import tpu as pltpu


# ----------------------------------------------------------------------------
# Fused kernel: multi-layer LSTM over one time block + running sum of the last
# layer's h_t + (on the final block) the mlp / mean / log_var heads.
#
#   grid = (T // TT,)           sequential ("arbitrary")
#   x block      : (B, TT, D)   one time block, no wrapper-side HBM transpose
#   LSTM weights : full, VMEM-resident, single-buffered, gate order (i, f, o, g)
#   head weights : full, VMEM-resident, single-buffered
#   outputs      : x_lat, mean, log_var -- written only on the last block
#   scratch      : h/c state (L,B,H), sum (B,H), gin (TT,B,4H), yout (TT,B,H)
# ----------------------------------------------------------------------------
def _lstm_encoder_kernel(L, H, TT, x_ref, *refs):
    n_w = 3 * L
    w_refs = refs[:n_w]
    (w_mlp_ref, b_mlp_ref, w_mean_ref, b_mean_ref,
     w_var_ref, b_var_ref) = refs[n_w:n_w + 6]
    xlat_ref, mean_ref, lv_ref = refs[n_w + 6:n_w + 9]
    h_scr, c_scr, sum_scr, gin_scr, yout_scr = refs[n_w + 9:]

    blk = pl.program_id(0)

    @pl.when(blk == 0)
    def _init():
        h_scr[...] = jnp.zeros_like(h_scr)
        c_scr[...] = jnp.zeros_like(c_scr)
        sum_scr[...] = jnp.zeros_like(sum_scr)

    B = x_ref.shape[0]

    for l in range(L):
        w_ih = w_refs[3 * l][...]             # (D_l, 4H), gate order (i,f,o,g)
        w_hh = w_refs[3 * l + 1][...]         # (H,   4H)
        b = w_refs[3 * l + 2][...]            # (1,   4H)  (= b_ih + b_hh), f32
        cdt = w_ih.dtype                      # matmul compute dtype
        d_l = w_ih.shape[0]
        last = (l == L - 1)

        # Hoisted input projection: ONE MXU matmul for the whole time block.
        if l == 0:
            # (B, TT, D) -> (TT, B, D): one relayout per block so every
            # later per-step access is a leading-axis (layout-free) index.
            inp = jnp.swapaxes(x_ref[...], 0, 1).reshape(TT * B, d_l)
        else:
            inp = yout_scr[...].reshape(TT * B, d_l)   # already time-major
        gin = jnp.dot(inp.astype(cdt), w_ih,
                      preferred_element_type=jnp.float32) + b
        gin_scr[...] = gin.reshape(TT, B, 4 * H)       # time-major scratch

        h = h_scr[l]                          # (B, H) f32
        c = c_scr[l]                          # (B, H) f32
        if last:
            acc = jnp.zeros_like(h)           # running sum over this block

        for t in range(TT):                   # static, fully unrolled
            g = gin_scr[t] + jnp.dot(h.astype(cdt), w_hh,
                                     preferred_element_type=jnp.float32)
            # sigmoid(x) = 0.5*tanh(0.5*x) + 0.5 : one EUP pass over the
            # contiguous (i, f, o) 3H slab instead of exp + reciprocal.
            sg = jnp.tanh(g[:, :3 * H] * 0.5) * 0.5 + 0.5
            i_g = sg[:, 0 * H:1 * H]
            f_g = sg[:, 1 * H:2 * H]
            o_g = sg[:, 2 * H:3 * H]
            g_g = jnp.tanh(g[:, 3 * H:])
            c = f_g * c + i_g * g_g
            h = o_g * jnp.tanh(c)
            if last:
                acc = acc + h                 # no TT live h tensors
            else:
                yout_scr[t] = h               # next layer's (time-major) input

        h_scr[l] = h
        c_scr[l] = c
        if last:
            sum_scr[...] = sum_scr[...] + acc

    # Fused heads on the last time block (resident accumulator -> outputs).
    @pl.when(blk == pl.num_programs(0) - 1)
    def _finalize():
        s = sum_scr[...]
        cdt = w_mlp_ref.dtype
        xlat = (jnp.dot(s.astype(cdt), w_mlp_ref[...],
                        preferred_element_type=jnp.float32) + b_mlp_ref[...])
        xlat_ref[...] = xlat
        mean_ref[...] = (jnp.dot(xlat.astype(cdt), w_mean_ref[...],
                                 preferred_element_type=jnp.float32)
                         + b_mean_ref[...])
        lv_ref[...] = (jnp.dot(xlat.astype(cdt), w_var_ref[...],
                               preferred_element_type=jnp.float32)
                       + b_var_ref[...])


# ----------------------------------------------------------------------------
# Wrapper helpers
# ----------------------------------------------------------------------------
def _repack_gates(w, H):
    """PyTorch packs gates (i, f, g, o) along the 4H axis; repack to (i, f, o, g)
    so the kernel applies one sigmoid to a contiguous 3H slab and one tanh to H."""
    return jnp.concatenate(
        [w[..., 0:2 * H], w[..., 3 * H:4 * H], w[..., 2 * H:3 * H]], axis=-1)


def _round_up(v, m):
    return ((v + m - 1) // m) * m


def _estimate_vmem_bytes(B, TT, D, H, L, Z, w_itemsize):
    """Rough VMEM residency estimate (padded to (8,128) tiles)."""
    f32 = 4
    Bp = _round_up(B, 8)
    total = 2 * B * _round_up(TT, 8) * _round_up(D, 128) * f32   # x (double-buf)
    for l in range(L):
        d_l = D if l == 0 else H
        total += _round_up(d_l, 8) * _round_up(4 * H, 128) * w_itemsize   # w_ih
        total += _round_up(H, 8) * _round_up(4 * H, 128) * w_itemsize     # w_hh
        total += 8 * _round_up(4 * H, 128) * f32                          # bias
    total += _round_up(H, 8) * _round_up(Z, 128) * w_itemsize             # w_mlp
    total += 2 * _round_up(Z, 8) * _round_up(Z, 128) * w_itemsize         # heads
    total += 3 * 8 * _round_up(Z, 128) * f32                              # head b
    total += (2 * L + 1) * Bp * _round_up(H, 128) * f32                   # h,c,sum
    total += TT * Bp * _round_up(4 * H, 128) * f32                        # gin
    total += TT * Bp * _round_up(H, 128) * f32                            # yout
    total += 2 * 3 * Bp * _round_up(Z, 128) * f32                         # outputs
    return total


def _choose_time_block(T, B, D, H, L, Z, w_itemsize, *,
                       budget_bytes=40 << 20, cap=64):
    """Largest multiple-of-8 divisor of T (<= cap) whose residency fits budget."""
    divs = [d for d in range(8, T + 1, 8) if T % d == 0]
    for tt in sorted((d for d in divs if d <= cap), reverse=True):
        if _estimate_vmem_bytes(B, tt, D, H, L, Z, w_itemsize) <= budget_bytes:
            return tt
    if divs:
        return min(divs)
    return T


# ----------------------------------------------------------------------------
# Wrapper
# ----------------------------------------------------------------------------
def lstm_encoder_forward(x, params, *, compute_dtype=jnp.float32, time_block=None):
    B, T, D = x.shape
    H = params["hidden_size"]
    L = params["num_layers"]
    Z = params["latent_size"]
    w_itemsize = jnp.dtype(compute_dtype).itemsize

    TT = (time_block if time_block is not None
          else _choose_time_block(T, B, D, H, L, Z, w_itemsize))
    assert T % TT == 0, "time_block must divide T"
    n_blocks = T // TT

    lstm_args = []
    for l in range(L):
        lstm_args += [
            _repack_gates(params[f"w_ih_{l}"], H).astype(compute_dtype),
            _repack_gates(params[f"w_hh_{l}"], H).astype(compute_dtype),
            _repack_gates(params[f"b_{l}"], H),            # bias stays f32
        ]
    head_args = [
        params["w_mlp"].astype(compute_dtype), params["b_mlp"],
        params["w_mean"].astype(compute_dtype), params["b_mean"],
        params["w_var"].astype(compute_dtype), params["b_var"],
    ]

    est = _estimate_vmem_bytes(B, TT, D, H, L, Z, w_itemsize)
    vmem_limit = int(min(max(3 * est // 2 + (4 << 20), 16 << 20), 56 << 20))

    out_shapes = tuple(jax.ShapeDtypeStruct((B, Z), jnp.float32) for _ in range(3))
    out_specs = tuple(pl.BlockSpec((B, Z), lambda i: (0, 0)) for _ in range(3))
    scratch_shapes = [
        pltpu.VMEM((L, B, H), jnp.float32),       # h state per layer
        pltpu.VMEM((L, B, H), jnp.float32),       # c state per layer
        pltpu.VMEM((B, H), jnp.float32),          # sum over time of last-layer h
        pltpu.VMEM((TT, B, 4 * H), jnp.float32),  # time-major hoisted gates
        pltpu.VMEM((TT, B, H), jnp.float32),      # time-major layer output
    ]

    def _call(single_buffer_weights):
        def const_spec(shape):
            if single_buffer_weights:
                # Constant index_map: one VMEM copy is enough (no ping-pong).
                return pl.BlockSpec(shape, lambda i: (0, 0),
                                    pipeline_mode=pl.Buffered(1))
            return pl.BlockSpec(shape, lambda i: (0, 0))

        in_specs = [pl.BlockSpec((B, TT, D), lambda i: (0, i, 0))]
        in_specs += [const_spec(a.shape) for a in lstm_args]
        in_specs += [const_spec(a.shape) for a in head_args]

        return pl.pallas_call(
            functools.partial(_lstm_encoder_kernel, L, H, TT),
            out_shape=out_shapes,
            grid=(n_blocks,),
            in_specs=in_specs,
            out_specs=out_specs,
            scratch_shapes=scratch_shapes,
            compiler_params=pltpu.CompilerParams(
                dimension_semantics=("arbitrary",),
                vmem_limit_bytes=vmem_limit,
            ),
        )(x, *lstm_args, *head_args)

    try:
        return _call(True)
    except Exception:
        # Fallback for jax versions without BlockSpec(pipeline_mode=...).
        return _call(False)


# ----------------------------------------------------------------------------
# Pure-JAX reference (semantics of the PyTorch module) for verification.
# Weights kept in PyTorch gate order (i, f, g, o).
# ----------------------------------------------------------------------------
def reference_forward(x, params):
    B, T, D = x.shape
    H = params["hidden_size"]
    L = params["num_layers"]
    out = x
    for l in range(L):
        w_ih = params[f"w_ih_{l}"]
        w_hh = params[f"w_hh_{l}"]
        b = params[f"b_{l}"][0]
        h = jnp.zeros((B, H), jnp.float32)
        c = jnp.zeros((B, H), jnp.float32)
        hs = []
        for t in range(T):
            gates = out[:, t, :] @ w_ih + h @ w_hh + b
            i_g = jax.nn.sigmoid(gates[:, 0 * H:1 * H])
            f_g = jax.nn.sigmoid(gates[:, 1 * H:2 * H])
            g_g = jnp.tanh(gates[:, 2 * H:3 * H])
            o_g = jax.nn.sigmoid(gates[:, 3 * H:4 * H])
            c = f_g * c + i_g * g_g
            h = o_g * jnp.tanh(c)
            hs.append(h)
        out = jnp.stack(hs, axis=1)
    s = out.sum(axis=1)
    x_lat = s @ params["w_mlp"] + params["b_mlp"][0]
    mean = x_lat @ params["w_mean"] + params["b_mean"][0]
    log_var = x_lat @ params["w_var"] + params["b_var"][0]
    return x_lat, mean, log_var


# ----------------------------------------------------------------------------
# Deterministic parameter init (shapes follow nn.LSTM / nn.Linear,
# pre-transposed to (in_features, out_features); bias = b_ih + b_hh combined).
# ----------------------------------------------------------------------------
def init_params(key, input_size, hidden_size, latent_size, num_layers):
    H = hidden_size
    params = {
        "hidden_size": hidden_size,
        "latent_size": latent_size,
        "num_layers": num_layers,
    }
    scale = 1.0 / jnp.sqrt(jnp.float32(H))
    for l in range(num_layers):
        d_in = input_size if l == 0 else hidden_size
        key, k1, k2, k3 = jax.random.split(key, 4)
        params[f"w_ih_{l}"] = jax.random.uniform(k1, (d_in, 4 * H), jnp.float32, -scale, scale)
        params[f"w_hh_{l}"] = jax.random.uniform(k2, (H, 4 * H), jnp.float32, -scale, scale)
        params[f"b_{l}"] = jax.random.uniform(k3, (1, 4 * H), jnp.float32, -scale, scale)
    key, k1, k2, k3, k4, k5, k6 = jax.random.split(key, 7)
    params["w_mlp"] = jax.random.uniform(k1, (H, latent_size), jnp.float32, -scale, scale)
    params["b_mlp"] = jax.random.uniform(k2, (1, latent_size), jnp.float32, -scale, scale)
    zscale = 1.0 / jnp.sqrt(jnp.float32(latent_size))
    params["w_mean"] = jax.random.uniform(k3, (latent_size, latent_size), jnp.float32, -zscale, zscale)
    params["b_mean"] = jax.random.uniform(k4, (1, latent_size), jnp.float32, -zscale, zscale)
    params["w_var"] = jax.random.uniform(k5, (latent_size, latent_size), jnp.float32, -zscale, zscale)
    params["b_var"] = jax.random.uniform(k6, (1, latent_size), jnp.float32, -zscale, zscale)
    return params


if __name__ == "__main__":
    B, T = 2, 8                  # batch, sequence length
    input_size = 16
    hidden_size = 32
    latent_size = 8
    num_layers = 2

    key = jax.random.PRNGKey(0)
    key, kx, kp, kx2 = jax.random.split(key, 4)
    x = jax.random.normal(kx, (B, T, input_size), jnp.float32)
    params = init_params(kp, input_size, hidden_size, latent_size, num_layers)

    # f32, single time block (TT = T)
    x_lat, mean, log_var = lstm_encoder_forward(x, params)
    jax.block_until_ready((x_lat, mean, log_var))
    x_ref, mean_ref, lv_ref = reference_forward(x, params)
    assert jnp.allclose(x_lat, x_ref, atol=5e-4, rtol=5e-4)
    assert jnp.allclose(mean, mean_ref, atol=5e-4, rtol=5e-4)
    assert jnp.allclose(log_var, lv_ref, atol=5e-4, rtol=5e-4)

    # f32, longer sequence with multiple time blocks (state carry across grid)
    T2 = 32
    x2 = jax.random.normal(kx2, (B, T2, input_size), jnp.float32)
    x_lat2, mean2, log_var2 = lstm_encoder_forward(x2, params, time_block=8)
    jax.block_until_ready((x_lat2, mean2, log_var2))
    x_ref2, mean_ref2, lv_ref2 = reference_forward(x2, params)
    assert jnp.allclose(x_lat2, x_ref2, atol=5e-4, rtol=5e-4)
    assert jnp.allclose(mean2, mean_ref2, atol=5e-4, rtol=5e-4)
    assert jnp.allclose(log_var2, lv_ref2, atol=5e-4, rtol=5e-4)

    # bf16-weight compute path (f32 accumulation / f32 state): exercise + sanity.
    x_lat3, mean3, log_var3 = lstm_encoder_forward(
        x2, params, compute_dtype=jnp.bfloat16, time_block=8)
    jax.block_until_ready((x_lat3, mean3, log_var3))
    assert bool(jnp.all(jnp.isfinite(x_lat3)))
    assert bool(jnp.all(jnp.isfinite(mean3)))
    assert bool(jnp.all(jnp.isfinite(log_var3)))

    print("KERNEL_OK")
</pallas_src>

<mosaic_0001>
module attributes {stable_mosaic.version = 11 : i64} {
  func.func @_lstm_encoder_kernel(%arg0: i32, %arg1: memref<2x8x16xf32, #tpu.memory_space<vmem>>, %arg2: memref<16x128xf32, #tpu.memory_space<vmem>>, %arg3: memref<32x128xf32, #tpu.memory_space<vmem>>, %arg4: memref<1x128xf32, #tpu.memory_space<vmem>>, %arg5: memref<32x128xf32, #tpu.memory_space<vmem>>, %arg6: memref<32x128xf32, #tpu.memory_space<vmem>>, %arg7: memref<1x128xf32, #tpu.memory_space<vmem>>, %arg8: memref<32x8xf32, #tpu.memory_space<vmem>>, %arg9: memref<1x8xf32, #tpu.memory_space<vmem>>, %arg10: memref<8x8xf32, #tpu.memory_space<vmem>>, %arg11: memref<1x8xf32, #tpu.memory_space<vmem>>, %arg12: memref<8x8xf32, #tpu.memory_space<vmem>>, %arg13: memref<1x8xf32, #tpu.memory_space<vmem>>, %arg14: memref<2x8xf32, #tpu.memory_space<vmem>>, %arg15: memref<2x8xf32, #tpu.memory_space<vmem>>, %arg16: memref<2x8xf32, #tpu.memory_space<vmem>>, %arg17: memref<2x2x32xf32, #tpu.memory_space<vmem>>, %arg18: memref<2x2x32xf32, #tpu.memory_space<vmem>>, %arg19: memref<2x32xf32, #tpu.memory_space<vmem>>, %arg20: memref<8x2x128xf32, #tpu.memory_space<vmem>>, %arg21: memref<8x2x32xf32, #tpu.memory_space<vmem>>) attributes {dimension_semantics = [#tpu.dimension_semantics<arbitrary>], iteration_bounds = array<i64: 1>, scalar_prefetch = 0 : i64, scratch_operands = 5 : i64, tpu.core_type = #tpu.core_type<tc>, window_params = [{transform_indices = @transform_0, window_bounds = array<i64: 2, 8, 16>}, {pipeline_mode = #tpu.pipeline_mode<synchronous>, transform_indices = @transform_1, window_bounds = array<i64: 16, 128>}, {pipeline_mode = #tpu.pipeline_mode<synchronous>, transform_indices = @transform_2, window_bounds = array<i64: 32, 128>}, {pipeline_mode = #tpu.pipeline_mode<synchronous>, transform_indices = @transform_3, window_bounds = array<i64: 1, 128>}, {pipeline_mode = #tpu.pipeline_mode<synchronous>, transform_indices = @transform_4, window_bounds = array<i64: 32, 128>}, {pipeline_mode = #tpu.pipeline_mode<synchronous>, transform_indices = @transform_5, window_bounds = array<i64: 32, 128>}, {pipeline_mode = #tpu.pipeline_mode<synchronous>, transform_indices = @transform_6, window_bounds = array<i64: 1, 128>}, {pipeline_mode = #tpu.pipeline_mode<synchronous>, transform_indices = @transform_7, window_bounds = array<i64: 32, 8>}, {pipeline_mode = #tpu.pipeline_mode<synchronous>, transform_indices = @transform_8, window_bounds = array<i64: 1, 8>}, {pipeline_mode = #tpu.pipeline_mode<synchronous>, transform_indices = @transform_9, window_bounds = array<i64: 8, 8>}, {pipeline_mode = #tpu.pipeline_mode<synchronous>, transform_indices = @transform_10, window_bounds = array<i64: 1, 8>}, {pipeline_mode = #tpu.pipeline_mode<synchronous>, transform_indices = @transform_11, window_bounds = array<i64: 8, 8>}, {pipeline_mode = #tpu.pipeline_mode<synchronous>, transform_indices = @transform_12, window_bounds = array<i64: 1, 8>}, {pipeline_mode = #tpu.pipeline_mode<synchronous>, transform_indices = @transform_13, window_bounds = array<i64: 2, 8>}, {pipeline_mode = #tpu.pipeline_mode<synchronous>, transform_indices = @transform_14, window_bounds = array<i64: 2, 8>}, {pipeline_mode = #tpu.pipeline_mode<synchronous>, transform_indices = @transform_15, window_bounds = array<i64: 2, 8>}]} {
    %c0_i32 = arith.constant 0 : i32
    %0 = arith.cmpi eq, %arg0, %c0_i32 : i32
    %1 = arith.extui %0 : i1 to i32
    %c0_i32_0 = arith.constant 0 : i32
    %2 = arith.cmpi ne, %1, %c0_i32_0 : i32
    scf.if %2 {
      %cst_185 = arith.constant 0.000000e+00 : f32
      %435 = vector.broadcast %cst_185 : f32 to vector<2x2x32xf32>
      %c0_186 = arith.constant 0 : index
      %c0_187 = arith.constant 0 : index
      %c0_188 = arith.constant 0 : index
      %436 = vector.load %arg17[%c0_186, %c0_187, %c0_188] : memref<2x2x32xf32, #tpu.memory_space<vmem>>, vector<2x2x32xf32>
      tpu.vector_store %arg17[%c0_186, %c0_187, %c0_188], %435 {strides = array<i32>} : memref<2x2x32xf32, #tpu.memory_space<vmem>>, vector<2x2x32xf32>,
      %cst_189 = arith.constant 0.000000e+00 : f32
      %437 = vector.broadcast %cst_189 : f32 to vector<2x2x32xf32>
      %c0_190 = arith.constant 0 : index
      %c0_191 = arith.constant 0 : index
      %c0_192 = arith.constant 0 : index
      %438 = vector.load %arg18[%c0_190, %c0_191, %c0_192] : memref<2x2x32xf32, #tpu.memory_space<vmem>>, vector<2x2x32xf32>
      tpu.vector_store %arg18[%c0_190, %c0_191, %c0_192], %437 {strides = array<i32>} : memref<2x2x32xf32, #tpu.memory_space<vmem>>, vector<2x2x32xf32>,
      %cst_193 = arith.constant 0.000000e+00 : f32
      %439 = vector.broadcast %cst_193 : f32 to vector<2x32xf32>
      %c0_194 = arith.constant 0 : index
      %c0_195 = arith.constant 0 : index
      %440 = vector.load %arg19[%c0_194, %c0_195] : memref<2x32xf32, #tpu.memory_space<vmem>>, vector<2x32xf32>
      tpu.vector_store %arg19[%c0_194, %c0_195], %439 {strides = array<i32>} : memref<2x32xf32, #tpu.memory_space<vmem>>, vector<2x32xf32>,
    } else {
    }
    %c0 = arith.constant 0 : index
    %c0_1 = arith.constant 0 : index
    %3 = vector.load %arg2[%c0, %c0_1] : memref<16x128xf32, #tpu.memory_space<vmem>>, vector<16x128xf32>
    %c0_2 = arith.constant 0 : index
    %c0_3 = arith.constant 0 : index
    %4 = vector.load %arg3[%c0_2, %c0_3] : memref<32x128xf32, #tpu.memory_space<vmem>>, vector<32x128xf32>
    %c0_4 = arith.constant 0 : index
    %c0_5 = arith.constant 0 : index
    %5 = vector.load %arg4[%c0_4, %c0_5] : memref<1x128xf32, #tpu.memory_space<vmem>>, vector<1x128xf32>
    %c0_6 = arith.constant 0 : index
    %c0_7 = arith.constant 0 : index
    %c0_8 = arith.constant 0 : index
    %6 = vector.load %arg1[%c0_6, %c0_7, %c0_8] : memref<2x8x16xf32, #tpu.memory_space<vmem>>, vector<2x8x16xf32>
    %7 = tpu.transpose %6, [1, 0, 2] : vector<2x8x16xf32> -> vector<8x2x16xf32>
    %8 = vector.shape_cast %7 : vector<8x2x16xf32> to vector<16x16xf32>
    %cst = arith.constant dense<0.000000e+00> : vector<16x128xf32>
    %9 = tpu.matmul %8, %3, %cst {dimension_numbers = #tpu.dot_dimension_numbers<[1], [0], [0], [1], [0, 0, 1, 1], [], []>} : vector<16x16xf32>, vector<16x128xf32>, vector<16x128xf32> -> vector<16x128xf32>
    %10 = vector.broadcast %5 : vector<1x128xf32> to vector<16x128xf32>
    %11 = arith.addf %9, %10 : vector<16x128xf32>
    %12 = vector.shape_cast %11 : vector<16x128xf32> to vector<8x2x128xf32>
    %c0_9 = arith.constant 0 : index
    %c0_10 = arith.constant 0 : index
    %c0_11 = arith.constant 0 : index
    %13 = vector.load %arg20[%c0_9, %c0_10, %c0_11] : memref<8x2x128xf32, #tpu.memory_space<vmem>>, vector<8x2x128xf32>
    tpu.vector_store %arg20[%c0_9, %c0_10, %c0_11], %12 {strides = array<i32>} : memref<8x2x128xf32, #tpu.memory_space<vmem>>, vector<8x2x128xf32>,
    %c0_12 = arith.constant 0 : index
    %c0_13 = arith.constant 0 : index
    %c0_14 = arith.constant 0 : index
    %14 = vector.load %arg17[%c0_12, %c0_13, %c0_14] : memref<2x2x32xf32, #tpu.memory_space<vmem>>, vector<1x2x32xf32>
    %15 = vector.shape_cast %14 : vector<1x2x32xf32> to vector<2x32xf32>
    %c0_15 = arith.constant 0 : index
    %c0_16 = arith.constant 0 : index
    %c0_17 = arith.constant 0 : index
    %16 = vector.load %arg18[%c0_15, %c0_16, %c0_17] : memref<2x2x32xf32, #tpu.memory_space<vmem>>, vector<1x2x32xf32>
    %17 = vector.shape_cast %16 : vector<1x2x32xf32> to vector<2x32xf32>
    %c0_18 = arith.constant 0 : index
    %c0_19 = arith.constant 0 : index
    %c0_20 = arith.constant 0 : index
    %18 = vector.load %arg20[%c0_18, %c0_19, %c0_20] : memref<8x2x128xf32, #tpu.memory_space<vmem>>, vector<1x2x128xf32>
    %19 = vector.shape_cast %18 : vector<1x2x128xf32> to vector<2x128xf32>
    %cst_21 = arith.constant dense<0.000000e+00> : vector<2x128xf32>
    %20 = tpu.matmul %15, %4, %cst_21 {dimension_numbers = #tpu.dot_dimension_numbers<[1], [0], [0], [1], [0, 0, 1, 1], [], []>} : vector<2x32xf32>, vector<32x128xf32>, vector<2x128xf32> -> vector<2x128xf32>
    %21 = arith.addf %19, %20 : vector<2x128xf32>
    %22 = vector.extract_strided_slice %21 {offsets = [0, 0], sizes = [2, 96], strides = [1, 1]} : vector<2x128xf32> to vector<2x96xf32>
    %cst_22 = arith.constant 5.000000e-01 : f32
    %23 = vector.broadcast %cst_22 : f32 to vector<2x96xf32>
    %24 = arith.mulf %22, %23 : vector<2x96xf32>
    %25 = math.tanh %24 : vector<2x96xf32>
    %cst_23 = arith.constant 5.000000e-01 : f32
    %26 = vector.broadcast %cst_23 : f32 to vector<2x96xf32>
    %27 = arith.mulf %25, %26 : vector<2x96xf32>
    %cst_24 = arith.constant 5.000000e-01 : f32
    %28 = vector.broadcast %cst_24 : f32 to vector<2x96xf32>
    %29 = arith.addf %27, %28 : vector<2x96xf32>
    %30 = vector.extract_strided_slice %29 {offsets = [0, 0], sizes = [2, 32], strides = [1, 1]} : vector<2x96xf32> to vector<2x32xf32>
    %31 = vector.extract_strided_slice %29 {offsets = [0, 32], sizes = [2, 32], strides = [1, 1]} : vector<2x96xf32> to vector<2x32xf32>
    %32 = vector.extract_strided_slice %29 {offsets = [0, 64], sizes = [2, 32], strides = [1, 1]} : vector<2x96xf32> to vector<2x32xf32>
    %33 = vector.extract_strided_slice %21 {offsets = [0, 96], sizes = [2, 32], strides = [1, 1]} : vector<2x128xf32> to vector<2x32xf32>
    %34 = math.tanh %33 : vector<2x32xf32>
    %35 = arith.mulf %31, %17 : vector<2x32xf32>
    %36 = arith.mulf %30, %34 : vector<2x32xf32>
    %37 = arith.addf %35, %36 : vector<2x32xf32>
    %38 = math.tanh %37 : vector<2x32xf32>
    %39 = arith.mulf %32, %38 : vector<2x32xf32>
    %c0_25 = arith.constant 0 : index
    %c0_26 = arith.constant 0 : index
    %c0_27 = arith.constant 0 : index
    %40 = vector.load %arg21[%c0_25, %c0_26, %c0_27] : memref<8x2x32xf32, #tpu.memory_space<vmem>>, vector<1x2x32xf32>
    %41 = vector.shape_cast %40 : vector<1x2x32xf32> to vector<2x32xf32>
    %42 = vector.shape_cast %39 : vector<2x32xf32> to vector<1x2x32xf32>
    tpu.vector_store %arg21[%c0_25, %c0_26, %c0_27], %42 {strides = array<i32>} : memref<8x2x32xf32, #tpu.memory_space<vmem>>, vector<1x2x32xf32>,
    %c1 = arith.constant 1 : index
    %c0_28 = arith.constant 0 : index
    %c0_29 = arith.constant 0 : index
    %43 = vector.load %arg20[%c1, %c0_28, %c0_29] : memref<8x2x128xf32, #tpu.memory_space<vmem>>, vector<1x2x128xf32>
    %44 = vector.shape_cast %43 : vector<1x2x128xf32> to vector<2x128xf32>
    %cst_30 = arith.constant dense<0.000000e+00> : vector<2x128xf32>
    %45 = tpu.matmul %39, %4, %cst_30 {dimension_numbers = #tpu.dot_dimension_numbers<[1], [0], [0], [1], [0, 0, 1, 1], [], []>} : vector<2x32xf32>, vector<32x128xf32>, vector<2x128xf32> -> vector<2x128xf32>
    %46 = arith.addf %44, %45 : vector<2x128xf32>
    %47 = vector.extract_strided_slice %46 {offsets = [0, 0], sizes = [2, 96], strides = [1, 1]} : vector<2x128xf32> to vector<2x96xf32>
    %cst_31 = arith.constant 5.000000e-01 : f32
    %48 = vector.broadcast %cst_31 : f32 to vector<2x96xf32>
    %49 = arith.mulf %47, %48 : vector<2x96xf32>
    %50 = math.tanh %49 : vector<2x96xf32>
    %cst_32 = arith.constant 5.000000e-01 : f32
    %51 = vector.broadcast %cst_32 : f32 to vector<2x96xf32>
    %52 = arith.mulf %50, %51 : vector<2x96xf32>
    %cst_33 = arith.constant 5.000000e-01 : f32
    %53 = vector.broadcast %cst_33 : f32 to vector<2x96xf32>
    %54 = arith.addf %52, %53 : vector<2x96xf32>
    %55 = vector.extract_strided_slice %54 {offsets = [0, 0], sizes = [2, 32], strides = [1, 1]} : vector<2x96xf32> to vector<2x32xf32>
    %56 = vector.extract_strided_slice %54 {offsets = [0, 32], sizes = [2, 32], strides = [1, 1]} : vector<2x96xf32> to vector<2x32xf32>
    %57 = vector.extract_strided_slice %54 {offsets = [0, 64], sizes = [2, 32], strides = [1, 1]} : vector<2x96xf32> to vector<2x32xf32>
    %58 = vector.extract_strided_slice %46 {offsets = [0, 96], sizes = [2, 32], strides = [1, 1]} : vector<2x128xf32> to vector<2x32xf32>
    %59 = math.tanh %58 : vector<2x32xf32>
    %60 = arith.mulf %56, %37 : vector<2x32xf32>
    %61 = arith.mulf %55, %59 : vector<2x32xf32>
    %62 = arith.addf %60, %61 : vector<2x32xf32>
    %63 = math.tanh %62 : vector<2x32xf32>
    %64 = arith.mulf %57, %63 : vector<2x32xf32>
    %c1_34 = arith.constant 1 : index
    %c0_35 = arith.constant 0 : index
    %c0_36 = arith.constant 0 : index
    %65 = vector.load %arg21[%c1_34, %c0_35, %c0_36] : memref<8x2x32xf32, #tpu.memory_space<vmem>>, vector<1x2x32xf32>
    %66 = vector.shape_cast %65 : vector<1x2x32xf32> to vector<2x32xf32>
    %67 = vector.shape_cast %64 : vector<2x32xf32> to vector<1x2x32xf32>
    tpu.vector_store %arg21[%c1_34, %c0_35, %c0_36], %67 {strides = array<i32>} : memref<8x2x32xf32, #tpu.memory_space<vmem>>, vector<1x2x32xf32>,
    %c2 = arith.constant 2 : index
    %c0_37 = arith.constant 0 : index
    %c0_38 = arith.constant 0 : index
    %68 = vector.load %arg20[%c2, %c0_37, %c0_38] : memref<8x2x128xf32, #tpu.memory_space<vmem>>, vector<1x2x128xf32>
    %69 = vector.shape_cast %68 : vector<1x2x128xf32> to vector<2x128xf32>
    %cst_39 = arith.constant dense<0.000000e+00> : vector<2x128xf32>
    %70 = tpu.matmul %64, %4, %cst_39 {dimension_numbers = #tpu.dot_dimension_numbers<[1], [0], [0], [1], [0, 0, 1, 1], [], []>} : vector<2x32xf32>, vector<32x128xf32>, vector<2x128xf32> -> vector<2x128xf32>
    %71 = arith.addf %69, %70 : vector<2x128xf32>
    %72 = vector.extract_strided_slice %71 {offsets = [0, 0], sizes = [2, 96], strides = [1, 1]} : vector<2x128xf32> to vector<2x96xf32>
    %cst_40 = arith.constant 5.000000e-01 : f32
    %73 = vector.broadcast %cst_40 : f32 to vector<2x96xf32>
    %74 = arith.mulf %72, %73 : vector<2x96xf32>
    %75 = math.tanh %74 : vector<2x96xf32>
    %cst_41 = arith.constant 5.000000e-01 : f32
    %76 = vector.broadcast %cst_41 : f32 to vector<2x96xf32>
    %77 = arith.mulf %75, %76 : vector<2x96xf32>
    %cst_42 = arith.constant 5.000000e-01 : f32
    %78 = vector.broadcast %cst_42 : f32 to vector<2x96xf32>
    %79 = arith.addf %77, %78 : vector<2x96xf32>
    %80 = vector.extract_strided_slice %79 {offsets = [0, 0], sizes = [2, 32], strides = [1, 1]} : vector<2x96xf32> to vector<2x32xf32>
    %81 = vector.extract_strided_slice %79 {offsets = [0, 32], sizes = [2, 32], strides = [1, 1]} : vector<2x96xf32> to vector<2x32xf32>
    %82 = vector.extract_strided_slice %79 {offsets = [0, 64], sizes = [2, 32], strides = [1, 1]} : vector<2x96xf32> to vector<2x32xf32>
    %83 = vector.extract_strided_slice %71 {offsets = [0, 96], sizes = [2, 32], strides = [1, 1]} : vector<2x128xf32> to vector<2x32xf32>
    %84 = math.tanh %83 : vector<2x32xf32>
    %85 = arith.mulf %81, %62 : vector<2x32xf32>
    %86 = arith.mulf %80, %84 : vector<2x32xf32>
    %87 = arith.addf %85, %86 : vector<2x32xf32>
    %88 = math.tanh %87 : vector<2x32xf32>
    %89 = arith.mulf %82, %88 : vector<2x32xf32>
    %c2_43 = arith.constant 2 : index
    %c0_44 = arith.constant 0 : index
    %c0_45 = arith.constant 0 : index
    %90 = vector.load %arg21[%c2_43, %c0_44, %c0_45] : memref<8x2x32xf32, #tpu.memory_space<vmem>>, vector<1x2x32xf32>
    %91 = vector.shape_cast %90 : vector<1x2x32xf32> to vector<2x32xf32>
    %92 = vector.shape_cast %89 : vector<2x32xf32> to vector<1x2x32xf32>
    tpu.vector_store %arg21[%c2_43, %c0_44, %c0_45], %92 {strides = array<i32>} : memref<8x2x32xf32, #tpu.memory_space<vmem>>, vector<1x2x32xf32>,
    %c3 = arith.constant 3 : index
    %c0_46 = arith.constant 0 : index
    %c0_47 = arith.constant 0 : index
    %93 = vector.load %arg20[%c3, %c0_46, %c0_47] : memref<8x2x128xf32, #tpu.memory_space<vmem>>, vector<1x2x128xf32>
    %94 = vector.shape_cast %93 : vector<1x2x128xf32> to vector<2x128xf32>
    %cst_48 = arith.constant dense<0.000000e+00> : vector<2x128xf32>
    %95 = tpu.matmul %89, %4, %cst_48 {dimension_numbers = #tpu.dot_dimension_numbers<[1], [0], [0], [1], [0, 0, 1, 1], [], []>} : vector<2x32xf32>, vector<32x128xf32>, vector<2x128xf32> -> vector<2x128xf32>
    %96 = arith.addf %94, %95 : vector<2x128xf32>
    %97 = vector.extract_strided_slice %96 {offsets = [0, 0], sizes = [2, 96], strides = [1, 1]} : vector<2x128xf32> to vector<2x96xf32>
    %cst_49 = arith.constant 5.000000e-01 : f32
    %98 = vector.broadcast %cst_49 : f32 to vector<2x96xf32>
    %99 = arith.mulf %97, %98 : vector<2x96xf32>
    %100 = math.tanh %99 : vector<2x96xf32>
    %cst_50 = arith.constant 5.000000e-01 : f32
    %101 = vector.broadcast %cst_50 : f32 to vector<2x96xf32>
    %102 = arith.mulf %100, %101 : vector<2x96xf32>
    %cst_51 = arith.constant 5.000000e-01 : f32
    %103 = vector.broadcast %cst_51 : f32 to vector<2x96xf32>
    %104 = arith.addf %102, %103 : vector<2x96xf32>
    %105 = vector.extract_strided_slice %104 {offsets = [0, 0], sizes = [2, 32], strides = [1, 1]} : vector<2x96xf32> to vector<2x32xf32>
    %106 = vector.extract_strided_slice %104 {offsets = [0, 32], sizes = [2, 32], strides = [1, 1]} : vector<2x96xf32> to vector<2x32xf32>
    %107 = vector.extract_strided_slice %104 {offsets = [0, 64], sizes = [2, 32], strides = [1, 1]} : vector<2x96xf32> to vector<2x32xf32>
    %108 = vector.extract_strided_slice %96 {offsets = [0, 96], sizes = [2, 32], strides = [1, 1]} : vector<2x128xf32> to vector<2x32xf32>
    %109 = math.tanh %108 : vector<2x32xf32>
    %110 = arith.mulf %106, %87 : vector<2x32xf32>
    %111 = arith.mulf %105, %109 : vector<2x32xf32>
    %112 = arith.addf %110, %111 : vector<2x32xf32>
    %113 = math.tanh %112 : vector<2x32xf32>
    %114 = arith.mulf %107, %113 : vector<2x32xf32>
    %c3_52 = arith.constant 3 : index
    %c0_53 = arith.constant 0 : index
    %c0_54 = arith.constant 0 : index
    %115 = vector.load %arg21[%c3_52, %c0_53, %c0_54] : memref<8x2x32xf32, #tpu.memory_space<vmem>>, vector<1x2x32xf32>
    %116 = vector.shape_cast %115 : vector<1x2x32xf32> to vector<2x32xf32>
    %117 = vector.shape_cast %114 : vector<2x32xf32> to vector<1x2x32xf32>
    tpu.vector_store %arg21[%c3_52, %c0_53, %c0_54], %117 {strides = array<i32>} : memref<8x2x32xf32, #tpu.memory_space<vmem>>, vector<1x2x32xf32>,
    %c4 = arith.constant 4 : index
    %c0_55 = arith.constant 0 : index
    %c0_56 = arith.constant 0 : index
    %118 = vector.load %arg20[%c4, %c0_55, %c0_56] : memref<8x2x128xf32, #tpu.memory_space<vmem>>, vector<1x2x128xf32>
    %119 = vector.shape_cast %118 : vector<1x2x128xf32> to vector<2x128xf32>
    %cst_57 = arith.constant dense<0.000000e+00> : vector<2x128xf32>
    %120 = tpu.matmul %114, %4, %cst_57 {dimension_numbers = #tpu.dot_dimension_numbers<[1], [0], [0], [1], [0, 0, 1, 1], [], []>} : vector<2x32xf32>, vector<32x128xf32>, vector<2x128xf32> -> vector<2x128xf32>
    %121 = arith.addf %119, %120 : vector<2x128xf32>
    %122 = vector.extract_strided_slice %121 {offsets = [0, 0], sizes = [2, 96], strides = [1, 1]} : vector<2x128xf32> to vector<2x96xf32>
    %cst_58 = arith.constant 5.000000e-01 : f32
    %123 = vector.broadcast %cst_58 : f32 to vector<2x96xf32>
    %124 = arith.mulf %122, %123 : vector<2x96xf32>
    %125 = math.tanh %124 : vector<2x96xf32>
    %cst_59 = arith.constant 5.000000e-01 : f32
    %126 = vector.broadcast %cst_59 : f32 to vector<2x96xf32>
    %127 = arith.mulf %125, %126 : vector<2x96xf32>
    %cst_60 = arith.constant 5.000000e-01 : f32
    %128 = vector.broadcast %cst_60 : f32 to vector<2x96xf32>
    %129 = arith.addf %127, %128 : vector<2x96xf32>
    %130 = vector.extract_strided_slice %129 {offsets = [0, 0], sizes = [2, 32], strides = [1, 1]} : vector<2x96xf32> to vector<2x32xf32>
    %131 = vector.extract_strided_slice %129 {offsets = [0, 32], sizes = [2, 32], strides = [1, 1]} : vector<2x96xf32> to vector<2x32xf32>
    %132 = vector.extract_strided_slice %129 {offsets = [0, 64], sizes = [2, 32], strides = [1, 1]} : vector<2x96xf32> to vector<2x32xf32>
    %133 = vector.extract_strided_slice %121 {offsets = [0, 96], sizes = [2, 32], strides = [1, 1]} : vector<2x128xf32> to vector<2x32xf32>
    %134 = math.tanh %133 : vector<2x32xf32>
    %135 = arith.mulf %131, %112 : vector<2x32xf32>
    %136 = arith.mulf %130, %134 : vector<2x32xf32>
    %137 = arith.addf %135, %136 : vector<2x32xf32>
    %138 = math.tanh %137 : vector<2x32xf32>
    %139 = arith.mulf %132, %138 : vector<2x32xf32>
    %c4_61 = arith.constant 4 : index
    %c0_62 = arith.constant 0 : index
    %c0_63 = arith.constant 0 : index
    %140 = vector.load %arg21[%c4_61, %c0_62, %c0_63] : memref<8x2x32xf32, #tpu.memory_space<vmem>>, vector<1x2x32xf32>
    %141 = vector.shape_cast %140 : vector<1x2x32xf32> to vector<2x32xf32>
    %142 = vector.shape_cast %139 : vector<2x32xf32> to vector<1x2x32xf32>
    tpu.vector_store %arg21[%c4_61, %c0_62, %c0_63], %142 {strides = array<i32>} : memref<8x2x32xf32, #tpu.memory_space<vmem>>, vector<1x2x32xf32>,
    %c5 = arith.constant 5 : index
    %c0_64 = arith.constant 0 : index
    %c0_65 = arith.constant 0 : index
    %143 = vector.load %arg20[%c5, %c0_64, %c0_65] : memref<8x2x128xf32, #tpu.memory_space<vmem>>, vector<1x2x128xf32>
    %144 = vector.shape_cast %143 : vector<1x2x128xf32> to vector<2x128xf32>
    %cst_66 = arith.constant dense<0.000000e+00> : vector<2x128xf32>
    %145 = tpu.matmul %139, %4, %cst_66 {dimension_numbers = #tpu.dot_dimension_numbers<[1], [0], [0], [1], [0, 0, 1, 1], [], []>} : vector<2x32xf32>, vector<32x128xf32>, vector<2x128xf32> -> vector<2x128xf32>
    %146 = arith.addf %144, %145 : vector<2x128xf32>
    %147 = vector.extract_strided_slice %146 {offsets = [0, 0], sizes = [2, 96], strides = [1, 1]} : vector<2x128xf32> to vector<2x96xf32>
    %cst_67 = arith.constant 5.000000e-01 : f32
    %148 = vector.broadcast %cst_67 : f32 to vector<2x96xf32>
    %149 = arith.mulf %147, %148 : vector<2x96xf32>
    %150 = math.tanh %149 : vector<2x96xf32>
    %cst_68 = arith.constant 5.000000e-01 : f32
    %151 = vector.broadcast %cst_68 : f32 to vector<2x96xf32>
    %152 = arith.mulf %150, %151 : vector<2x96xf32>
    %cst_69 = arith.constant 5.000000e-01 : f32
    %153 = vector.broadcast %cst_69 : f32 to vector<2x96xf32>
    %154 = arith.addf %152, %153 : vector<2x96xf32>
    %155 = vector.extract_strided_slice %154 {offsets = [0, 0], sizes = [2, 32], strides = [1, 1]} : vector<2x96xf32> to vector<2x32xf32>
    %156 = vector.extract_strided_slice %154 {offsets = [0, 32], sizes = [2, 32], strides = [1, 1]} : vector<2x96xf32> to vector<2x32xf32>
    %157 = vector.extract_strided_slice %154 {offsets = [0, 64], sizes = [2, 32], strides = [1, 1]} : vector<2x96xf32> to vector<2x32xf32>
    %158 = vector.extract_strided_slice %146 {offsets = [0, 96], sizes = [2, 32], strides = [1, 1]} : vector<2x128xf32> to vector<2x32xf32>
    %159 = math.tanh %158 : vector<2x32xf32>
    %160 = arith.mulf %156, %137 : vector<2x32xf32>
    %161 = arith.mulf %155, %159 : vector<2x32xf32>
    %162 = arith.addf %160, %161 : vector<2x32xf32>
    %163 = math.tanh %162 : vector<2x32xf32>
    %164 = arith.mulf %157, %163 : vector<2x32xf32>
    %c5_70 = arith.constant 5 : index
    %c0_71 = arith.constant 0 : index
    %c0_72 = arith.constant 0 : index
    %165 = vector.load %arg21[%c5_70, %c0_71, %c0_72] : memref<8x2x32xf32, #tpu.memory_space<vmem>>, vector<1x2x32xf32>
    %166 = vector.shape_cast %165 : vector<1x2x32xf32> to vector<2x32xf32>
    %167 = vector.shape_cast %164 : vector<2x32xf32> to vector<1x2x32xf32>
    tpu.vector_store %arg21[%c5_70, %c0_71, %c0_72], %167 {strides = array<i32>} : memref<8x2x32xf32, #tpu.memory_space<vmem>>, vector<1x2x32xf32>,
    %c6 = arith.constant 6 : index
    %c0_73 = arith.constant 0 : index
    %c0_74 = arith.constant 0 : index
    %168 = vector.load %arg20[%c6, %c0_73, %c0_74] : memref<8x2x128xf32, #tpu.memory_space<vmem>>, vector<1x2x128xf32>
    %169 = vector.shape_cast %168 : vector<1x2x128xf32> to vector<2x128xf32>
    %cst_75 = arith.constant dense<0.000000e+00> : vector<2x128xf32>
    %170 = tpu.matmul %164, %4, %cst_75 {dimension_numbers = #tpu.dot_dimension_numbers<[1], [0], [0], [1], [0, 0, 1, 1], [], []>} : vector<2x32xf32>, vector<32x128xf32>, vector<2x128xf32> -> vector<2x128xf32>
    %171 = arith.addf %169, %170 : vector<2x128xf32>
    %172 = vector.extract_strided_slice %171 {offsets = [0, 0], sizes = [2, 96], strides = [1, 1]} : vector<2x128xf32> to vector<2x96xf32>
    %cst_76 = arith.constant 5.000000e-01 : f32
    %173 = vector.broadcast %cst_76 : f32 to vector<2x96xf32>
    %174 = arith.mulf %172, %173 : vector<2x96xf32>
    %175 = math.tanh %174 : vector<2x96xf32>
    %cst_77 = arith.constant 5.000000e-01 : f32
    %176 = vector.broadcast %cst_77 : f32 to vector<2x96xf32>
    %177 = arith.mulf %175, %176 : vector<2x96xf32>
    %cst_78 = arith.constant 5.000000e-01 : f32
    %178 = vector.broadcast %cst_78 : f32 to vector<2x96xf32>
    %179 = arith.addf %177, %178 : vector<2x96xf32>
    %180 = vector.extract_strided_slice %179 {offsets = [0, 0], sizes = [2, 32], strides = [1, 1]} : vector<2x96xf32> to vector<2x32xf32>
    %181 = vector.extract_strided_slice %179 {offsets = [0, 32], sizes = [2, 32], strides = [1, 1]} : vector<2x96xf32> to vector<2x32xf32>
    %182 = vector.extract_strided_slice %179 {offsets = [0, 64], sizes = [2, 32], strides = [1, 1]} : vector<2x96xf32> to vector<2x32xf32>
    %183 = vector.extract_strided_slice %171 {offsets = [0, 96], sizes = [2, 32], strides = [1, 1]} : vector<2x128xf32> to vector<2x32xf32>
    %184 = math.tanh %183 : vector<2x32xf32>
    %185 = arith.mulf %181, %162 : vector<2x32xf32>
    %186 = arith.mulf %180, %184 : vector<2x32xf32>
    %187 = arith.addf %185, %186 : vector<2x32xf32>
    %188 = math.tanh %187 : vector<2x32xf32>
    %189 = arith.mulf %182, %188 : vector<2x32xf32>
    %c6_79 = arith.constant 6 : index
    %c0_80 = arith.constant 0 : index
    %c0_81 = arith.constant 0 : index
    %190 = vector.load %arg21[%c6_79, %c0_80, %c0_81] : memref<8x2x32xf32, #tpu.memory_space<vmem>>, vector<1x2x32xf32>
    %191 = vector.shape_cast %190 : vector<1x2x32xf32> to vector<2x32xf32>
    %192 = vector.shape_cast %189 : vector<2x32xf32> to vector<1x2x32xf32>
    tpu.vector_store %arg21[%c6_79, %c0_80, %c0_81], %192 {strides = array<i32>} : memref<8x2x32xf32, #tpu.memory_space<vmem>>, vector<1x2x32xf32>,
    %c7 = arith.constant 7 : index
    %c0_82 = arith.constant 0 : index
    %c0_83 = arith.constant 0 : index
    %193 = vector.load %arg20[%c7, %c0_82, %c0_83] : memref<8x2x128xf32, #tpu.memory_space<vmem>>, vector<1x2x128xf32>
    %194 = vector.shape_cast %193 : vector<1x2x128xf32> to vector<2x128xf32>
    %cst_84 = arith.constant dense<0.000000e+00> : vector<2x128xf32>
    %195 = tpu.matmul %189, %4, %cst_84 {dimension_numbers = #tpu.dot_dimension_numbers<[1], [0], [0], [1], [0, 0, 1, 1], [], []>} : vector<2x32xf32>, vector<32x128xf32>, vector<2x128xf32> -> vector<2x128xf32>
    %196 = arith.addf %194, %195 : vector<2x128xf32>
    %197 = vector.extract_strided_slice %196 {offsets = [0, 0], sizes = [2, 96], strides = [1, 1]} : vector<2x128xf32> to vector<2x96xf32>
    %cst_85 = arith.constant 5.000000e-01 : f32
    %198 = vector.broadcast %cst_85 : f32 to vector<2x96xf32>
    %199 = arith.mulf %197, %198 : vector<2x96xf32>
    %200 = math.tanh %199 : vector<2x96xf32>
    %cst_86 = arith.constant 5.000000e-01 : f32
    %201 = vector.broadcast %cst_86 : f32 to vector<2x96xf32>
    %202 = arith.mulf %200, %201 : vector<2x96xf32>
    %cst_87 = arith.constant 5.000000e-01 : f32
    %203 = vector.broadcast %cst_87 : f32 to vector<2x96xf32>
    %204 = arith.addf %202, %203 : vector<2x96xf32>
    %205 = vector.extract_strided_slice %204 {offsets = [0, 0], sizes = [2, 32], strides = [1, 1]} : vector<2x96xf32> to vector<2x32xf32>
    %206 = vector.extract_strided_slice %204 {offsets = [0, 32], sizes = [2, 32], strides = [1, 1]} : vector<2x96xf32> to vector<2x32xf32>
    %207 = vector.extract_strided_slice %204 {offsets = [0, 64], sizes = [2, 32], strides = [1, 1]} : vector<2x96xf32> to vector<2x32xf32>
    %208 = vector.extract_strided_slice %196 {offsets = [0, 96], sizes = [2, 32], strides = [1, 1]} : vector<2x128xf32> to vector<2x32xf32>
    %209 = math.tanh %208 : vector<2x32xf32>
    %210 = arith.mulf %206, %187 : vector<2x32xf32>
    %211 = arith.mulf %205, %209 : vector<2x32xf32>
    %212 = arith.addf %210, %211 : vector<2x32xf32>
    %213 = math.tanh %212 : vector<2x32xf32>
    %214 = arith.mulf %207, %213 : vector<2x32xf32>
    %c7_88 = arith.constant 7 : index
    %c0_89 = arith.constant 0 : index
    %c0_90 = arith.constant 0 : index
    %215 = vector.load %arg21[%c7_88, %c0_89, %c0_90] : memref<8x2x32xf32, #tpu.memory_space<vmem>>, vector<1x2x32xf32>
    %216 = vector.shape_cast %215 : vector<1x2x32xf32> to vector<2x32xf32>
    %217 = vector.shape_cast %214 : vector<2x32xf32> to vector<1x2x32xf32>
    tpu.vector_store %arg21[%c7_88, %c0_89, %c0_90], %217 {strides = array<i32>} : memref<8x2x32xf32, #tpu.memory_space<vmem>>, vector<1x2x32xf32>,
    %c0_91 = arith.constant 0 : index
    %c0_92 = arith.constant 0 : index
    %c0_93 = arith.constant 0 : index
    %218 = vector.load %arg17[%c0_91, %c0_92, %c0_93] : memref<2x2x32xf32, #tpu.memory_space<vmem>>, vector<1x2x32xf32>
    %219 = vector.shape_cast %218 : vector<1x2x32xf32> to vector<2x32xf32>
    %220 = vector.shape_cast %214 : vector<2x32xf32> to vector<1x2x32xf32>
    tpu.vector_store %arg17[%c0_91, %c0_92, %c0_93], %220 {strides = array<i32>} : memref<2x2x32xf32, #tpu.memory_space<vmem>>, vector<1x2x32xf32>,
    %c0_94 = arith.constant 0 : index
    %c0_95 = arith.constant 0 : index
    %c0_96 = arith.constant 0 : index
    %221 = vector.load %arg18[%c0_94, %c0_95, %c0_96] : memref<2x2x32xf32, #tpu.memory_space<vmem>>, vector<1x2x32xf32>
    %222 = vector.shape_cast %221 : vector<1x2x32xf32> to vector<2x32xf32>
    %223 = vector.shape_cast %212 : vector<2x32xf32> to vector<1x2x32xf32>
    tpu.vector_store %arg18[%c0_94, %c0_95, %c0_96], %223 {strides = array<i32>} : memref<2x2x32xf32, #tpu.memory_space<vmem>>, vector<1x2x32xf32>,
    %c0_97 = arith.constant 0 : index
    %c0_98 = arith.constant 0 : index
    %224 = vector.load %arg5[%c0_97, %c0_98] : memref<32x128xf32, #tpu.memory_space<vmem>>, vector<32x128xf32>
    %c0_99 = arith.constant 0 : index
    %c0_100 = arith.constant 0 : index
    %225 = vector.load %arg6[%c0_99, %c0_100] : memref<32x128xf32, #tpu.memory_space<vmem>>, vector<32x128xf32>
    %c0_101 = arith.constant 0 : index
    %c0_102 = arith.constant 0 : index
    %226 = vector.load %arg7[%c0_101, %c0_102] : memref<1x128xf32, #tpu.memory_space<vmem>>, vector<1x128xf32>
    %c0_103 = arith.constant 0 : index
    %c0_104 = arith.constant 0 : index
    %c0_105 = arith.constant 0 : index
    %227 = vector.load %arg21[%c0_103, %c0_104, %c0_105] : memref<8x2x32xf32, #tpu.memory_space<vmem>>, vector<8x2x32xf32>
    %228 = vector.shape_cast %227 : vector<8x2x32xf32> to vector<16x32xf32>
    %cst_106 = arith.constant dense<0.000000e+00> : vector<16x128xf32>
    %229 = tpu.matmul %228, %224, %cst_106 {dimension_numbers = #tpu.dot_dimension_numbers<[1], [0], [0], [1], [0, 0, 1, 1], [], []>} : vector<16x32xf32>, vector<32x128xf32>, vector<16x128xf32> -> vector<16x128xf32>
    %230 = vector.broadcast %226 : vector<1x128xf32> to vector<16x128xf32>
    %231 = arith.addf %229, %230 : vector<16x128xf32>
    %232 = vector.shape_cast %231 : vector<16x128xf32> to vector<8x2x128xf32>
    %c0_107 = arith.constant 0 : index
    %c0_108 = arith.constant 0 : index
    %c0_109 = arith.constant 0 : index
    %233 = vector.load %arg20[%c0_107, %c0_108, %c0_109] : memref<8x2x128xf32, #tpu.memory_space<vmem>>, vector<8x2x128xf32>
    tpu.vector_store %arg20[%c0_107, %c0_108, %c0_109], %232 {strides = array<i32>} : memref<8x2x128xf32, #tpu.memory_space<vmem>>, vector<8x2x128xf32>,
    %c1_110 = arith.constant 1 : index
    %c0_111 = arith.constant 0 : index
    %c0_112 = arith.constant 0 : index
    %234 = vector.load %arg17[%c1_110, %c0_111, %c0_112] : memref<2x2x32xf32, #tpu.memory_space<vmem>>, vector<1x2x32xf32>
    %235 = vector.shape_cast %234 : vector<1x2x32xf32> to vector<2x32xf32>
    %c1_113 = arith.constant 1 : index
    %c0_114 = arith.constant 0 : index
    %c0_115 = arith.constant 0 : index
    %236 = vector.load %arg18[%c1_113, %c0_114, %c0_115] : memref<2x2x32xf32, #tpu.memory_space<vmem>>, vector<1x2x32xf32>
    %237 = vector.shape_cast %236 : vector<1x2x32xf32> to vector<2x32xf32>
    %cst_116 = arith.constant 0.000000e+00 : f32
    %238 = vector.broadcast %cst_116 : f32 to vector<2x32xf32>
    %c0_117 = arith.constant 0 : index
    %c0_118 = arith.constant 0 : index
    %c0_119 = arith.constant 0 : index
    %239 = vector.load %arg20[%c0_117, %c0_118, %c0_119] : memref<8x2x128xf32, #tpu.memory_space<vmem>>, vector<1x2x128xf32>
    %240 = vector.shape_cast %239 : vector<1x2x128xf32> to vector<2x128xf32>
    %cst_120 = arith.constant dense<0.000000e+00> : vector<2x128xf32>
    %241 = tpu.matmul %235, %225, %cst_120 {dimension_numbers = #tpu.dot_dimension_numbers<[1], [0], [0], [1], [0, 0, 1, 1], [], []>} : vector<2x32xf32>, vector<32x128xf32>, vector<2x128xf32> -> vector<2x128xf32>
    %242 = arith.addf %240, %241 : vector<2x128xf32>
    %243 = vector.extract_strided_slice %242 {offsets = [0, 0], sizes = [2, 96], strides = [1, 1]} : vector<2x128xf32> to vector<2x96xf32>
    %cst_121 = arith.constant 5.000000e-01 : f32
    %244 = vector.broadcast %cst_121 : f32 to vector<2x96xf32>
    %245 = arith.mulf %243, %244 : vector<2x96xf32>
    %246 = math.tanh %245 : vector<2x96xf32>
    %cst_122 = arith.constant 5.000000e-01 : f32
    %247 = vector.broadcast %cst_122 : f32 to vector<2x96xf32>
    %248 = arith.mulf %246, %247 : vector<2x96xf32>
    %cst_123 = arith.constant 5.000000e-01 : f32
    %249 = vector.broadcast %cst_123 : f32 to vector<2x96xf32>
    %250 = arith.addf %248, %249 : vector<2x96xf32>
    %251 = vector.extract_strided_slice %250 {offsets = [0, 0], sizes = [2, 32], strides = [1, 1]} : vector<2x96xf32> to vector<2x32xf32>
    %252 = vector.extract_strided_slice %250 {offsets = [0, 32], sizes = [2, 32], strides = [1, 1]} : vector<2x96xf32> to vector<2x32xf32>
    %253 = vector.extract_strided_slice %250 {offsets = [0, 64], sizes = [2, 32], strides = [1, 1]} : vector<2x96xf32> to vector<2x32xf32>
    %254 = vector.extract_strided_slice %242 {offsets = [0, 96], sizes = [2, 32], strides = [1, 1]} : vector<2x128xf32> to vector<2x32xf32>
    %255 = math.tanh %254 : vector<2x32xf32>
    %256 = arith.mulf %252, %237 : vector<2x32xf32>
    %257 = arith.mulf %251, %255 : vector<2x32xf32>
    %258 = arith.addf %256, %257 : vector<2x32xf32>
    %259 = math.tanh %258 : vector<2x32xf32>
    %260 = arith.mulf %253, %259 : vector<2x32xf32>
    %261 = arith.addf %238, %260 : vector<2x32xf32>
    %c1_124 = arith.constant 1 : index
    %c0_125 = arith.constant 0 : index
    %c0_126 = arith.constant 0 : index
    %262 = vector.load %arg20[%c1_124, %c0_125, %c0_126] : memref<8x2x128xf32, #tpu.memory_space<vmem>>, vector<1x2x128xf32>
    %263 = vector.shape_cast %262 : vector<1x2x128xf32> to vector<2x128xf32>
    %cst_127 = arith.constant dense<0.000000e+00> : vector<2x128xf32>
    %264 = tpu.matmul %260, %225, %cst_127 {dimension_numbers = #tpu.dot_dimension_numbers<[1], [0], [0], [1], [0, 0, 1, 1], [], []>} : vector<2x32xf32>, vector<32x128xf32>, vector<2x128xf32> -> vector<2x128xf32>
    %265 = arith.addf %263, %264 : vector<2x128xf32>
    %266 = vector.extract_strided_slice %265 {offsets = [0, 0], sizes = [2, 96], strides = [1, 1]} : vector<2x128xf32> to vector<2x96xf32>
    %cst_128 = arith.constant 5.000000e-01 : f32
    %267 = vector.broadcast %cst_128 : f32 to vector<2x96xf32>
    %268 = arith.mulf %266, %267 : vector<2x96xf32>
    %269 = math.tanh %268 : vector<2x96xf32>
    %cst_129 = arith.constant 5.000000e-01 : f32
    %270 = vector.broadcast %cst_129 : f32 to vector<2x96xf32>
    %271 = arith.mulf %269, %270 : vector<2x96xf32>
    %cst_130 = arith.constant 5.000000e-01 : f32
    %272 = vector.broadcast %cst_130 : f32 to vector<2x96xf32>
    %273 = arith.addf %271, %272 : vector<2x96xf32>
    %274 = vector.extract_strided_slice %273 {offsets = [0, 0], sizes = [2, 32], strides = [1, 1]} : vector<2x96xf32> to vector<2x32xf32>
    %275 = vector.extract_strided_slice %273 {offsets = [0, 32], sizes = [2, 32], strides = [1, 1]} : vector<2x96xf32> to vector<2x32xf32>
    %276 = vector.extract_strided_slice %273 {offsets = [0, 64], sizes = [2, 32], strides = [1, 1]} : vector<2x96xf32> to vector<2x32xf32>
    %277 = vector.extract_strided_slice %265 {offsets = [0, 96], sizes = [2, 32], strides = [1, 1]} : vector<2x128xf32> to vector<2x32xf32>
    %278 = math.tanh %277 : vector<2x32xf32>
    %279 = arith.mulf %275, %258 : vector<2x32xf32>
    %280 = arith.mulf %274, %278 : vector<2x32xf32>
    %281 = arith.addf %279, %280 : vector<2x32xf32>
    %282 = math.tanh %281 : vector<2x32xf32>
    %283 = arith.mulf %276, %282 : vector<2x32xf32>
    %284 = arith.addf %261, %283 : vector<2x32xf32>
    %c2_131 = arith.constant 2 : index
    %c0_132 = arith.constant 0 : index
    %c0_133 = arith.constant 0 : index
    %285 = vector.load %arg20[%c2_131, %c0_132, %c0_133] : memref<8x2x128xf32, #tpu.memory_space<vmem>>, vector<1x2x128xf32>
    %286 = vector.shape_cast %285 : vector<1x2x128xf32> to vector<2x128xf32>
    %cst_134 = arith.constant dense<0.000000e+00> : vector<2x128xf32>
    %287 = tpu.matmul %283, %225, %cst_134 {dimension_numbers = #tpu.dot_dimension_numbers<[1], [0], [0], [1], [0, 0, 1, 1], [], []>} : vector<2x32xf32>, vector<32x128xf32>, vector<2x128xf32> -> vector<2x128xf32>
    %288 = arith.addf %286, %287 : vector<2x128xf32>
    %289 = vector.extract_strided_slice %288 {offsets = [0, 0], sizes = [2, 96], strides = [1, 1]} : vector<2x128xf32> to vector<2x96xf32>
    %cst_135 = arith.constant 5.000000e-01 : f32
    %290 = vector.broadcast %cst_135 : f32 to vector<2x96xf32>
    %291 = arith.mulf %289, %290 : vector<2x96xf32>
    %292 = math.tanh %291 : vector<2x96xf32>
    %cst_136 = arith.constant 5.000000e-01 : f32
    %293 = vector.broadcast %cst_136 : f32 to vector<2x96xf32>
    %294 = arith.mulf %292, %293 : vector<2x96xf32>
    %cst_137 = arith.constant 5.000000e-01 : f32
    %295 = vector.broadcast %cst_137 : f32 to vector<2x96xf32>
    %296 = arith.addf %294, %295 : vector<2x96xf32>
    %297 = vector.extract_strided_slice %296 {offsets = [0, 0], sizes = [2, 32], strides = [1, 1]} : vector<2x96xf32> to vector<2x32xf32>
    %298 = vector.extract_strided_slice %296 {offsets = [0, 32], sizes = [2, 32], strides = [1, 1]} : vector<2x96xf32> to vector<2x32xf32>
    %299 = vector.extract_strided_slice %296 {offsets = [0, 64], sizes = [2, 32], strides = [1, 1]} : vector<2x96xf32> to vector<2x32xf32>
    %300 = vector.extract_strided_slice %288 {offsets = [0, 96], sizes = [2, 32], strides = [1, 1]} : vector<2x128xf32> to vector<2x32xf32>
    %301 = math.tanh %300 : vector<2x32xf32>
    %302 = arith.mulf %298, %281 : vector<2x32xf32>
    %303 = arith.mulf %297, %301 : vector<2x32xf32>
    %304 = arith.addf %302, %303 : vector<2x32xf32>
    %305 = math.tanh %304 : vector<2x32xf32>
    %306 = arith.mulf %299, %305 : vector<2x32xf32>
    %307 = arith.addf %284, %306 : vector<2x32xf32>
    %c3_138 = arith.constant 3 : index
    %c0_139 = arith.constant 0 : index
    %c0_140 = arith.constant 0 : index
    %308 = vector.load %arg20[%c3_138, %c0_139, %c0_140] : memref<8x2x128xf32, #tpu.memory_space<vmem>>, vector<1x2x128xf32>
    %309 = vector.shape_cast %308 : vector<1x2x128xf32> to vector<2x128xf32>
    %cst_141 = arith.constant dense<0.000000e+00> : vector<2x128xf32>
    %310 = tpu.matmul %306, %225, %cst_141 {dimension_numbers = #tpu.dot_dimension_numbers<[1], [0], [0], [1], [0, 0, 1, 1], [], []>} : vector<2x32xf32>, vector<32x128xf32>, vector<2x128xf32> -> vector<2x128xf32>
    %311 = arith.addf %309, %310 : vector<2x128xf32>
    %312 = vector.extract_strided_slice %311 {offsets = [0, 0], sizes = [2, 96], strides = [1, 1]} : vector<2x128xf32> to vector<2x96xf32>
    %cst_142 = arith.constant 5.000000e-01 : f32
    %313 = vector.broadcast %cst_142 : f32 to vector<2x96xf32>
    %314 = arith.mulf %312, %313 : vector<2x96xf32>
    %315 = math.tanh %314 : vector<2x96xf32>
    %cst_143 = arith.constant 5.000000e-01 : f32
    %316 = vector.broadcast %cst_143 : f32 to vector<2x96xf32>
    %317 = arith.mulf %315, %316 : vector<2x96xf32>
    %cst_144 = arith.constant 5.000000e-01 : f32
    %318 = vector.broadcast %cst_144 : f32 to vector<2x96xf32>
    %319 = arith.addf %317, %318 : vector<2x96xf32>
    %320 = vector.extract_strided_slice %319 {offsets = [0, 0], sizes = [2, 32], strides = [1, 1]} : vector<2x96xf32> to vector<2x32xf32>
    %321 = vector.extract_strided_slice %319 {offsets = [0, 32], sizes = [2, 32], strides = [1, 1]} : vector<2x96xf32> to vector<2x32xf32>
    %322 = vector.extract_strided_slice %319 {offsets = [0, 64], sizes = [2, 32], strides = [1, 1]} : vector<2x96xf32> to vector<2x32xf32>
    %323 = vector.extract_strided_slice %311 {offsets = [0, 96], sizes = [2, 32], strides = [1, 1]} : vector<2x128xf32> to vector<2x32xf32>
    %324 = math.tanh %323 : vector<2x32xf32>
    %325 = arith.mulf %321, %304 : vector<2x32xf32>
    %326 = arith.mulf %320, %324 : vector<2x32xf32>
    %327 = arith.addf %325, %326 : vector<2x32xf32>
    %328 = math.tanh %327 : vector<2x32xf32>
    %329 = arith.mulf %322, %328 : vector<2x32xf32>
    %330 = arith.addf %307, %329 : vector<2x32xf32>
    %c4_145 = arith.constant 4 : index
    %c0_146 = arith.constant 0 : index
    %c0_147 = arith.constant 0 : index
    %331 = vector.load %arg20[%c4_145, %c0_146, %c0_147] : memref<8x2x128xf32, #tpu.memory_space<vmem>>, vector<1x2x128xf32>
    %332 = vector.shape_cast %331 : vector<1x2x128xf32> to vector<2x128xf32>
    %cst_148 = arith.constant dense<0.000000e+00> : vector<2x128xf32>
    %333 = tpu.matmul %329, %225, %cst_148 {dimension_numbers = #tpu.dot_dimension_numbers<[1], [0], [0], [1], [0, 0, 1, 1], [], []>} : vector<2x32xf32>, vector<32x128xf32>, vector<2x128xf32> -> vector<2x128xf32>
    %334 = arith.addf %332, %333 : vector<2x128xf32>
    %335 = vector.extract_strided_slice %334 {offsets = [0, 0], sizes = [2, 96], strides = [1, 1]} : vector<2x128xf32> to vector<2x96xf32>
    %cst_149 = arith.constant 5.000000e-01 : f32
    %336 = vector.broadcast %cst_149 : f32 to vector<2x96xf32>
    %337 = arith.mulf %335, %336 : vector<2x96xf32>
    %338 = math.tanh %337 : vector<2x96xf32>
    %cst_150 = arith.constant 5.000000e-01 : f32
    %339 = vector.broadcast %cst_150 : f32 to vector<2x96xf32>
    %340 = arith.mulf %338, %339 : vector<2x96xf32>
    %cst_151 = arith.constant 5.000000e-01 : f32
    %341 = vector.broadcast %cst_151 : f32 to vector<2x96xf32>
    %342 = arith.addf %340, %341 : vector<2x96xf32>
    %343 = vector.extract_strided_slice %342 {offsets = [0, 0], sizes = [2, 32], strides = [1, 1]} : vector<2x96xf32> to vector<2x32xf32>
    %344 = vector.extract_strided_slice %342 {offsets = [0, 32], sizes = [2, 32], strides = [1, 1]} : vector<2x96xf32> to vector<2x32xf32>
    %345 = vector.extract_strided_slice %342 {offsets = [0, 64], sizes = [2, 32], strides = [1, 1]} : vector<2x96xf32> to vector<2x32xf32>
    %346 = vector.extract_strided_slice %334 {offsets = [0, 96], sizes = [2, 32], strides = [1, 1]} : vector<2x128xf32> to vector<2x32xf32>
    %347 = math.tanh %346 : vector<2x32xf32>
    %348 = arith.mulf %344, %327 : vector<2x32xf32>
    %349 = arith.mulf %343, %347 : vector<2x32xf32>
    %350 = arith.addf %348, %349 : vector<2x32xf32>
    %351 = math.tanh %350 : vector<2x32xf32>
    %352 = arith.mulf %345, %351 : vector<2x32xf32>
    %353 = arith.addf %330, %352 : vector<2x32xf32>
    %c5_152 = arith.constant 5 : index
    %c0_153 = arith.constant 0 : index
    %c0_154 = arith.constant 0 : index
    %354 = vector.load %arg20[%c5_152, %c0_153, %c0_154] : memref<8x2x128xf32, #tpu.memory_space<vmem>>, vector<1x2x128xf32>
    %355 = vector.shape_cast %354 : vector<1x2x128xf32> to vector<2x128xf32>
    %cst_155 = arith.constant dense<0.000000e+00> : vector<2x128xf32>
    %356 = tpu.matmul %352, %225, %cst_155 {dimension_numbers = #tpu.dot_dimension_numbers<[1], [0], [0], [1], [0, 0, 1, 1], [], []>} : vector<2x32xf32>, vector<32x128xf32>, vector<2x128xf32> -> vector<2x128xf32>
    %357 = arith.addf %355, %356 : vector<2x128xf32>
    %358 = vector.extract_strided_slice %357 {offsets = [0, 0], sizes = [2, 96], strides = [1, 1]} : vector<2x128xf32> to vector<2x96xf32>
    %cst_156 = arith.constant 5.000000e-01 : f32
    %359 = vector.broadcast %cst_156 : f32 to vector<2x96xf32>
    %360 = arith.mulf %358, %359 : vector<2x96xf32>
    %361 = math.tanh %360 : vector<2x96xf32>
    %cst_157 = arith.constant 5.000000e-01 : f32
    %362 = vector.broadcast %cst_157 : f32 to vector<2x96xf32>
    %363 = arith.mulf %361, %362 : vector<2x96xf32>
    %cst_158 = arith.constant 5.000000e-01 : f32
    %364 = vector.broadcast %cst_158 : f32 to vector<2x96xf32>
    %365 = arith.addf %363, %364 : vector<2x96xf32>
    %366 = vector.extract_strided_slice %365 {offsets = [0, 0], sizes = [2, 32], strides = [1, 1]} : vector<2x96xf32> to vector<2x32xf32>
    %367 = vector.extract_strided_slice %365 {offsets = [0, 32], sizes = [2, 32], strides = [1, 1]} : vector<2x96xf32> to vector<2x32xf32>
    %368 = vector.extract_strided_slice %365 {offsets = [0, 64], sizes = [2, 32], strides = [1, 1]} : vector<2x96xf32> to vector<2x32xf32>
    %369 = vector.extract_strided_slice %357 {offsets = [0, 96], sizes = [2, 32], strides = [1, 1]} : vector<2x128xf32> to vector<2x32xf32>
    %370 = math.tanh %369 : vector<2x32xf32>
    %371 = arith.mulf %367, %350 : vector<2x32xf32>
    %372 = arith.mulf %366, %370 : vector<2x32xf32>
    %373 = arith.addf %371, %372 : vector<2x32xf32>
    %374 = math.tanh %373 : vector<2x32xf32>
    %375 = arith.mulf %368, %374 : vector<2x32xf32>
    %376 = arith.addf %353, %375 : vector<2x32xf32>
    %c6_159 = arith.constant 6 : index
    %c0_160 = arith.constant 0 : index
    %c0_161 = arith.constant 0 : index
    %377 = vector.load %arg20[%c6_159, %c0_160, %c0_161] : memref<8x2x128xf32, #tpu.memory_space<vmem>>, vector<1x2x128xf32>
    %378 = vector.shape_cast %377 : vector<1x2x128xf32> to vector<2x128xf32>
    %cst_162 = arith.constant dense<0.000000e+00> : vector<2x128xf32>
    %379 = tpu.matmul %375, %225, %cst_162 {dimension_numbers = #tpu.dot_dimension_numbers<[1], [0], [0], [1], [0, 0, 1, 1], [], []>} : vector<2x32xf32>, vector<32x128xf32>, vector<2x128xf32> -> vector<2x128xf32>
    %380 = arith.addf %378, %379 : vector<2x128xf32>
    %381 = vector.extract_strided_slice %380 {offsets = [0, 0], sizes = [2, 96], strides = [1, 1]} : vector<2x128xf32> to vector<2x96xf32>
    %cst_163 = arith.constant 5.000000e-01 : f32
    %382 = vector.broadcast %cst_163 : f32 to vector<2x96xf32>
    %383 = arith.mulf %381, %382 : vector<2x96xf32>
    %384 = math.tanh %383 : vector<2x96xf32>
    %cst_164 = arith.constant 5.000000e-01 : f32
    %385 = vector.broadcast %cst_164 : f32 to vector<2x96xf32>
    %386 = arith.mulf %384, %385 : vector<2x96xf32>
    %cst_165 = arith.constant 5.000000e-01 : f32
    %387 = vector.broadcast %cst_165 : f32 to vector<2x96xf32>
    %388 = arith.addf %386, %387 : vector<2x96xf32>
    %389 = vector.extract_strided_slice %388 {offsets = [0, 0], sizes = [2, 32], strides = [1, 1]} : vector<2x96xf32> to vector<2x32xf32>
    %390 = vector.extract_strided_slice %388 {offsets = [0, 32], sizes = [2, 32], strides = [1, 1]} : vector<2x96xf32> to vector<2x32xf32>
    %391 = vector.extract_strided_slice %388 {offsets = [0, 64], sizes = [2, 32], strides = [1, 1]} : vector<2x96xf32> to vector<2x32xf32>
    %392 = vector.extract_strided_slice %380 {offsets = [0, 96], sizes = [2, 32], strides = [1, 1]} : vector<2x128xf32> to vector<2x32xf32>
    %393 = math.tanh %392 : vector<2x32xf32>
    %394 = arith.mulf %390, %373 : vector<2x32xf32>
    %395 = arith.mulf %389, %393 : vector<2x32xf32>
    %396 = arith.addf %394, %395 : vector<2x32xf32>
    %397 = math.tanh %396 : vector<2x32xf32>
    %398 = arith.mulf %391, %397 : vector<2x32xf32>
    %399 = arith.addf %376, %398 : vector<2x32xf32>
    %c7_166 = arith.constant 7 : index
    %c0_167 = arith.constant 0 : index
    %c0_168 = arith.constant 0 : index
    %400 = vector.load %arg20[%c7_166, %c0_167, %c0_168] : memref<8x2x128xf32, #tpu.memory_space<vmem>>, vector<1x2x128xf32>
    %401 = vector.shape_cast %400 : vector<1x2x128xf32> to vector<2x128xf32>
    %cst_169 = arith.constant dense<0.000000e+00> : vector<2x128xf32>
    %402 = tpu.matmul %398, %225, %cst_169 {dimension_numbers = #tpu.dot_dimension_numbers<[1], [0], [0], [1], [0, 0, 1, 1], [], []>} : vector<2x32xf32>, vector<32x128xf32>, vector<2x128xf32> -> vector<2x128xf32>
    %403 = arith.addf %401, %402 : vector<2x128xf32>
    %404 = vector.extract_strided_slice %403 {offsets = [0, 0], sizes = [2, 96], strides = [1, 1]} : vector<2x128xf32> to vector<2x96xf32>
    %cst_170 = arith.constant 5.000000e-01 : f32
    %405 = vector.broadcast %cst_170 : f32 to vector<2x96xf32>
    %406 = arith.mulf %404, %405 : vector<2x96xf32>
    %407 = math.tanh %406 : vector<2x96xf32>
    %cst_171 = arith.constant 5.000000e-01 : f32
    %408 = vector.broadcast %cst_171 : f32 to vector<2x96xf32>
    %409 = arith.mulf %407, %408 : vector<2x96xf32>
    %cst_172 = arith.constant 5.000000e-01 : f32
    %410 = vector.broadcast %cst_172 : f32 to vector<2x96xf32>
    %411 = arith.addf %409, %410 : vector<2x96xf32>
    %412 = vector.extract_strided_slice %411 {offsets = [0, 0], sizes = [2, 32], strides = [1, 1]} : vector<2x96xf32> to vector<2x32xf32>
    %413 = vector.extract_strided_slice %411 {offsets = [0, 32], sizes = [2, 32], strides = [1, 1]} : vector<2x96xf32> to vector<2x32xf32>
    %414 = vector.extract_strided_slice %411 {offsets = [0, 64], sizes = [2, 32], strides = [1, 1]} : vector<2x96xf32> to vector<2x32xf32>
    %415 = vector.extract_strided_slice %403 {offsets = [0, 96], sizes = [2, 32], strides = [1, 1]} : vector<2x128xf32> to vector<2x32xf32>
    %416 = math.tanh %415 : vector<2x32xf32>
    %417 = arith.mulf %413, %396 : vector<2x32xf32>
    %418 = arith.mulf %412, %416 : vector<2x32xf32>
    %419 = arith.addf %417, %418 : vector<2x32xf32>
    %420 = math.tanh %419 : vector<2x32xf32>
    %421 = arith.mulf %414, %420 : vector<2x32xf32>
    %422 = arith.addf %399, %421 : vector<2x32xf32>
    %c1_173 = arith.constant 1 : index
    %c0_174 = arith.constant 0 : index
    %c0_175 = arith.constant 0 : index
    %423 = vector.load %arg17[%c1_173, %c0_174, %c0_175] : memref<2x2x32xf32, #tpu.memory_space<vmem>>, vector<1x2x32xf32>
    %424 = vector.shape_cast %423 : vector<1x2x32xf32> to vector<2x32xf32>
    %425 = vector.shape_cast %421 : vector<2x32xf32> to vector<1x2x32xf32>
    tpu.vector_store %arg17[%c1_173, %c0_174, %c0_175], %425 {strides = array<i32>} : memref<2x2x32xf32, #tpu.memory_space<vmem>>, vector<1x2x32xf32>,
    %c1_176 = arith.constant 1 : index
    %c0_177 = arith.constant 0 : index
    %c0_178 = arith.constant 0 : index
    %426 = vector.load %arg18[%c1_176, %c0_177, %c0_178] : memref<2x2x32xf32, #tpu.memory_space<vmem>>, vector<1x2x32xf32>
    %427 = vector.shape_cast %426 : vector<1x2x32xf32> to vector<2x32xf32>
    %428 = vector.shape_cast %419 : vector<2x32xf32> to vector<1x2x32xf32>
    tpu.vector_store %arg18[%c1_176, %c0_177, %c0_178], %428 {strides = array<i32>} : memref<2x2x32xf32, #tpu.memory_space<vmem>>, vector<1x2x32xf32>,
    %c0_179 = arith.constant 0 : index
    %c0_180 = arith.constant 0 : index
    %429 = vector.load %arg19[%c0_179, %c0_180] : memref<2x32xf32, #tpu.memory_space<vmem>>, vector<2x32xf32>
    %430 = arith.addf %429, %422 : vector<2x32xf32>
    %c0_181 = arith.constant 0 : index
    %c0_182 = arith.constant 0 : index
    %431 = vector.load %arg19[%c0_181, %c0_182] : memref<2x32xf32, #tpu.memory_space<vmem>>, vector<2x32xf32>
    tpu.vector_store %arg19[%c0_181, %c0_182], %430 {strides = array<i32>} : memref<2x32xf32, #tpu.memory_space<vmem>>, vector<2x32xf32>,
    %c0_i32_183 = arith.constant 0 : i32
    %432 = arith.cmpi eq, %arg0, %c0_i32_183 : i32
    %433 = arith.extui %432 : i1 to i32
    %c0_i32_184 = arith.constant 0 : i32
    %434 = arith.cmpi ne, %433, %c0_i32_184 : i32
    scf.if %434 {
      %c0_185 = arith.constant 0 : index
      %c0_186 = arith.constant 0 : index
      %435 = vector.load %arg19[%c0_185, %c0_186] : memref<2x32xf32, #tpu.memory_space<vmem>>, vector<2x32xf32>
      %c0_187 = arith.constant 0 : index
      %c0_188 = arith.constant 0 : index
      %436 = vector.load %arg8[%c0_187, %c0_188] : memref<32x8xf32, #tpu.memory_space<vmem>>, vector<32x8xf32>
      %cst_189 = arith.constant dense<0.000000e+00> : vector<2x8xf32>
      %437 = tpu.matmul %435, %436, %cst_189 {dimension_numbers = #tpu.dot_dimension_numbers<[1], [0], [0], [1], [0, 0, 1, 1], [], []>} : vector<2x32xf32>, vector<32x8xf32>, vector<2x8xf32> -> vector<2x8xf32>
      %c0_190 = arith.constant 0 : index
      %c0_191 = arith.constant 0 : index
      %438 = vector.load %arg9[%c0_190, %c0_191] : memref<1x8xf32, #tpu.memory_space<vmem>>, vector<1x8xf32>
      %439 = vector.broadcast %438 : vector<1x8xf32> to vector<2x8xf32>
      %440 = arith.addf %437, %439 : vector<2x8xf32>
      %c0_192 = arith.constant 0 : index
      %c0_193 = arith.constant 0 : index
      %441 = vector.load %arg14[%c0_192, %c0_193] : memref<2x8xf32, #tpu.memory_space<vmem>>, vector<2x8xf32>
      tpu.vector_store %arg14[%c0_192, %c0_193], %440 {strides = array<i32>} : memref<2x8xf32, #tpu.memory_space<vmem>>, vector<2x8xf32>,
      %c0_194 = arith.constant 0 : index
      %c0_195 = arith.constant 0 : index
      %442 = vector.load %arg10[%c0_194, %c0_195] : memref<8x8xf32, #tpu.memory_space<vmem>>, vector<8x8xf32>
      %cst_196 = arith.constant dense<0.000000e+00> : vector<2x8xf32>
      %443 = tpu.matmul %440, %442, %cst_196 {dimension_numbers = #tpu.dot_dimension_numbers<[1], [0], [0], [1], [0, 0, 1, 1], [], []>} : vector<2x8xf32>, vector<8x8xf32>, vector<2x8xf32> -> vector<2x8xf32>
      %c0_197 = arith.constant 0 : index
      %c0_198 = arith.constant 0 : index
      %444 = vector.load %arg11[%c0_197, %c0_198] : memref<1x8xf32, #tpu.memory_space<vmem>>, vector<1x8xf32>
      %445 = vector.broadcast %444 : vector<1x8xf32> to vector<2x8xf32>
      %446 = arith.addf %443, %445 : vector<2x8xf32>
      %c0_199 = arith.constant 0 : index
      %c0_200 = arith.constant 0 : index
      %447 = vector.load %arg15[%c0_199, %c0_200] : memref<2x8xf32, #tpu.memory_space<vmem>>, vector<2x8xf32>
      tpu.vector_store %arg15[%c0_199, %c0_200], %446 {strides = array<i32>} : memref<2x8xf32, #tpu.memory_space<vmem>>, vector<2x8xf32>,
      %c0_201 = arith.constant 0 : index
      %c0_202 = arith.constant 0 : index
      %448 = vector.load %arg12[%c0_201, %c0_202] : memref<8x8xf32, #tpu.memory_space<vmem>>, vector<8x8xf32>
      %cst_203 = arith.constant dense<0.000000e+00> : vector<2x8xf32>
      %449 = tpu.matmul %440, %448, %cst_203 {dimension_numbers = #tpu.dot_dimension_numbers<[1], [0], [0], [1], [0, 0, 1, 1], [], []>} : vector<2x8xf32>, vector<8x8xf32>, vector<2x8xf32> -> vector<2x8xf32>
      %c0_204 = arith.constant 0 : index
      %c0_205 = arith.constant 0 : index
      %450 = vector.load %arg13[%c0_204, %c0_205] : memref<1x8xf32, #tpu.memory_space<vmem>>, vector<1x8xf32>
      %451 = vector.broadcast %450 : vector<1x8xf32> to vector<2x8xf32>
      %452 = arith.addf %449, %451 : vector<2x8xf32>
      %c0_206 = arith.constant 0 : index
      %c0_207 = arith.constant 0 : index
      %453 = vector.load %arg16[%c0_206, %c0_207] : memref<2x8xf32, #tpu.memory_space<vmem>>, vector<2x8xf32>
      tpu.vector_store %arg16[%c0_206, %c0_207], %452 {strides = array<i32>} : memref<2x8xf32, #tpu.memory_space<vmem>>, vector<2x8xf32>,
    } else {
    }
    return
  }
  func.func @transform_0(%arg0: i32) -> (i32, i32, i32) {
    %c0_i32 = arith.constant 0 : i32
    %c0_i32_0 = arith.constant 0 : i32
    %c0_i32_1 = arith.constant 0 : i32
    return %c0_i32, %arg0, %c0_i32_0 : i32, i32, i32
  }
  func.func @transform_1(%arg0: i32) -> (i32, i32) {
    %c0_i32 = arith.constant 0 : i32
    %c0_i32_0 = arith.constant 0 : i32
    %c0_i32_1 = arith.constant 0 : i32
    return %c0_i32, %c0_i32_0 : i32, i32
  }
  func.func @transform_2(%arg0: i32) -> (i32, i32) {
    %c0_i32 = arith.constant 0 : i32
    %c0_i32_0 = arith.constant 0 : i32
    %c0_i32_1 = arith.constant 0 : i32
    return %c0_i32, %c0_i32_0 : i32, i32
  }
  func.func @transform_3(%arg0: i32) -> (i32, i32) {
    %c0_i32 = arith.constant 0 : i32
    %c0_i32_0 = arith.constant 0 : i32
    %c0_i32_1 = arith.constant 0 : i32
    return %c0_i32, %c0_i32_0 : i32, i32
  }
  func.func @transform_4(%arg0: i32) -> (i32, i32) {
    %c0_i32 = arith.constant 0 : i32
    %c0_i32_0 = arith.constant 0 : i32
    %c0_i32_1 = arith.constant 0 : i32
    return %c0_i32, %c0_i32_0 : i32, i32
  }
  func.func @transform_5(%arg0: i32) -> (i32, i32) {
    %c0_i32 = arith.constant 0 : i32
    %c0_i32_0 = arith.constant 0 : i32
    %c0_i32_1 = arith.constant 0 : i32
    return %c0_i32, %c0_i32_0 : i32, i32
  }
  func.func @transform_6(%arg0: i32) -> (i32, i32) {
    %c0_i32 = arith.constant 0 : i32
    %c0_i32_0 = arith.constant 0 : i32
    %c0_i32_1 = arith.constant 0 : i32
    return %c0_i32, %c0_i32_0 : i32, i32
  }
  func.func @transform_7(%arg0: i32) -> (i32, i32) {
    %c0_i32 = arith.constant 0 : i32
    %c0_i32_0 = arith.constant 0 : i32
    %c0_i32_1 = arith.constant 0 : i32
    return %c0_i32, %c0_i32_0 : i32, i32
  }
  func.func @transform_8(%arg0: i32) -> (i32, i32) {
    %c0_i32 = arith.constant 0 : i32
    %c0_i32_0 = arith.constant 0 : i32
    %c0_i32_1 = arith.constant 0 : i32
    return %c0_i32, %c0_i32_0 : i32, i32
  }
  func.func @transform_9(%arg0: i32) -> (i32, i32) {
    %c0_i32 = arith.constant 0 : i32
    %c0_i32_0 = arith.constant 0 : i32
    %c0_i32_1 = arith.constant 0 : i32
    return %c0_i32, %c0_i32_0 : i32, i32
  }
  func.func @transform_10(%arg0: i32) -> (i32, i32) {
    %c0_i32 = arith.constant 0 : i32
    %c0_i32_0 = arith.constant 0 : i32
    %c0_i32_1 = arith.constant 0 : i32
    return %c0_i32, %c0_i32_0 : i32, i32
  }
  func.func @transform_11(%arg0: i32) -> (i32, i32) {
    %c0_i32 = arith.constant 0 : i32
    %c0_i32_0 = arith.constant 0 : i32
    %c0_i32_1 = arith.constant 0 : i32
    return %c0_i32, %c0_i32_0 : i32, i32
  }
  func.func @transform_12(%arg0: i32) -> (i32, i32) {
    %c0_i32 = arith.constant 0 : i32
    %c0_i32_0 = arith.constant 0 : i32
    %c0_i32_1 = arith.constant 0 : i32
    return %c0_i32, %c0_i32_0 : i32, i32
  }
  func.func @transform_13(%arg0: i32) -> (i32, i32) {
    %c0_i32 = arith.constant 0 : i32
    %c0_i32_0 = arith.constant 0 : i32
    %c0_i32_1 = arith.constant 0 : i32
    return %c0_i32, %c0_i32_0 : i32, i32
  }
  func.func @transform_14(%arg0: i32) -> (i32, i32) {
    %c0_i32 = arith.constant 0 : i32
    %c0_i32_0 = arith.constant 0 : i32
    %c0_i32_1 = arith.constant 0 : i32
    return %c0_i32, %c0_i32_0 : i32, i32
  }
  func.func @transform_15(%arg0: i32) -> (i32, i32) {
    %c0_i32 = arith.constant 0 : i32
    %c0_i32_0 = arith.constant 0 : i32
    %c0_i32_1 = arith.constant 0 : i32
    return %c0_i32, %c0_i32_0 : i32, i32
  }
}

module attributes {stable_mosaic.version = 11 : i64} {
  func.func @_lstm_encoder_kernel(%arg0: i32, %arg1: memref<2x8x16xf32, #tpu.memory_space<vmem>>, %arg2: memref<16x128xf32, #tpu.memory_space<vmem>>, %arg3: memref<32x128xf32, #tpu.memory_space<vmem>>, %arg4: memref<1x128xf32, #tpu.memory_space<vmem>>, %arg5: memref<32x128xf32, #tpu.memory_space<vmem>>, %arg6: memref<32x128xf32, #tpu.memory_space<vmem>>, %arg7: memref<1x128xf32, #tpu.memory_space<vmem>>, %arg8: memref<32x8xf32, #tpu.memory_space<vmem>>, %arg9: memref<1x8xf32, #tpu.memory_space<vmem>>, %arg10: memref<8x8xf32, #tpu.memory_space<vmem>>, %arg11: memref<1x8xf32, #tpu.memory_space<vmem>>, %arg12: memref<8x8xf32, #tpu.memory_space<vmem>>, %arg13: memref<1x8xf32, #tpu.memory_space<vmem>>, %arg14: memref<2x8xf32, #tpu.memory_space<vmem>>, %arg15: memref<2x8xf32, #tpu.memory_space<vmem>>, %arg16: memref<2x8xf32, #tpu.memory_space<vmem>>, %arg17: memref<2x2x32xf32, #tpu.memory_space<vmem>>, %arg18: memref<2x2x32xf32, #tpu.memory_space<vmem>>, %arg19: memref<2x32xf32, #tpu.memory_space<vmem>>, %arg20: memref<8x2x128xf32, #tpu.memory_space<vmem>>, %arg21: memref<8x2x32xf32, #tpu.memory_space<vmem>>) attributes {dimension_semantics = [#tpu.dimension_semantics<arbitrary>], iteration_bounds = array<i64: 1>, scalar_prefetch = 0 : i64, scratch_operands = 5 : i64, tpu.core_type = #tpu.core_type<tc>, window_params = [{transform_indices = @transform_0, window_bounds = array<i64: 2, 8, 16>}, {pipeline_mode = #tpu.pipeline_mode<synchronous>, transform_indices = @transform_1, window_bounds = array<i64: 16, 128>}, {pipeline_mode = #tpu.pipeline_mode<synchronous>, transform_indices = @transform_2, window_bounds = array<i64: 32, 128>}, {pipeline_mode = #tpu.pipeline_mode<synchronous>, transform_indices = @transform_3, window_bounds = array<i64: 1, 128>}, {pipeline_mode = #tpu.pipeline_mode<synchronous>, transform_indices = @transform_4, window_bounds = array<i64: 32, 128>}, {pipeline_mode = #tpu.pipeline_mode<synchronous>, transform_indices = @transform_5, window_bounds = array<i64: 32, 128>}, {pipeline_mode = #tpu.pipeline_mode<synchronous>, transform_indices = @transform_6, window_bounds = array<i64: 1, 128>}, {pipeline_mode = #tpu.pipeline_mode<synchronous>, transform_indices = @transform_7, window_bounds = array<i64: 32, 8>}, {pipeline_mode = #tpu.pipeline_mode<synchronous>, transform_indices = @transform_8, window_bounds = array<i64: 1, 8>}, {pipeline_mode = #tpu.pipeline_mode<synchronous>, transform_indices = @transform_9, window_bounds = array<i64: 8, 8>}, {pipeline_mode = #tpu.pipeline_mode<synchronous>, transform_indices = @transform_10, window_bounds = array<i64: 1, 8>}, {pipeline_mode = #tpu.pipeline_mode<synchronous>, transform_indices = @transform_11, window_bounds = array<i64: 8, 8>}, {pipeline_mode = #tpu.pipeline_mode<synchronous>, transform_indices = @transform_12, window_bounds = array<i64: 1, 8>}, {pipeline_mode = #tpu.pipeline_mode<synchronous>, transform_indices = @transform_13, window_bounds = array<i64: 2, 8>}, {pipeline_mode = #tpu.pipeline_mode<synchronous>, transform_indices = @transform_14, window_bounds = array<i64: 2, 8>}, {pipeline_mode = #tpu.pipeline_mode<synchronous>, transform_indices = @transform_15, window_bounds = array<i64: 2, 8>}]} {
    %c0_i32 = arith.constant 0 : i32
    %0 = arith.cmpi eq, %arg0, %c0_i32 : i32
    %1 = arith.extui %0 : i1 to i32
    %c0_i32_0 = arith.constant 0 : i32
    %2 = arith.cmpi ne, %1, %c0_i32_0 : i32
    scf.if %2 {
      %cst_185 = arith.constant 0.000000e+00 : f32
      %435 = vector.broadcast %cst_185 : f32 to vector<2x2x32xf32>
      %c0_186 = arith.constant 0 : index
      %c0_187 = arith.constant 0 : index
      %c0_188 = arith.constant 0 : index
      %436 = vector.load %arg17[%c0_186, %c0_187, %c0_188] : memref<2x2x32xf32, #tpu.memory_space<vmem>>, vector<2x2x32xf32>
      tpu.vector_store %arg17[%c0_186, %c0_187, %c0_188], %435 {strides = array<i32>} : memref<2x2x32xf32, #tpu.memory_space<vmem>>, vector<2x2x32xf32>,
      %cst_189 = arith.constant 0.000000e+00 : f32
      %437 = vector.broadcast %cst_189 : f32 to vector<2x2x32xf32>
      %c0_190 = arith.constant 0 : index
      %c0_191 = arith.constant 0 : index
      %c0_192 = arith.constant 0 : index
      %438 = vector.load %arg18[%c0_190, %c0_191, %c0_192] : memref<2x2x32xf32, #tpu.memory_space<vmem>>, vector<2x2x32xf32>
      tpu.vector_store %arg18[%c0_190, %c0_191, %c0_192], %437 {strides = array<i32>} : memref<2x2x32xf32, #tpu.memory_space<vmem>>, vector<2x2x32xf32>,
      %cst_193 = arith.constant 0.000000e+00 : f32
      %439 = vector.broadcast %cst_193 : f32 to vector<2x32xf32>
      %c0_194 = arith.constant 0 : index
      %c0_195 = arith.constant 0 : index
      %440 = vector.load %arg19[%c0_194, %c0_195] : memref<2x32xf32, #tpu.memory_space<vmem>>, vector<2x32xf32>
      tpu.vector_store %arg19[%c0_194, %c0_195], %439 {strides = array<i32>} : memref<2x32xf32, #tpu.memory_space<vmem>>, vector<2x32xf32>,
    } else {
    }
    %c0 = arith.constant 0 : index
    %c0_1 = arith.constant 0 : index
    %3 = vector.load %arg2[%c0, %c0_1] : memref<16x128xf32, #tpu.memory_space<vmem>>, vector<16x128xf32>
    %c0_2 = arith.constant 0 : index
    %c0_3 = arith.constant 0 : index
    %4 = vector.load %arg3[%c0_2, %c0_3] : memref<32x128xf32, #tpu.memory_space<vmem>>, vector<32x128xf32>
    %c0_4 = arith.constant 0 : index
    %c0_5 = arith.constant 0 : index
    %5 = vector.load %arg4[%c0_4, %c0_5] : memref<1x128xf32, #tpu.memory_space<vmem>>, vector<1x128xf32>
    %c0_6 = arith.constant 0 : index
    %c0_7 = arith.constant 0 : index
    %c0_8 = arith.constant 0 : index
    %6 = vector.load %arg1[%c0_6, %c0_7, %c0_8] : memref<2x8x16xf32, #tpu.memory_space<vmem>>, vector<2x8x16xf32>
    %7 = tpu.transpose %6, [1, 0, 2] : vector<2x8x16xf32> -> vector<8x2x16xf32>
    %8 = vector.shape_cast %7 : vector<8x2x16xf32> to vector<16x16xf32>
    %cst = arith.constant dense<0.000000e+00> : vector<16x128xf32>
    %9 = tpu.matmul %8, %3, %cst {dimension_numbers = #tpu.dot_dimension_numbers<[1], [0], [0], [1], [0, 0, 1, 1], [], []>} : vector<16x16xf32>, vector<16x128xf32>, vector<16x128xf32> -> vector<16x128xf32>
    %10 = vector.broadcast %5 : vector<1x128xf32> to vector<16x128xf32>
    %11 = arith.addf %9, %10 : vector<16x128xf32>
    %12 = vector.shape_cast %11 : vector<16x128xf32> to vector<8x2x128xf32>
    %c0_9 = arith.constant 0 : index
    %c0_10 = arith.constant 0 : index
    %c0_11 = arith.constant 0 : index
    %13 = vector.load %arg20[%c0_9, %c0_10, %c0_11] : memref<8x2x128xf32, #tpu.memory_space<vmem>>, vector<8x2x128xf32>
    tpu.vector_store %arg20[%c0_9, %c0_10, %c0_11], %12 {strides = array<i32>} : memref<8x2x128xf32, #tpu.memory_space<vmem>>, vector<8x2x128xf32>,
    %c0_12 = arith.constant 0 : index
    %c0_13 = arith.constant 0 : index
    %c0_14 = arith.constant 0 : index
    %14 = vector.load %arg17[%c0_12, %c0_13, %c0_14] : memref<2x2x32xf32, #tpu.memory_space<vmem>>, vector<1x2x32xf32>
    %15 = vector.shape_cast %14 : vector<1x2x32xf32> to vector<2x32xf32>
    %c0_15 = arith.constant 0 : index
    %c0_16 = arith.constant 0 : index
    %c0_17 = arith.constant 0 : index
    %16 = vector.load %arg18[%c0_15, %c0_16, %c0_17] : memref<2x2x32xf32, #tpu.memory_space<vmem>>, vector<1x2x32xf32>
    %17 = vector.shape_cast %16 : vector<1x2x32xf32> to vector<2x32xf32>
    %c0_18 = arith.constant 0 : index
    %c0_19 = arith.constant 0 : index
    %c0_20 = arith.constant 0 : index
    %18 = vector.load %arg20[%c0_18, %c0_19, %c0_20] : memref<8x2x128xf32, #tpu.memory_space<vmem>>, vector<1x2x128xf32>
    %19 = vector.shape_cast %18 : vector<1x2x128xf32> to vector<2x128xf32>
    %cst_21 = arith.constant dense<0.000000e+00> : vector<2x128xf32>
    %20 = tpu.matmul %15, %4, %cst_21 {dimension_numbers = #tpu.dot_dimension_numbers<[1], [0], [0], [1], [0, 0, 1, 1], [], []>} : vector<2x32xf32>, vector<32x128xf32>, vector<2x128xf32> -> vector<2x128xf32>
    %21 = arith.addf %19, %20 : vector<2x128xf32>
    %22 = vector.extract_strided_slice %21 {offsets = [0, 0], sizes = [2, 96], strides = [1, 1]} : vector<2x128xf32> to vector<2x96xf32>
    %cst_22 = arith.constant 5.000000e-01 : f32
    %23 = vector.broadcast %cst_22 : f32 to vector<2x96xf32>
    %24 = arith.mulf %22, %23 : vector<2x96xf32>
    %25 = math.tanh %24 : vector<2x96xf32>
    %cst_23 = arith.constant 5.000000e-01 : f32
    %26 = vector.broadcast %cst_23 : f32 to vector<2x96xf32>
    %27 = arith.mulf %25, %26 : vector<2x96xf32>
    %cst_24 = arith.constant 5.000000e-01 : f32
    %28 = vector.broadcast %cst_24 : f32 to vector<2x96xf32>
    %29 = arith.addf %27, %28 : vector<2x96xf32>
    %30 = vector.extract_strided_slice %29 {offsets = [0, 0], sizes = [2, 32], strides = [1, 1]} : vector<2x96xf32> to vector<2x32xf32>
    %31 = vector.extract_strided_slice %29 {offsets = [0, 32], sizes = [2, 32], strides = [1, 1]} : vector<2x96xf32> to vector<2x32xf32>
    %32 = vector.extract_strided_slice %29 {offsets = [0, 64], sizes = [2, 32], strides = [1, 1]} : vector<2x96xf32> to vector<2x32xf32>
    %33 = vector.extract_strided_slice %21 {offsets = [0, 96], sizes = [2, 32], strides = [1, 1]} : vector<2x128xf32> to vector<2x32xf32>
    %34 = math.tanh %33 : vector<2x32xf32>
    %35 = arith.mulf %31, %17 : vector<2x32xf32>
    %36 = arith.mulf %30, %34 : vector<2x32xf32>
    %37 = arith.addf %35, %36 : vector<2x32xf32>
    %38 = math.tanh %37 : vector<2x32xf32>
    %39 = arith.mulf %32, %38 : vector<2x32xf32>
    %c0_25 = arith.constant 0 : index
    %c0_26 = arith.constant 0 : index
    %c0_27 = arith.constant 0 : index
    %40 = vector.load %arg21[%c0_25, %c0_26, %c0_27] : memref<8x2x32xf32, #tpu.memory_space<vmem>>, vector<1x2x32xf32>
    %41 = vector.shape_cast %40 : vector<1x2x32xf32> to vector<2x32xf32>
    %42 = vector.shape_cast %39 : vector<2x32xf32> to vector<1x2x32xf32>
    tpu.vector_store %arg21[%c0_25, %c0_26, %c0_27], %42 {strides = array<i32>} : memref<8x2x32xf32, #tpu.memory_space<vmem>>, vector<1x2x32xf32>,
    %c1 = arith.constant 1 : index
    %c0_28 = arith.constant 0 : index
    %c0_29 = arith.constant 0 : index
    %43 = vector.load %arg20[%c1, %c0_28, %c0_29] : memref<8x2x128xf32, #tpu.memory_space<vmem>>, vector<1x2x128xf32>
    %44 = vector.shape_cast %43 : vector<1x2x128xf32> to vector<2x128xf32>
    %cst_30 = arith.constant dense<0.000000e+00> : vector<2x128xf32>
    %45 = tpu.matmul %39, %4, %cst_30 {dimension_numbers = #tpu.dot_dimension_numbers<[1], [0], [0], [1], [0, 0, 1, 1], [], []>} : vector<2x32xf32>, vector<32x128xf32>, vector<2x128xf32> -> vector<2x128xf32>
    %46 = arith.addf %44, %45 : vector<2x128xf32>
    %47 = vector.extract_strided_slice %46 {offsets = [0, 0], sizes = [2, 96], strides = [1, 1]} : vector<2x128xf32> to vector<2x96xf32>
    %cst_31 = arith.constant 5.000000e-01 : f32
    %48 = vector.broadcast %cst_31 : f32 to vector<2x96xf32>
    %49 = arith.mulf %47, %48 : vector<2x96xf32>
    %50 = math.tanh %49 : vector<2x96xf32>
    %cst_32 = arith.constant 5.000000e-01 : f32
    %51 = vector.broadcast %cst_32 : f32 to vector<2x96xf32>
    %52 = arith.mulf %50, %51 : vector<2x96xf32>
    %cst_33 = arith.constant 5.000000e-01 : f32
    %53 = vector.broadcast %cst_33 : f32 to vector<2x96xf32>
    %54 = arith.addf %52, %53 : vector<2x96xf32>
    %55 = vector.extract_strided_slice %54 {offsets = [0, 0], sizes = [2, 32], strides = [1, 1]} : vector<2x96xf32> to vector<2x32xf32>
    %56 = vector.extract_strided_slice %54 {offsets = [0, 32], sizes = [2, 32], strides = [1, 1]} : vector<2x96xf32> to vector<2x32xf32>
    %57 = vector.extract_strided_slice %54 {offsets = [0, 64], sizes = [2, 32], strides = [1, 1]} : vector<2x96xf32> to vector<2x32xf32>
    %58 = vector.extract_strided_slice %46 {offsets = [0, 96], sizes = [2, 32], strides = [1, 1]} : vector<2x128xf32> to vector<2x32xf32>
    %59 = math.tanh %58 : vector<2x32xf32>
    %60 = arith.mulf %56, %37 : vector<2x32xf32>
    %61 = arith.mulf %55, %59 : vector<2x32xf32>
    %62 = arith.addf %60, %61 : vector<2x32xf32>
    %63 = math.tanh %62 : vector<2x32xf32>
    %64 = arith.mulf %57, %63 : vector<2x32xf32>
    %c1_34 = arith.constant 1 : index
    %c0_35 = arith.constant 0 : index
    %c0_36 = arith.constant 0 : index
    %65 = vector.load %arg21[%c1_34, %c0_35, %c0_36] : memref<8x2x32xf32, #tpu.memory_space<vmem>>, vector<1x2x32xf32>
    %66 = vector.shape_cast %65 : vector<1x2x32xf32> to vector<2x32xf32>
    %67 = vector.shape_cast %64 : vector<2x32xf32> to vector<1x2x32xf32>
    tpu.vector_store %arg21[%c1_34, %c0_35, %c0_36], %67 {strides = array<i32>} : memref<8x2x32xf32, #tpu.memory_space<vmem>>, vector<1x2x32xf32>,
    %c2 = arith.constant 2 : index
    %c0_37 = arith.constant 0 : index
    %c0_38 = arith.constant 0 : index
    %68 = vector.load %arg20[%c2, %c0_37, %c0_38] : memref<8x2x128xf32, #tpu.memory_space<vmem>>, vector<1x2x128xf32>
    %69 = vector.shape_cast %68 : vector<1x2x128xf32> to vector<2x128xf32>
    %cst_39 = arith.constant dense<0.000000e+00> : vector<2x128xf32>
    %70 = tpu.matmul %64, %4, %cst_39 {dimension_numbers = #tpu.dot_dimension_numbers<[1], [0], [0], [1], [0, 0, 1, 1], [], []>} : vector<2x32xf32>, vector<32x128xf32>, vector<2x128xf32> -> vector<2x128xf32>
    %71 = arith.addf %69, %70 : vector<2x128xf32>
    %72 = vector.extract_strided_slice %71 {offsets = [0, 0], sizes = [2, 96], strides = [1, 1]} : vector<2x128xf32> to vector<2x96xf32>
    %cst_40 = arith.constant 5.000000e-01 : f32
    %73 = vector.broadcast %cst_40 : f32 to vector<2x96xf32>
    %74 = arith.mulf %72, %73 : vector<2x96xf32>
    %75 = math.tanh %74 : vector<2x96xf32>
    %cst_41 = arith.constant 5.000000e-01 : f32
    %76 = vector.broadcast %cst_41 : f32 to vector<2x96xf32>
    %77 = arith.mulf %75, %76 : vector<2x96xf32>
    %cst_42 = arith.constant 5.000000e-01 : f32
    %78 = vector.broadcast %cst_42 : f32 to vector<2x96xf32>
    %79 = arith.addf %77, %78 : vector<2x96xf32>
    %80 = vector.extract_strided_slice %79 {offsets = [0, 0], sizes = [2, 32], strides = [1, 1]} : vector<2x96xf32> to vector<2x32xf32>
    %81 = vector.extract_strided_slice %79 {offsets = [0, 32], sizes = [2, 32], strides = [1, 1]} : vector<2x96xf32> to vector<2x32xf32>
    %82 = vector.extract_strided_slice %79 {offsets = [0, 64], sizes = [2, 32], strides = [1, 1]} : vector<2x96xf32> to vector<2x32xf32>
    %83 = vector.extract_strided_slice %71 {offsets = [0, 96], sizes = [2, 32], strides = [1, 1]} : vector<2x128xf32> to vector<2x32xf32>
    %84 = math.tanh %83 : vector<2x32xf32>
    %85 = arith.mulf %81, %62 : vector<2x32xf32>
    %86 = arith.mulf %80, %84 : vector<2x32xf32>
    %87 = arith.addf %85, %86 : vector<2x32xf32>
    %88 = math.tanh %87 : vector<2x32xf32>
    %89 = arith.mulf %82, %88 : vector<2x32xf32>
    %c2_43 = arith.constant 2 : index
    %c0_44 = arith.constant 0 : index
    %c0_45 = arith.constant 0 : index
    %90 = vector.load %arg21[%c2_43, %c0_44, %c0_45] : memref<8x2x32xf32, #tpu.memory_space<vmem>>, vector<1x2x32xf32>
    %91 = vector.shape_cast %90 : vector<1x2x32xf32> to vector<2x32xf32>
    %92 = vector.shape_cast %89 : vector<2x32xf32> to vector<1x2x32xf32>
    tpu.vector_store %arg21[%c2_43, %c0_44, %c0_45], %92 {strides = array<i32>} : memref<8x2x32xf32, #tpu.memory_space<vmem>>, vector<1x2x32xf32>,
    %c3 = arith.constant 3 : index
    %c0_46 = arith.constant 0 : index
    %c0_47 = arith.constant 0 : index
    %93 = vector.load %arg20[%c3, %c0_46, %c0_47] : memref<8x2x128xf32, #tpu.memory_space<vmem>>, vector<1x2x128xf32>
    %94 = vector.shape_cast %93 : vector<1x2x128xf32> to vector<2x128xf32>
    %cst_48 = arith.constant dense<0.000000e+00> : vector<2x128xf32>
    %95 = tpu.matmul %89, %4, %cst_48 {dimension_numbers = #tpu.dot_dimension_numbers<[1], [0], [0], [1], [0, 0, 1, 1], [], []>} : vector<2x32xf32>, vector<32x128xf32>, vector<2x128xf32> -> vector<2x128xf32>
    %96 = arith.addf %94, %95 : vector<2x128xf32>
    %97 = vector.extract_strided_slice %96 {offsets = [0, 0], sizes = [2, 96], strides = [1, 1]} : vector<2x128xf32> to vector<2x96xf32>
    %cst_49 = arith.constant 5.000000e-01 : f32
    %98 = vector.broadcast %cst_49 : f32 to vector<2x96xf32>
    %99 = arith.mulf %97, %98 : vector<2x96xf32>
    %100 = math.tanh %99 : vector<2x96xf32>
    %cst_50 = arith.constant 5.000000e-01 : f32
    %101 = vector.broadcast %cst_50 : f32 to vector<2x96xf32>
    %102 = arith.mulf %100, %101 : vector<2x96xf32>
    %cst_51 = arith.constant 5.000000e-01 : f32
    %103 = vector.broadcast %cst_51 : f32 to vector<2x96xf32>
    %104 = arith.addf %102, %103 : vector<2x96xf32>
    %105 = vector.extract_strided_slice %104 {offsets = [0, 0], sizes = [2, 32], strides = [1, 1]} : vector<2x96xf32> to vector<2x32xf32>
    %106 = vector.extract_strided_slice %104 {offsets = [0, 32], sizes = [2, 32], strides = [1, 1]} : vector<2x96xf32> to vector<2x32xf32>
    %107 = vector.extract_strided_slice %104 {offsets = [0, 64], sizes = [2, 32], strides = [1, 1]} : vector<2x96xf32> to vector<2x32xf32>
    %108 = vector.extract_strided_slice %96 {offsets = [0, 96], sizes = [2, 32], strides = [1, 1]} : vector<2x128xf32> to vector<2x32xf32>
    %109 = math.tanh %108 : vector<2x32xf32>
    %110 = arith.mulf %106, %87 : vector<2x32xf32>
    %111 = arith.mulf %105, %109 : vector<2x32xf32>
    %112 = arith.addf %110, %111 : vector<2x32xf32>
    %113 = math.tanh %112 : vector<2x32xf32>
    %114 = arith.mulf %107, %113 : vector<2x32xf32>
    %c3_52 = arith.constant 3 : index
    %c0_53 = arith.constant 0 : index
    %c0_54 = arith.constant 0 : index
    %115 = vector.load %arg21[%c3_52, %c0_53, %c0_54] : memref<8x2x32xf32, #tpu.memory_space<vmem>>, vector<1x2x32xf32>
    %116 = vector.shape_cast %115 : vector<1x2x32xf32> to vector<2x32xf32>
    %117 = vector.shape_cast %114 : vector<2x32xf32> to vector<1x2x32xf32>
    tpu.vector_store %arg21[%c3_52, %c0_53, %c0_54], %117 {strides = array<i32>} : memref<8x2x32xf32, #tpu.memory_space<vmem>>, vector<1x2x32xf32>,
    %c4 = arith.constant 4 : index
    %c0_55 = arith.constant 0 : index
    %c0_56 = arith.constant 0 : index
    %118 = vector.load %arg20[%c4, %c0_55, %c0_56] : memref<8x2x128xf32, #tpu.memory_space<vmem>>, vector<1x2x128xf32>
    %119 = vector.shape_cast %118 : vector<1x2x128xf32> to vector<2x128xf32>
    %cst_57 = arith.constant dense<0.000000e+00> : vector<2x128xf32>
    %120 = tpu.matmul %114, %4, %cst_57 {dimension_numbers = #tpu.dot_dimension_numbers<[1], [0], [0], [1], [0, 0, 1, 1], [], []>} : vector<2x32xf32>, vector<32x128xf32>, vector<2x128xf32> -> vector<2x128xf32>
    %121 = arith.addf %119, %120 : vector<2x128xf32>
    %122 = vector.extract_strided_slice %121 {offsets = [0, 0], sizes = [2, 96], strides = [1, 1]} : vector<2x128xf32> to vector<2x96xf32>
    %cst_58 = arith.constant 5.000000e-01 : f32
    %123 = vector.broadcast %cst_58 : f32 to vector<2x96xf32>
    %124 = arith.mulf %122, %123 : vector<2x96xf32>
    %125 = math.tanh %124 : vector<2x96xf32>
    %cst_59 = arith.constant 5.000000e-01 : f32
    %126 = vector.broadcast %cst_59 : f32 to vector<2x96xf32>
    %127 = arith.mulf %125, %126 : vector<2x96xf32>
    %cst_60 = arith.constant 5.000000e-01 : f32
    %128 = vector.broadcast %cst_60 : f32 to vector<2x96xf32>
    %129 = arith.addf %127, %128 : vector<2x96xf32>
    %130 = vector.extract_strided_slice %129 {offsets = [0, 0], sizes = [2, 32], strides = [1, 1]} : vector<2x96xf32> to vector<2x32xf32>
    %131 = vector.extract_strided_slice %129 {offsets = [0, 32], sizes = [2, 32], strides = [1, 1]} : vector<2x96xf32> to vector<2x32xf32>
    %132 = vector.extract_strided_slice %129 {offsets = [0, 64], sizes = [2, 32], strides = [1, 1]} : vector<2x96xf32> to vector<2x32xf32>
    %133 = vector.extract_strided_slice %121 {offsets = [0, 96], sizes = [2, 32], strides = [1, 1]} : vector<2x128xf32> to vector<2x32xf32>
    %134 = math.tanh %133 : vector<2x32xf32>
    %135 = arith.mulf %131, %112 : vector<2x32xf32>
    %136 = arith.mulf %130, %134 : vector<2x32xf32>
    %137 = arith.addf %135, %136 : vector<2x32xf32>
    %138 = math.tanh %137 : vector<2x32xf32>
    %139 = arith.mulf %132, %138 : vector<2x32xf32>
    %c4_61 = arith.constant 4 : index
    %c0_62 = arith.constant 0 : index
    %c0_63 = arith.constant 0 : index
    %140 = vector.load %arg21[%c4_61, %c0_62, %c0_63] : memref<8x2x32xf32, #tpu.memory_space<vmem>>, vector<1x2x32xf32>
    %141 = vector.shape_cast %140 : vector<1x2x32xf32> to vector<2x32xf32>
    %142 = vector.shape_cast %139 : vector<2x32xf32> to vector<1x2x32xf32>
    tpu.vector_store %arg21[%c4_61, %c0_62, %c0_63], %142 {strides = array<i32>} : memref<8x2x32xf32, #tpu.memory_space<vmem>>, vector<1x2x32xf32>,
    %c5 = arith.constant 5 : index
    %c0_64 = arith.constant 0 : index
    %c0_65 = arith.constant 0 : index
    %143 = vector.load %arg20[%c5, %c0_64, %c0_65] : memref<8x2x128xf32, #tpu.memory_space<vmem>>, vector<1x2x128xf32>
    %144 = vector.shape_cast %143 : vector<1x2x128xf32> to vector<2x128xf32>
    %cst_66 = arith.constant dense<0.000000e+00> : vector<2x128xf32>
    %145 = tpu.matmul %139, %4, %cst_66 {dimension_numbers = #tpu.dot_dimension_numbers<[1], [0], [0], [1], [0, 0, 1, 1], [], []>} : vector<2x32xf32>, vector<32x128xf32>, vector<2x128xf32> -> vector<2x128xf32>
    %146 = arith.addf %144, %145 : vector<2x128xf32>
    %147 = vector.extract_strided_slice %146 {offsets = [0, 0], sizes = [2, 96], strides = [1, 1]} : vector<2x128xf32> to vector<2x96xf32>
    %cst_67 = arith.constant 5.000000e-01 : f32
    %148 = vector.broadcast %cst_67 : f32 to vector<2x96xf32>
    %149 = arith.mulf %147, %148 : vector<2x96xf32>
    %150 = math.tanh %149 : vector<2x96xf32>
    %cst_68 = arith.constant 5.000000e-01 : f32
    %151 = vector.broadcast %cst_68 : f32 to vector<2x96xf32>
    %152 = arith.mulf %150, %151 : vector<2x96xf32>
    %cst_69 = arith.constant 5.000000e-01 : f32
    %153 = vector.broadcast %cst_69 : f32 to vector<2x96xf32>
    %154 = arith.addf %152, %153 : vector<2x96xf32>
    %155 = vector.extract_strided_slice %154 {offsets = [0, 0], sizes = [2, 32], strides = [1, 1]} : vector<2x96xf32> to vector<2x32xf32>
    %156 = vector.extract_strided_slice %154 {offsets = [0, 32], sizes = [2, 32], strides = [1, 1]} : vector<2x96xf32> to vector<2x32xf32>
    %157 = vector.extract_strided_slice %154 {offsets = [0, 64], sizes = [2, 32], strides = [1, 1]} : vector<2x96xf32> to vector<2x32xf32>
    %158 = vector.extract_strided_slice %146 {offsets = [0, 96], sizes = [2, 32], strides = [1, 1]} : vector<2x128xf32> to vector<2x32xf32>
    %159 = math.tanh %158 : vector<2x32xf32>
    %160 = arith.mulf %156, %137 : vector<2x32xf32>
    %161 = arith.mulf %155, %159 : vector<2x32xf32>
    %162 = arith.addf %160, %161 : vector<2x32xf32>
    %163 = math.tanh %162 : vector<2x32xf32>
    %164 = arith.mulf %157, %163 : vector<2x32xf32>
    %c5_70 = arith.constant 5 : index
    %c0_71 = arith.constant 0 : index
    %c0_72 = arith.constant 0 : index
    %165 = vector.load %arg21[%c5_70, %c0_71, %c0_72] : memref<8x2x32xf32, #tpu.memory_space<vmem>>, vector<1x2x32xf32>
    %166 = vector.shape_cast %165 : vector<1x2x32xf32> to vector<2x32xf32>
    %167 = vector.shape_cast %164 : vector<2x32xf32> to vector<1x2x32xf32>
    tpu.vector_store %arg21[%c5_70, %c0_71, %c0_72], %167 {strides = array<i32>} : memref<8x2x32xf32, #tpu.memory_space<vmem>>, vector<1x2x32xf32>,
    %c6 = arith.constant 6 : index
    %c0_73 = arith.constant 0 : index
    %c0_74 = arith.constant 0 : index
    %168 = vector.load %arg20[%c6, %c0_73, %c0_74] : memref<8x2x128xf32, #tpu.memory_space<vmem>>, vector<1x2x128xf32>
    %169 = vector.shape_cast %168 : vector<1x2x128xf32> to vector<2x128xf32>
    %cst_75 = arith.constant dense<0.000000e+00> : vector<2x128xf32>
    %170 = tpu.matmul %164, %4, %cst_75 {dimension_numbers = #tpu.dot_dimension_numbers<[1], [0], [0], [1], [0, 0, 1, 1], [], []>} : vector<2x32xf32>, vector<32x128xf32>, vector<2x128xf32> -> vector<2x128xf32>
    %171 = arith.addf %169, %170 : vector<2x128xf32>
    %172 = vector.extract_strided_slice %171 {offsets = [0, 0], sizes = [2, 96], strides = [1, 1]} : vector<2x128xf32> to vector<2x96xf32>
    %cst_76 = arith.constant 5.000000e-01 : f32
    %173 = vector.broadcast %cst_76 : f32 to vector<2x96xf32>
    %174 = arith.mulf %172, %173 : vector<2x96xf32>
    %175 = math.tanh %174 : vector<2x96xf32>
    %cst_77 = arith.constant 5.000000e-01 : f32
    %176 = vector.broadcast %cst_77 : f32 to vector<2x96xf32>
    %177 = arith.mulf %175, %176 : vector<2x96xf32>
    %cst_78 = arith.constant 5.000000e-01 : f32
    %178 = vector.broadcast %cst_78 : f32 to vector<2x96xf32>
    %179 = arith.addf %177, %178 : vector<2x96xf32>
    %180 = vector.extract_strided_slice %179 {offsets = [0, 0], sizes = [2, 32], strides = [1, 1]} : vector<2x96xf32> to vector<2x32xf32>
    %181 = vector.extract_strided_slice %179 {offsets = [0, 32], sizes = [2, 32], strides = [1, 1]} : vector<2x96xf32> to vector<2x32xf32>
    %182 = vector.extract_strided_slice %179 {offsets = [0, 64], sizes = [2, 32], strides = [1, 1]} : vector<2x96xf32> to vector<2x32xf32>
    %183 = vector.extract_strided_slice %171 {offsets = [0, 96], sizes = [2, 32], strides = [1, 1]} : vector<2x128xf32> to vector<2x32xf32>
    %184 = math.tanh %183 : vector<2x32xf32>
    %185 = arith.mulf %181, %162 : vector<2x32xf32>
    %186 = arith.mulf %180, %184 : vector<2x32xf32>
    %187 = arith.addf %185, %186 : vector<2x32xf32>
    %188 = math.tanh %187 : vector<2x32xf32>
    %189 = arith.mulf %182, %188 : vector<2x32xf32>
    %c6_79 = arith.constant 6 : index
    %c0_80 = arith.constant 0 : index
    %c0_81 = arith.constant 0 : index
    %190 = vector.load %arg21[%c6_79, %c0_80, %c0_81] : memref<8x2x32xf32, #tpu.memory_space<vmem>>, vector<1x2x32xf32>
    %191 = vector.shape_cast %190 : vector<1x2x32xf32> to vector<2x32xf32>
    %192 = vector.shape_cast %189 : vector<2x32xf32> to vector<1x2x32xf32>
    tpu.vector_store %arg21[%c6_79, %c0_80, %c0_81], %192 {strides = array<i32>} : memref<8x2x32xf32, #tpu.memory_space<vmem>>, vector<1x2x32xf32>,
    %c7 = arith.constant 7 : index
    %c0_82 = arith.constant 0 : index
    %c0_83 = arith.constant 0 : index
    %193 = vector.load %arg20[%c7, %c0_82, %c0_83] : memref<8x2x128xf32, #tpu.memory_space<vmem>>, vector<1x2x128xf32>
    %194 = vector.shape_cast %193 : vector<1x2x128xf32> to vector<2x128xf32>
    %cst_84 = arith.constant dense<0.000000e+00> : vector<2x128xf32>
    %195 = tpu.matmul %189, %4, %cst_84 {dimension_numbers = #tpu.dot_dimension_numbers<[1], [0], [0], [1], [0, 0, 1, 1], [], []>} : vector<2x32xf32>, vector<32x128xf32>, vector<2x128xf32> -> vector<2x128xf32>
    %196 = arith.addf %194, %195 : vector<2x128xf32>
    %197 = vector.extract_strided_slice %196 {offsets = [0, 0], sizes = [2, 96], strides = [1, 1]} : vector<2x128xf32> to vector<2x96xf32>
    %cst_85 = arith.constant 5.000000e-01 : f32
    %198 = vector.broadcast %cst_85 : f32 to vector<2x96xf32>
    %199 = arith.mulf %197, %198 : vector<2x96xf32>
    %200 = math.tanh %199 : vector<2x96xf32>
    %cst_86 = arith.constant 5.000000e-01 : f32
    %201 = vector.broadcast %cst_86 : f32 to vector<2x96xf32>
    %202 = arith.mulf %200, %201 : vector<2x96xf32>
    %cst_87 = arith.constant 5.000000e-01 : f32
    %203 = vector.broadcast %cst_87 : f32 to vector<2x96xf32>
    %204 = arith.addf %202, %203 : vector<2x96xf32>
    %205 = vector.extract_strided_slice %204 {offsets = [0, 0], sizes = [2, 32], strides = [1, 1]} : vector<2x96xf32> to vector<2x32xf32>
    %206 = vector.extract_strided_slice %204 {offsets = [0, 32], sizes = [2, 32], strides = [1, 1]} : vector<2x96xf32> to vector<2x32xf32>
    %207 = vector.extract_strided_slice %204 {offsets = [0, 64], sizes = [2, 32], strides = [1, 1]} : vector<2x96xf32> to vector<2x32xf32>
    %208 = vector.extract_strided_slice %196 {offsets = [0, 96], sizes = [2, 32], strides = [1, 1]} : vector<2x128xf32> to vector<2x32xf32>
    %209 = math.tanh %208 : vector<2x32xf32>
    %210 = arith.mulf %206, %187 : vector<2x32xf32>
    %211 = arith.mulf %205, %209 : vector<2x32xf32>
    %212 = arith.addf %210, %211 : vector<2x32xf32>
    %213 = math.tanh %212 : vector<2x32xf32>
    %214 = arith.mulf %207, %213 : vector<2x32xf32>
    %c7_88 = arith.constant 7 : index
    %c0_89 = arith.constant 0 : index
    %c0_90 = arith.constant 0 : index
    %215 = vector.load %arg21[%c7_88, %c0_89, %c0_90] : memref<8x2x32xf32, #tpu.memory_space<vmem>>, vector<1x2x32xf32>
    %216 = vector.shape_cast %215 : vector<1x2x32xf32> to vector<2x32xf32>
    %217 = vector.shape_cast %214 : vector<2x32xf32> to vector<1x2x32xf32>
    tpu.vector_store %arg21[%c7_88, %c0_89, %c0_90], %217 {strides = array<i32>} : memref<8x2x32xf32, #tpu.memory_space<vmem>>, vector<1x2x32xf32>,
    %c0_91 = arith.constant 0 : index
    %c0_92 = arith.constant 0 : index
    %c0_93 = arith.constant 0 : index
    %218 = vector.load %arg17[%c0_91, %c0_92, %c0_93] : memref<2x2x32xf32, #tpu.memory_space<vmem>>, vector<1x2x32xf32>
    %219 = vector.shape_cast %218 : vector<1x2x32xf32> to vector<2x32xf32>
    %220 = vector.shape_cast %214 : vector<2x32xf32> to vector<1x2x32xf32>
    tpu.vector_store %arg17[%c0_91, %c0_92, %c0_93], %220 {strides = array<i32>} : memref<2x2x32xf32, #tpu.memory_space<vmem>>, vector<1x2x32xf32>,
    %c0_94 = arith.constant 0 : index
    %c0_95 = arith.constant 0 : index
    %c0_96 = arith.constant 0 : index
    %221 = vector.load %arg18[%c0_94, %c0_95, %c0_96] : memref<2x2x32xf32, #tpu.memory_space<vmem>>, vector<1x2x32xf32>
    %222 = vector.shape_cast %221 : vector<1x2x32xf32> to vector<2x32xf32>
    %223 = vector.shape_cast %212 : vector<2x32xf32> to vector<1x2x32xf32>
    tpu.vector_store %arg18[%c0_94, %c0_95, %c0_96], %223 {strides = array<i32>} : memref<2x2x32xf32, #tpu.memory_space<vmem>>, vector<1x2x32xf32>,
    %c0_97 = arith.constant 0 : index
    %c0_98 = arith.constant 0 : index
    %224 = vector.load %arg5[%c0_97, %c0_98] : memref<32x128xf32, #tpu.memory_space<vmem>>, vector<32x128xf32>
    %c0_99 = arith.constant 0 : index
    %c0_100 = arith.constant 0 : index
    %225 = vector.load %arg6[%c0_99, %c0_100] : memref<32x128xf32, #tpu.memory_space<vmem>>, vector<32x128xf32>
    %c0_101 = arith.constant 0 : index
    %c0_102 = arith.constant 0 : index
    %226 = vector.load %arg7[%c0_101, %c0_102] : memref<1x128xf32, #tpu.memory_space<vmem>>, vector<1x128xf32>
    %c0_103 = arith.constant 0 : index
    %c0_104 = arith.constant 0 : index
    %c0_105 = arith.constant 0 : index
    %227 = vector.load %arg21[%c0_103, %c0_104, %c0_105] : memref<8x2x32xf32, #tpu.memory_space<vmem>>, vector<8x2x32xf32>
    %228 = vector.shape_cast %227 : vector<8x2x32xf32> to vector<16x32xf32>
    %cst_106 = arith.constant dense<0.000000e+00> : vector<16x128xf32>
    %229 = tpu.matmul %228, %224, %cst_106 {dimension_numbers = #tpu.dot_dimension_numbers<[1], [0], [0], [1], [0, 0, 1, 1], [], []>} : vector<16x32xf32>, vector<32x128xf32>, vector<16x128xf32> -> vector<16x128xf32>
    %230 = vector.broadcast %226 : vector<1x128xf32> to vector<16x128xf32>
    %231 = arith.addf %229, %230 : vector<16x128xf32>
    %232 = vector.shape_cast %231 : vector<16x128xf32> to vector<8x2x128xf32>
    %c0_107 = arith.constant 0 : index
    %c0_108 = arith.constant 0 : index
    %c0_109 = arith.constant 0 : index
    %233 = vector.load %arg20[%c0_107, %c0_108, %c0_109] : memref<8x2x128xf32, #tpu.memory_space<vmem>>, vector<8x2x128xf32>
    tpu.vector_store %arg20[%c0_107, %c0_108, %c0_109], %232 {strides = array<i32>} : memref<8x2x128xf32, #tpu.memory_space<vmem>>, vector<8x2x128xf32>,
    %c1_110 = arith.constant 1 : index
    %c0_111 = arith.constant 0 : index
    %c0_112 = arith.constant 0 : index
    %234 = vector.load %arg17[%c1_110, %c0_111, %c0_112] : memref<2x2x32xf32, #tpu.memory_space<vmem>>, vector<1x2x32xf32>
    %235 = vector.shape_cast %234 : vector<1x2x32xf32> to vector<2x32xf32>
    %c1_113 = arith.constant 1 : index
    %c0_114 = arith.constant 0 : index
    %c0_115 = arith.constant 0 : index
    %236 = vector.load %arg18[%c1_113, %c0_114, %c0_115] : memref<2x2x32xf32, #tpu.memory_space<vmem>>, vector<1x2x32xf32>
    %237 = vector.shape_cast %236 : vector<1x2x32xf32> to vector<2x32xf32>
    %cst_116 = arith.constant 0.000000e+00 : f32
    %238 = vector.broadcast %cst_116 : f32 to vector<2x32xf32>
    %c0_117 = arith.constant 0 : index
    %c0_118 = arith.constant 0 : index
    %c0_119 = arith.constant 0 : index
    %239 = vector.load %arg20[%c0_117, %c0_118, %c0_119] : memref<8x2x128xf32, #tpu.memory_space<vmem>>, vector<1x2x128xf32>
    %240 = vector.shape_cast %239 : vector<1x2x128xf32> to vector<2x128xf32>
    %cst_120 = arith.constant dense<0.000000e+00> : vector<2x128xf32>
    %241 = tpu.matmul %235, %225, %cst_120 {dimension_numbers = #tpu.dot_dimension_numbers<[1], [0], [0], [1], [0, 0, 1, 1], [], []>} : vector<2x32xf32>, vector<32x128xf32>, vector<2x128xf32> -> vector<2x128xf32>
    %242 = arith.addf %240, %241 : vector<2x128xf32>
    %243 = vector.extract_strided_slice %242 {offsets = [0, 0], sizes = [2, 96], strides = [1, 1]} : vector<2x128xf32> to vector<2x96xf32>
    %cst_121 = arith.constant 5.000000e-01 : f32
    %244 = vector.broadcast %cst_121 : f32 to vector<2x96xf32>
    %245 = arith.mulf %243, %244 : vector<2x96xf32>
    %246 = math.tanh %245 : vector<2x96xf32>
    %cst_122 = arith.constant 5.000000e-01 : f32
    %247 = vector.broadcast %cst_122 : f32 to vector<2x96xf32>
    %248 = arith.mulf %246, %247 : vector<2x96xf32>
    %cst_123 = arith.constant 5.000000e-01 : f32
    %249 = vector.broadcast %cst_123 : f32 to vector<2x96xf32>
    %250 = arith.addf %248, %249 : vector<2x96xf32>
    %251 = vector.extract_strided_slice %250 {offsets = [0, 0], sizes = [2, 32], strides = [1, 1]} : vector<2x96xf32> to vector<2x32xf32>
    %252 = vector.extract_strided_slice %250 {offsets = [0, 32], sizes = [2, 32], strides = [1, 1]} : vector<2x96xf32> to vector<2x32xf32>
    %253 = vector.extract_strided_slice %250 {offsets = [0, 64], sizes = [2, 32], strides = [1, 1]} : vector<2x96xf32> to vector<2x32xf32>
    %254 = vector.extract_strided_slice %242 {offsets = [0, 96], sizes = [2, 32], strides = [1, 1]} : vector<2x128xf32> to vector<2x32xf32>
    %255 = math.tanh %254 : vector<2x32xf32>
    %256 = arith.mulf %252, %237 : vector<2x32xf32>
    %257 = arith.mulf %251, %255 : vector<2x32xf32>
    %258 = arith.addf %256, %257 : vector<2x32xf32>
    %259 = math.tanh %258 : vector<2x32xf32>
    %260 = arith.mulf %253, %259 : vector<2x32xf32>
    %261 = arith.addf %238, %260 : vector<2x32xf32>
    %c1_124 = arith.constant 1 : index
    %c0_125 = arith.constant 0 : index
    %c0_126 = arith.constant 0 : index
    %262 = vector.load %arg20[%c1_124, %c0_125, %c0_126] : memref<8x2x128xf32, #tpu.memory_space<vmem>>, vector<1x2x128xf32>
    %263 = vector.shape_cast %262 : vector<1x2x128xf32> to vector<2x128xf32>
    %cst_127 = arith.constant dense<0.000000e+00> : vector<2x128xf32>
    %264 = tpu.matmul %260, %225, %cst_127 {dimension_numbers = #tpu.dot_dimension_numbers<[1], [0], [0], [1], [0, 0, 1, 1], [], []>} : vector<2x32xf32>, vector<32x128xf32>, vector<2x128xf32> -> vector<2x128xf32>
    %265 = arith.addf %263, %264 : vector<2x128xf32>
    %266 = vector.extract_strided_slice %265 {offsets = [0, 0], sizes = [2, 96], strides = [1, 1]} : vector<2x128xf32> to vector<2x96xf32>
    %cst_128 = arith.constant 5.000000e-01 : f32
    %267 = vector.broadcast %cst_128 : f32 to vector<2x96xf32>
    %268 = arith.mulf %266, %267 : vector<2x96xf32>
    %269 = math.tanh %268 : vector<2x96xf32>
    %cst_129 = arith.constant 5.000000e-01 : f32
    %270 = vector.broadcast %cst_129 : f32 to vector<2x96xf32>
    %271 = arith.mulf %269, %270 : vector<2x96xf32>
    %cst_130 = arith.constant 5.000000e-01 : f32
    %272 = vector.broadcast %cst_130 : f32 to vector<2x96xf32>
    %273 = arith.addf %271, %272 : vector<2x96xf32>
    %274 = vector.extract_strided_slice %273 {offsets = [0, 0], sizes = [2, 32], strides = [1, 1]} : vector<2x96xf32> to vector<2x32xf32>
    %275 = vector.extract_strided_slice %273 {offsets = [0, 32], sizes = [2, 32], strides = [1, 1]} : vector<2x96xf32> to vector<2x32xf32>
    %276 = vector.extract_strided_slice %273 {offsets = [0, 64], sizes = [2, 32], strides = [1, 1]} : vector<2x96xf32> to vector<2x32xf32>
    %277 = vector.extract_strided_slice %265 {offsets = [0, 96], sizes = [2, 32], strides = [1, 1]} : vector<2x128xf32> to vector<2x32xf32>
    %278 = math.tanh %277 : vector<2x32xf32>
    %279 = arith.mulf %275, %258 : vector<2x32xf32>
    %280 = arith.mulf %274, %278 : vector<2x32xf32>
    %281 = arith.addf %279, %280 : vector<2x32xf32>
    %282 = math.tanh %281 : vector<2x32xf32>
    %283 = arith.mulf %276, %282 : vector<2x32xf32>
    %284 = arith.addf %261, %283 : vector<2x32xf32>
    %c2_131 = arith.constant 2 : index
    %c0_132 = arith.constant 0 : index
    %c0_133 = arith.constant 0 : index
    %285 = vector.load %arg20[%c2_131, %c0_132, %c0_133] : memref<8x2x128xf32, #tpu.memory_space<vmem>>, vector<1x2x128xf32>
    %286 = vector.shape_cast %285 : vector<1x2x128xf32> to vector<2x128xf32>
    %cst_134 = arith.constant dense<0.000000e+00> : vector<2x128xf32>
    %287 = tpu.matmul %283, %225, %cst_134 {dimension_numbers = #tpu.dot_dimension_numbers<[1], [0], [0], [1], [0, 0, 1, 1], [], []>} : vector<2x32xf32>, vector<32x128xf32>, vector<2x128xf32> -> vector<2x128xf32>
    %288 = arith.addf %286, %287 : vector<2x128xf32>
    %289 = vector.extract_strided_slice %288 {offsets = [0, 0], sizes = [2, 96], strides = [1, 1]} : vector<2x128xf32> to vector<2x96xf32>
    %cst_135 = arith.constant 5.000000e-01 : f32
    %290 = vector.broadcast %cst_135 : f32 to vector<2x96xf32>
    %291 = arith.mulf %289, %290 : vector<2x96xf32>
    %292 = math.tanh %291 : vector<2x96xf32>
    %cst_136 = arith.constant 5.000000e-01 : f32
    %293 = vector.broadcast %cst_136 : f32 to vector<2x96xf32>
    %294 = arith.mulf %292, %293 : vector<2x96xf32>
    %cst_137 = arith.constant 5.000000e-01 : f32
    %295 = vector.broadcast %cst_137 : f32 to vector<2x96xf32>
    %296 = arith.addf %294, %295 : vector<2x96xf32>
    %297 = vector.extract_strided_slice %296 {offsets = [0, 0], sizes = [2, 32], strides = [1, 1]} : vector<2x96xf32> to vector<2x32xf32>
    %298 = vector.extract_strided_slice %296 {offsets = [0, 32], sizes = [2, 32], strides = [1, 1]} : vector<2x96xf32> to vector<2x32xf32>
    %299 = vector.extract_strided_slice %296 {offsets = [0, 64], sizes = [2, 32], strides = [1, 1]} : vector<2x96xf32> to vector<2x32xf32>
    %300 = vector.extract_strided_slice %288 {offsets = [0, 96], sizes = [2, 32], strides = [1, 1]} : vector<2x128xf32> to vector<2x32xf32>
    %301 = math.tanh %300 : vector<2x32xf32>
    %302 = arith.mulf %298, %281 : vector<2x32xf32>
    %303 = arith.mulf %297, %301 : vector<2x32xf32>
    %304 = arith.addf %302, %303 : vector<2x32xf32>
    %305 = math.tanh %304 : vector<2x32xf32>
    %306 = arith.mulf %299, %305 : vector<2x32xf32>
    %307 = arith.addf %284, %306 : vector<2x32xf32>
    %c3_138 = arith.constant 3 : index
    %c0_139 = arith.constant 0 : index
    %c0_140 = arith.constant 0 : index
    %308 = vector.load %arg20[%c3_138, %c0_139, %c0_140] : memref<8x2x128xf32, #tpu.memory_space<vmem>>, vector<1x2x128xf32>
    %309 = vector.shape_cast %308 : vector<1x2x128xf32> to vector<2x128xf32>
    %cst_141 = arith.constant dense<0.000000e+00> : vector<2x128xf32>
    %310 = tpu.matmul %306, %225, %cst_141 {dimension_numbers = #tpu.dot_dimension_numbers<[1], [0], [0], [1], [0, 0, 1, 1], [], []>} : vector<2x32xf32>, vector<32x128xf32>, vector<2x128xf32> -> vector<2x128xf32>
    %311 = arith.addf %309, %310 : vector<2x128xf32>
    %312 = vector.extract_strided_slice %311 {offsets = [0, 0], sizes = [2, 96], strides = [1, 1]} : vector<2x128xf32> to vector<2x96xf32>
    %cst_142 = arith.constant 5.000000e-01 : f32
    %313 = vector.broadcast %cst_142 : f32 to vector<2x96xf32>
    %314 = arith.mulf %312, %313 : vector<2x96xf32>
    %315 = math.tanh %314 : vector<2x96xf32>
    %cst_143 = arith.constant 5.000000e-01 : f32
    %316 = vector.broadcast %cst_143 : f32 to vector<2x96xf32>
    %317 = arith.mulf %315, %316 : vector<2x96xf32>
    %cst_144 = arith.constant 5.000000e-01 : f32
    %318 = vector.broadcast %cst_144 : f32 to vector<2x96xf32>
    %319 = arith.addf %317, %318 : vector<2x96xf32>
    %320 = vector.extract_strided_slice %319 {offsets = [0, 0], sizes = [2, 32], strides = [1, 1]} : vector<2x96xf32> to vector<2x32xf32>
    %321 = vector.extract_strided_slice %319 {offsets = [0, 32], sizes = [2, 32], strides = [1, 1]} : vector<2x96xf32> to vector<2x32xf32>
    %322 = vector.extract_strided_slice %319 {offsets = [0, 64], sizes = [2, 32], strides = [1, 1]} : vector<2x96xf32> to vector<2x32xf32>
    %323 = vector.extract_strided_slice %311 {offsets = [0, 96], sizes = [2, 32], strides = [1, 1]} : vector<2x128xf32> to vector<2x32xf32>
    %324 = math.tanh %323 : vector<2x32xf32>
    %325 = arith.mulf %321, %304 : vector<2x32xf32>
    %326 = arith.mulf %320, %324 : vector<2x32xf32>
    %327 = arith.addf %325, %326 : vector<2x32xf32>
    %328 = math.tanh %327 : vector<2x32xf32>
    %329 = arith.mulf %322, %328 : vector<2x32xf32>
    %330 = arith.addf %307, %329 : vector<2x32xf32>
    %c4_145 = arith.constant 4 : index
    %c0_146 = arith.constant 0 : index
    %c0_147 = arith.constant 0 : index
    %331 = vector.load %arg20[%c4_145, %c0_146, %c0_147] : memref<8x2x128xf32, #tpu.memory_space<vmem>>, vector<1x2x128xf32>
    %332 = vector.shape_cast %331 : vector<1x2x128xf32> to vector<2x128xf32>
    %cst_148 = arith.constant dense<0.000000e+00> : vector<2x128xf32>
    %333 = tpu.matmul %329, %225, %cst_148 {dimension_numbers = #tpu.dot_dimension_numbers<[1], [0], [0], [1], [0, 0, 1, 1], [], []>} : vector<2x32xf32>, vector<32x128xf32>, vector<2x128xf32> -> vector<2x128xf32>
    %334 = arith.addf %332, %333 : vector<2x128xf32>
    %335 = vector.extract_strided_slice %334 {offsets = [0, 0], sizes = [2, 96], strides = [1, 1]} : vector<2x128xf32> to vector<2x96xf32>
    %cst_149 = arith.constant 5.000000e-01 : f32
    %336 = vector.broadcast %cst_149 : f32 to vector<2x96xf32>
    %337 = arith.mulf %335, %336 : vector<2x96xf32>
    %338 = math.tanh %337 : vector<2x96xf32>
    %cst_150 = arith.constant 5.000000e-01 : f32
    %339 = vector.broadcast %cst_150 : f32 to vector<2x96xf32>
    %340 = arith.mulf %338, %339 : vector<2x96xf32>
    %cst_151 = arith.constant 5.000000e-01 : f32
    %341 = vector.broadcast %cst_151 : f32 to vector<2x96xf32>
    %342 = arith.addf %340, %341 : vector<2x96xf32>
    %343 = vector.extract_strided_slice %342 {offsets = [0, 0], sizes = [2, 32], strides = [1, 1]} : vector<2x96xf32> to vector<2x32xf32>
    %344 = vector.extract_strided_slice %342 {offsets = [0, 32], sizes = [2, 32], strides = [1, 1]} : vector<2x96xf32> to vector<2x32xf32>
    %345 = vector.extract_strided_slice %342 {offsets = [0, 64], sizes = [2, 32], strides = [1, 1]} : vector<2x96xf32> to vector<2x32xf32>
    %346 = vector.extract_strided_slice %334 {offsets = [0, 96], sizes = [2, 32], strides = [1, 1]} : vector<2x128xf32> to vector<2x32xf32>
    %347 = math.tanh %346 : vector<2x32xf32>
    %348 = arith.mulf %344, %327 : vector<2x32xf32>
    %349 = arith.mulf %343, %347 : vector<2x32xf32>
    %350 = arith.addf %348, %349 : vector<2x32xf32>
    %351 = math.tanh %350 : vector<2x32xf32>
    %352 = arith.mulf %345, %351 : vector<2x32xf32>
    %353 = arith.addf %330, %352 : vector<2x32xf32>
    %c5_152 = arith.constant 5 : index
    %c0_153 = arith.constant 0 : index
    %c0_154 = arith.constant 0 : index
    %354 = vector.load %arg20[%c5_152, %c0_153, %c0_154] : memref<8x2x128xf32, #tpu.memory_space<vmem>>, vector<1x2x128xf32>
    %355 = vector.shape_cast %354 : vector<1x2x128xf32> to vector<2x128xf32>
    %cst_155 = arith.constant dense<0.000000e+00> : vector<2x128xf32>
    %356 = tpu.matmul %352, %225, %cst_155 {dimension_numbers = #tpu.dot_dimension_numbers<[1], [0], [0], [1], [0, 0, 1, 1], [], []>} : vector<2x32xf32>, vector<32x128xf32>, vector<2x128xf32> -> vector<2x128xf32>
    %357 = arith.addf %355, %356 : vector<2x128xf32>
    %358 = vector.extract_strided_slice %357 {offsets = [0, 0], sizes = [2, 96], strides = [1, 1]} : vector<2x128xf32> to vector<2x96xf32>
    %cst_156 = arith.constant 5.000000e-01 : f32
    %359 = vector.broadcast %cst_156 : f32 to vector<2x96xf32>
    %360 = arith.mulf %358, %359 : vector<2x96xf32>
    %361 = math.tanh %360 : vector<2x96xf32>
    %cst_157 = arith.constant 5.000000e-01 : f32
    %362 = vector.broadcast %cst_157 : f32 to vector<2x96xf32>
    %363 = arith.mulf %361, %362 : vector<2x96xf32>
    %cst_158 = arith.constant 5.000000e-01 : f32
    %364 = vector.broadcast %cst_158 : f32 to vector<2x96xf32>
    %365 = arith.addf %363, %364 : vector<2x96xf32>
    %366 = vector.extract_strided_slice %365 {offsets = [0, 0], sizes = [2, 32], strides = [1, 1]} : vector<2x96xf32> to vector<2x32xf32>
    %367 = vector.extract_strided_slice %365 {offsets = [0, 32], sizes = [2, 32], strides = [1, 1]} : vector<2x96xf32> to vector<2x32xf32>
    %368 = vector.extract_strided_slice %365 {offsets = [0, 64], sizes = [2, 32], strides = [1, 1]} : vector<2x96xf32> to vector<2x32xf32>
    %369 = vector.extract_strided_slice %357 {offsets = [0, 96], sizes = [2, 32], strides = [1, 1]} : vector<2x128xf32> to vector<2x32xf32>
    %370 = math.tanh %369 : vector<2x32xf32>
    %371 = arith.mulf %367, %350 : vector<2x32xf32>
    %372 = arith.mulf %366, %370 : vector<2x32xf32>
    %373 = arith.addf %371, %372 : vector<2x32xf32>
    %374 = math.tanh %373 : vector<2x32xf32>
    %375 = arith.mulf %368, %374 : vector<2x32xf32>
    %376 = arith.addf %353, %375 : vector<2x32xf32>
    %c6_159 = arith.constant 6 : index
    %c0_160 = arith.constant 0 : index
    %c0_161 = arith.constant 0 : index
    %377 = vector.load %arg20[%c6_159, %c0_160, %c0_161] : memref<8x2x128xf32, #tpu.memory_space<vmem>>, vector<1x2x128xf32>
    %378 = vector.shape_cast %377 : vector<1x2x128xf32> to vector<2x128xf32>
    %cst_162 = arith.constant dense<0.000000e+00> : vector<2x128xf32>
    %379 = tpu.matmul %375, %225, %cst_162 {dimension_numbers = #tpu.dot_dimension_numbers<[1], [0], [0], [1], [0, 0, 1, 1], [], []>} : vector<2x32xf32>, vector<32x128xf32>, vector<2x128xf32> -> vector<2x128xf32>
    %380 = arith.addf %378, %379 : vector<2x128xf32>
    %381 = vector.extract_strided_slice %380 {offsets = [0, 0], sizes = [2, 96], strides = [1, 1]} : vector<2x128xf32> to vector<2x96xf32>
    %cst_163 = arith.constant 5.000000e-01 : f32
    %382 = vector.broadcast %cst_163 : f32 to vector<2x96xf32>
    %383 = arith.mulf %381, %382 : vector<2x96xf32>
    %384 = math.tanh %383 : vector<2x96xf32>
    %cst_164 = arith.constant 5.000000e-01 : f32
    %385 = vector.broadcast %cst_164 : f32 to vector<2x96xf32>
    %386 = arith.mulf %384, %385 : vector<2x96xf32>
    %cst_165 = arith.constant 5.000000e-01 : f32
    %387 = vector.broadcast %cst_165 : f32 to vector<2x96xf32>
    %388 = arith.addf %386, %387 : vector<2x96xf32>
    %389 = vector.extract_strided_slice %388 {offsets = [0, 0], sizes = [2, 32], strides = [1, 1]} : vector<2x96xf32> to vector<2x32xf32>
    %390 = vector.extract_strided_slice %388 {offsets = [0, 32], sizes = [2, 32], strides = [1, 1]} : vector<2x96xf32> to vector<2x32xf32>
    %391 = vector.extract_strided_slice %388 {offsets = [0, 64], sizes = [2, 32], strides = [1, 1]} : vector<2x96xf32> to vector<2x32xf32>
    %392 = vector.extract_strided_slice %380 {offsets = [0, 96], sizes = [2, 32], strides = [1, 1]} : vector<2x128xf32> to vector<2x32xf32>
    %393 = math.tanh %392 : vector<2x32xf32>
    %394 = arith.mulf %390, %373 : vector<2x32xf32>
    %395 = arith.mulf %389, %393 : vector<2x32xf32>
    %396 = arith.addf %394, %395 : vector<2x32xf32>
    %397 = math.tanh %396 : vector<2x32xf32>
    %398 = arith.mulf %391, %397 : vector<2x32xf32>
    %399 = arith.addf %376, %398 : vector<2x32xf32>
    %c7_166 = arith.constant 7 : index
    %c0_167 = arith.constant 0 : index
    %c0_168 = arith.constant 0 : index
    %400 = vector.load %arg20[%c7_166, %c0_167, %c0_168] : memref<8x2x128xf32, #tpu.memory_space<vmem>>, vector<1x2x128xf32>
    %401 = vector.shape_cast %400 : vector<1x2x128xf32> to vector<2x128xf32>
    %cst_169 = arith.constant dense<0.000000e+00> : vector<2x128xf32>
    %402 = tpu.matmul %398, %225, %cst_169 {dimension_numbers = #tpu.dot_dimension_numbers<[1], [0], [0], [1], [0, 0, 1, 1], [], []>} : vector<2x32xf32>, vector<32x128xf32>, vector<2x128xf32> -> vector<2x128xf32>
    %403 = arith.addf %401, %402 : vector<2x128xf32>
    %404 = vector.extract_strided_slice %403 {offsets = [0, 0], sizes = [2, 96], strides = [1, 1]} : vector<2x128xf32> to vector<2x96xf32>
    %cst_170 = arith.constant 5.000000e-01 : f32
    %405 = vector.broadcast %cst_170 : f32 to vector<2x96xf32>
    %406 = arith.mulf %404, %405 : vector<2x96xf32>
    %407 = math.tanh %406 : vector<2x96xf32>
    %cst_171 = arith.constant 5.000000e-01 : f32
    %408 = vector.broadcast %cst_171 : f32 to vector<2x96xf32>
    %409 = arith.mulf %407, %408 : vector<2x96xf32>
    %cst_172 = arith.constant 5.000000e-01 : f32
    %410 = vector.broadcast %cst_172 : f32 to vector<2x96xf32>
    %411 = arith.addf %409, %410 : vector<2x96xf32>
    %412 = vector.extract_strided_slice %411 {offsets = [0, 0], sizes = [2, 32], strides = [1, 1]} : vector<2x96xf32> to vector<2x32xf32>
    %413 = vector.extract_strided_slice %411 {offsets = [0, 32], sizes = [2, 32], strides = [1, 1]} : vector<2x96xf32> to vector<2x32xf32>
    %414 = vector.extract_strided_slice %411 {offsets = [0, 64], sizes = [2, 32], strides = [1, 1]} : vector<2x96xf32> to vector<2x32xf32>
    %415 = vector.extract_strided_slice %403 {offsets = [0, 96], sizes = [2, 32], strides = [1, 1]} : vector<2x128xf32> to vector<2x32xf32>
    %416 = math.tanh %415 : vector<2x32xf32>
    %417 = arith.mulf %413, %396 : vector<2x32xf32>
    %418 = arith.mulf %412, %416 : vector<2x32xf32>
    %419 = arith.addf %417, %418 : vector<2x32xf32>
    %420 = math.tanh %419 : vector<2x32xf32>
    %421 = arith.mulf %414, %420 : vector<2x32xf32>
    %422 = arith.addf %399, %421 : vector<2x32xf32>
    %c1_173 = arith.constant 1 : index
    %c0_174 = arith.constant 0 : index
    %c0_175 = arith.constant 0 : index
    %423 = vector.load %arg17[%c1_173, %c0_174, %c0_175] : memref<2x2x32xf32, #tpu.memory_space<vmem>>, vector<1x2x32xf32>
    %424 = vector.shape_cast %423 : vector<1x2x32xf32> to vector<2x32xf32>
    %425 = vector.shape_cast %421 : vector<2x32xf32> to vector<1x2x32xf32>
    tpu.vector_store %arg17[%c1_173, %c0_174, %c0_175], %425 {strides = array<i32>} : memref<2x2x32xf32, #tpu.memory_space<vmem>>, vector<1x2x32xf32>,
    %c1_176 = arith.constant 1 : index
    %c0_177 = arith.constant 0 : index
    %c0_178 = arith.constant 0 : index
    %426 = vector.load %arg18[%c1_176, %c0_177, %c0_178] : memref<2x2x32xf32, #tpu.memory_space<vmem>>, vector<1x2x32xf32>
    %427 = vector.shape_cast %426 : vector<1x2x32xf32> to vector<2x32xf32>
    %428 = vector.shape_cast %419 : vector<2x32xf32> to vector<1x2x32xf32>
    tpu.vector_store %arg18[%c1_176, %c0_177, %c0_178], %428 {strides = array<i32>} : memref<2x2x32xf32, #tpu.memory_space<vmem>>, vector<1x2x32xf32>,
    %c0_179 = arith.constant 0 : index
    %c0_180 = arith.constant 0 : index
    %429 = vector.load %arg19[%c0_179, %c0_180] : memref<2x32xf32, #tpu.memory_space<vmem>>, vector<2x32xf32>
    %430 = arith.addf %429, %422 : vector<2x32xf32>
    %c0_181 = arith.constant 0 : index
    %c0_182 = arith.constant 0 : index
    %431 = vector.load %arg19[%c0_181, %c0_182] : memref<2x32xf32, #tpu.memory_space<vmem>>, vector<2x32xf32>
    tpu.vector_store %arg19[%c0_181, %c0_182], %430 {strides = array<i32>} : memref<2x32xf32, #tpu.memory_space<vmem>>, vector<2x32xf32>,
    %c0_i32_183 = arith.constant 0 : i32
    %432 = arith.cmpi eq, %arg0, %c0_i32_183 : i32
    %433 = arith.extui %432 : i1 to i32
    %c0_i32_184 = arith.constant 0 : i32
    %434 = arith.cmpi ne, %433, %c0_i32_184 : i32
    scf.if %434 {
      %c0_185 = arith.constant 0 : index
      %c0_186 = arith.constant 0 : index
      %435 = vector.load %arg19[%c0_185, %c0_186] : memref<2x32xf32, #tpu.memory_space<vmem>>, vector<2x32xf32>
      %c0_187 = arith.constant 0 : index
      %c0_188 = arith.constant 0 : index
      %436 = vector.load %arg8[%c0_187, %c0_188] : memref<32x8xf32, #tpu.memory_space<vmem>>, vector<32x8xf32>
      %cst_189 = arith.constant dense<0.000000e+00> : vector<2x8xf32>
      %437 = tpu.matmul %435, %436, %cst_189 {dimension_numbers = #tpu.dot_dimension_numbers<[1], [0], [0], [1], [0, 0, 1, 1], [], []>} : vector<2x32xf32>, vector<32x8xf32>, vector<2x8xf32> -> vector<2x8xf32>
      %c0_190 = arith.constant 0 : index
      %c0_191 = arith.constant 0 : index
      %438 = vector.load %arg9[%c0_190, %c0_191] : memref<1x8xf32, #tpu.memory_space<vmem>>, vector<1x8xf32>
      %439 = vector.broadcast %438 : vector<1x8xf32> to vector<2x8xf32>
      %440 = arith.addf %437, %439 : vector<2x8xf32>
      %c0_192 = arith.constant 0 : index
      %c0_193 = arith.constant 0 : index
      %441 = vector.load %arg14[%c0_192, %c0_193] : memref<2x8xf32, #tpu.memory_space<vmem>>, vector<2x8xf32>
      tpu.vector_store %arg14[%c0_192, %c0_193], %440 {strides = array<i32>} : memref<2x8xf32, #tpu.memory_space<vmem>>, vector<2x8xf32>,
      %c0_194 = arith.constant 0 : index
      %c0_195 = arith.constant 0 : index
      %442 = vector.load %arg10[%c0_194, %c0_195] : memref<8x8xf32, #tpu.memory_space<vmem>>, vector<8x8xf32>
      %cst_196 = arith.constant dense<0.000000e+00> : vector<2x8xf32>
      %443 = tpu.matmul %440, %442, %cst_196 {dimension_numbers = #tpu.dot_dimension_numbers<[1], [0], [0], [1], [0, 0, 1, 1], [], []>} : vector<2x8xf32>, vector<8x8xf32>, vector<2x8xf32> -> vector<2x8xf32>
      %c0_197 = arith.constant 0 : index
      %c0_198 = arith.constant 0 : index
      %444 = vector.load %arg11[%c0_197, %c0_198] : memref<1x8xf32, #tpu.memory_space<vmem>>, vector<1x8xf32>
      %445 = vector.broadcast %444 : vector<1x8xf32> to vector<2x8xf32>
      %446 = arith.addf %443, %445 : vector<2x8xf32>
      %c0_199 = arith.constant 0 : index
      %c0_200 = arith.constant 0 : index
      %447 = vector.load %arg15[%c0_199, %c0_200] : memref<2x8xf32, #tpu.memory_space<vmem>>, vector<2x8xf32>
      tpu.vector_store %arg15[%c0_199, %c0_200], %446 {strides = array<i32>} : memref<2x8xf32, #tpu.memory_space<vmem>>, vector<2x8xf32>,
      %c0_201 = arith.constant 0 : index
      %c0_202 = arith.constant 0 : index
      %448 = vector.load %arg12[%c0_201, %c0_202] : memref<8x8xf32, #tpu.memory_space<vmem>>, vector<8x8xf32>
      %cst_203 = arith.constant dense<0.000000e+00> : vector<2x8xf32>
      %449 = tpu.matmul %440, %448, %cst_203 {dimension_numbers = #tpu.dot_dimension_numbers<[1], [0], [0], [1], [0, 0, 1, 1], [], []>} : vector<2x8xf32>, vector<8x8xf32>, vector<2x8xf32> -> vector<2x8xf32>
      %c0_204 = arith.constant 0 : index
      %c0_205 = arith.constant 0 : index
      %450 = vector.load %arg13[%c0_204, %c0_205] : memref<1x8xf32, #tpu.memory_space<vmem>>, vector<1x8xf32>
      %451 = vector.broadcast %450 : vector<1x8xf32> to vector<2x8xf32>
      %452 = arith.addf %449, %451 : vector<2x8xf32>
      %c0_206 = arith.constant 0 : index
      %c0_207 = arith.constant 0 : index
      %453 = vector.load %arg16[%c0_206, %c0_207] : memref<2x8xf32, #tpu.memory_space<vmem>>, vector<2x8xf32>
      tpu.vector_store %arg16[%c0_206, %c0_207], %452 {strides = array<i32>} : memref<2x8xf32, #tpu.memory_space<vmem>>, vector<2x8xf32>,
    } else {
    }
    return
  }
  func.func @transform_0(%arg0: i32) -> (i32, i32, i32) {
    %c0_i32 = arith.constant 0 : i32
    %c0_i32_0 = arith.constant 0 : i32
    %c0_i32_1 = arith.constant 0 : i32
    return %c0_i32, %arg0, %c0_i32_0 : i32, i32, i32
  }
  func.func @transform_1(%arg0: i32) -> (i32, i32) {
    %c0_i32 = arith.constant 0 : i32
    %c0_i32_0 = arith.constant 0 : i32
    %c0_i32_1 = arith.constant 0 : i32
    return %c0_i32, %c0_i32_0 : i32, i32
  }
  func.func @transform_2(%arg0: i32) -> (i32, i32) {
    %c0_i32 = arith.constant 0 : i32
    %c0_i32_0 = arith.constant 0 : i32
    %c0_i32_1 = arith.constant 0 : i32
    return %c0_i32, %c0_i32_0 : i32, i32
  }
  func.func @transform_3(%arg0: i32) -> (i32, i32) {
    %c0_i32 = arith.constant 0 : i32
    %c0_i32_0 = arith.constant 0 : i32
    %c0_i32_1 = arith.constant 0 : i32
    return %c0_i32, %c0_i32_0 : i32, i32
  }
  func.func @transform_4(%arg0: i32) -> (i32, i32) {
    %c0_i32 = arith.constant 0 : i32
    %c0_i32_0 = arith.constant 0 : i32
    %c0_i32_1 = arith.constant 0 : i32
    return %c0_i32, %c0_i32_0 : i32, i32
  }
  func.func @transform_5(%arg0: i32) -> (i32, i32) {
    %c0_i32 = arith.constant 0 : i32
    %c0_i32_0 = arith.constant 0 : i32
    %c0_i32_1 = arith.constant 0 : i32
    return %c0_i32, %c0_i32_0 : i32, i32
  }
  func.func @transform_6(%arg0: i32) -> (i32, i32) {
    %c0_i32 = arith.constant 0 : i32
    %c0_i32_0 = arith.constant 0 : i32
    %c0_i32_1 = arith.constant 0 : i32
    return %c0_i32, %c0_i32_0 : i32, i32
  }
  func.func @transform_7(%arg0: i32) -> (i32, i32) {
    %c0_i32 = arith.constant 0 : i32
    %c0_i32_0 = arith.constant 0 : i32
    %c0_i32_1 = arith.constant 0 : i32
    return %c0_i32, %c0_i32_0 : i32, i32
  }
  func.func @transform_8(%arg0: i32) -> (i32, i32) {
    %c0_i32 = arith.constant 0 : i32
    %c0_i32_0 = arith.constant 0 : i32
    %c0_i32_1 = arith.constant 0 : i32
    return %c0_i32, %c0_i32_0 : i32, i32
  }
  func.func @transform_9(%arg0: i32) -> (i32, i32) {
    %c0_i32 = arith.constant 0 : i32
    %c0_i32_0 = arith.constant 0 : i32
    %c0_i32_1 = arith.constant 0 : i32
    return %c0_i32, %c0_i32_0 : i32, i32
  }
  func.func @transform_10(%arg0: i32) -> (i32, i32) {
    %c0_i32 = arith.constant 0 : i32
    %c0_i32_0 = arith.constant 0 : i32
    %c0_i32_1 = arith.constant 0 : i32
    return %c0_i32, %c0_i32_0 : i32, i32
  }
  func.func @transform_11(%arg0: i32) -> (i32, i32) {
    %c0_i32 = arith.constant 0 : i32
    %c0_i32_0 = arith.constant 0 : i32
    %c0_i32_1 = arith.constant 0 : i32
    return %c0_i32, %c0_i32_0 : i32, i32
  }
  func.func @transform_12(%arg0: i32) -> (i32, i32) {
    %c0_i32 = arith.constant 0 : i32
    %c0_i32_0 = arith.constant 0 : i32
    %c0_i32_1 = arith.constant 0 : i32
    return %c0_i32, %c0_i32_0 : i32, i32
  }
  func.func @transform_13(%arg0: i32) -> (i32, i32) {
    %c0_i32 = arith.constant 0 : i32
    %c0_i32_0 = arith.constant 0 : i32
    %c0_i32_1 = arith.constant 0 : i32
    return %c0_i32, %c0_i32_0 : i32, i32
  }
  func.func @transform_14(%arg0: i32) -> (i32, i32) {
    %c0_i32 = arith.constant 0 : i32
    %c0_i32_0 = arith.constant 0 : i32
    %c0_i32_1 = arith.constant 0 : i32
    return %c0_i32, %c0_i32_0 : i32, i32
  }
  func.func @transform_15(%arg0: i32) -> (i32, i32) {
    %c0_i32 = arith.constant 0 : i32
    %c0_i32_0 = arith.constant 0 : i32
    %c0_i32_1 = arith.constant 0 : i32
    return %c0_i32, %c0_i32_0 : i32, i32
  }
}

</mosaic_0001>

<bundles_post_ra>
// kernel: tpu_custom_call.1
= control target key start
LH: loop header
LB: loop body
LE: loop exit
PB: predicated region body
PF: predicated region fallthrough
CT: control target
= control target key end

     0   :  { %21 = vsyncpa [#allocation8], 0  ;;  %s3746_s0 = inlined_call_operand.hbm [shape: f32[2,8,16], index: 0, kind: input, shape index: {}]   ;;  %s3747_s1 = inlined_call_operand.hbm [shape: f32[16,128], index: 1, kind: input, shape index: {}]   ;;  %s3748_s2 = inlined_call_operand.vmem [shape: f32[32,128], index: 2, kind: input, shape index: {}]   ;;  %s3749_s3 = inlined_call_operand.hbm [shape: f32[1,128], index: 3, kind: input, shape index: {}]   ;;  %s3750_s4 = inlined_call_operand.hbm [shape: f32[32,128], index: 4, kind: input, shape index: {}]   ;;  %s3751_s5 = inlined_call_operand.hbm [shape: f32[32,128], index: 5, kind: input, shape index: {}]   ;;  %s3752_s6 = inlined_call_operand.hbm [shape: f32[1,128], index: 6, kind: input, shape index: {}]   ;;  %s3753_s7 = inlined_call_operand.vmem [shape: f32[32,8], index: 7, kind: input, shape index: {}]   ;;  %s3754_s8 = inlined_call_operand.hbm [shape: f32[1,8], index: 8, kind: input, shape index: {}]   ;;  %s3755_s9 = inlined_call_operand.vmem [shape: f32[8,8], index: 9, kind: input, shape index: {}]   ;;  %s3756_s10 = inlined_call_operand.vmem [shape: f32[1,8], index: 10, kind: input, shape index: {}]   ;;  %s3757_s11 = inlined_call_operand.vmem [shape: f32[8,8], index: 11, kind: input, shape index: {}]   ;;  %s3758_s12 = inlined_call_operand.vmem [shape: f32[1,8], index: 12, kind: input, shape index: {}]   ;;  %s3759_s13 = inlined_call_operand.hbm [shape: f32[2,8], index: 13, kind: output, shape index: {0}]   ;;  %s3760_s14 = inlined_call_operand.hbm [shape: f32[2,8], index: 14, kind: output, shape index: {1}]   ;;  %s3761_s15 = inlined_call_operand.hbm [shape: f32[2,8], index: 15, kind: output, shape index: {2}]  }
   0x1   :  { %22 = vsyncpa [#allocation11], 0 }
   0x2   :  { %23 = vsyncpa [#allocation14], 0 }
   0x3   :  { %24 = vsyncpa [#allocation17], 0 }
   0x4   :  { %25 = vsyncpa [#allocation9], 0 }
   0x5   :  { %26 = vsyncpa [#allocation21], 0  ;;  %s3233_s18 = smov [#allocation10]   ;;  %s3234_s20 = smov [#allocation13]  }
   0x6   :  { %s44_s19 = sshll.u32 %s3233_s18, 4  ;;  %s68_s21 = sshll.u32 %s3234_s20, 4  ;;  %s45_s19 = int_to_ptr.vmem [resolvable:$true] %s44_s19  ;;  %s69_s21 = int_to_ptr.vmem [resolvable:$true] %s68_s21 }
   0x7   :  { %s3029_s22 = scalar_lea.vmem %s45_s19, 256  ;;  %p3034_p1 = scmp.lt.s32.totalorder %s45_s19, %s45_s19 }
   0x8   :  { %p3030_p0 = scmp.ne.s32.totalorder %s45_s19, %s3029_s22  ;;  %p3035_p2 = scmp.lt.s32.totalorder %s3029_s22, %s3029_s22 }
   0xa   :  { %p3036_p3 = por %p3035_p2, %p3034_p1 }
   0xc   :  { %p3037_p4 = pnand %p3036_p3, %p3030_p0 }
   0xe   :  { %3040 = shalt.err (!%p3037_p4)
}
   0xf   :  { %s3235_s23 = smov 128   ;;  %s3236_s24 = smov 8  }
  0x10   :  { %50 = dma.hbm_to_vmem [thread:$0]  %s3747_s1, 256, %s45_s19, [#allocation11], %s3235_s23, %s3235_s23, %s3236_s24  }
  0x11   :  { %s3049_s27 = scalar_lea.vmem %s69_s21, 512  ;;  %p3054_p6 = scmp.lt.s32.totalorder %s69_s21, %s69_s21 }
  0x12   :  { %p3050_p5 = scmp.ne.s32.totalorder %s69_s21, %s3049_s27  ;;  %p3055_p7 = scmp.lt.s32.totalorder %s3049_s27, %s3049_s27 }
  0x14   :  { %p3056_p8 = por %p3055_p7, %p3054_p6 }
  0x16   :  { %p3057_p9 = pnand %p3056_p8, %p3050_p5 }
  0x18   :  { %3060 = shalt.err (!%p3057_p9)
}
  0x19   :  { %74 = dma.hbm_to_vmem [thread:$0]  %s3750_s4, 512, %s69_s21, [#allocation14], %s3235_s23, %s3235_s23, %s3236_s24  }
  0x1a   :  { %s3237_s30 = smov [#allocation16]   ;;  %s3238_s17 = smov [#allocation7]  }
  0x1b   :  { %s93_s16 = sshll.u32 %s3237_s30, 4  ;;  %s32_s18 = sshll.u32 %s3238_s17, 4  ;;  %s94_s16 = int_to_ptr.vmem [resolvable:$true] %s93_s16  ;;  %s33_s18 = int_to_ptr.vmem [resolvable:$true] %s32_s18 }
  0x1c   :  { %s3069_s1 = scalar_lea.vmem %s94_s16, 16  ;;  %s3073_s19 = scalar_lea.vmem %s94_s16, 32 }
  0x1d   :  { %p3070_p10 = scmp.ne.s32.totalorder %s94_s16, %s3069_s1  ;;  %p3074_p11 = scmp.lt.s32.totalorder %s94_s16, %s94_s16 }
  0x1e   :  { %p3075_p12 = scmp.lt.s32.totalorder %s3073_s19, %s3069_s1 }
  0x20   :  { %p3076_p13 = por %p3075_p12, %p3074_p11 }
  0x22   :  { %p3077_p0 = pnand %p3076_p13, %p3070_p10 }
  0x24   :  { %3080 = shalt.err (!%p3077_p0)
}
  0x25   :  { %96 = dma.hbm_to_vmem [thread:$0]  %s3752_s6, 16, %s94_s16, [#allocation17]  }
  0x26   :  { %s3089_s25 = scalar_lea.vmem %s33_s18, 256  ;;  %p3094_p2 = scmp.lt.s32.totalorder %s33_s18, %s33_s18 }
  0x27   :  { %p3090_p1 = scmp.ne.s32.totalorder %s33_s18, %s3089_s25  ;;  %p3095_p3 = scmp.lt.s32.totalorder %s3089_s25, %s3089_s25 }
  0x29   :  { %p3096_p4 = por %p3095_p3, %p3094_p2 }
  0x2b   :  { %p3097_p5 = pnand %p3096_p4, %p3090_p1 }
  0x2d   :  { %3100 = shalt.err (!%p3097_p5)
}
  0x2e   :  { %38 = dma.hbm_to_vmem [thread:$0]  %s3746_s0, 256, %s33_s18, [#allocation8], %s3235_s23, %s3235_s23, %s3236_s24  }
  0x2f   :  { %s3239_s26 = smov [#allocation12]   ;;  %s3240_s28 = smov [#allocation15]  }
  0x30   :  { %s59_s27 = sshll.u32 %s3239_s26, 4  ;;  %s80_s29 = sshll.u32 %s3240_s28, 4  ;;  %s60_s27 = int_to_ptr.vmem [resolvable:$true] %s59_s27  ;;  %s81_s29 = int_to_ptr.vmem [resolvable:$true] %s80_s29 }
  0x31   :  { %s3109_s6 = scalar_lea.vmem %s60_s27, 16  ;;  %s3113_s30 = scalar_lea.vmem %s60_s27, 32 }
  0x32   :  { %p3110_p6 = scmp.ne.s32.totalorder %s60_s27, %s3109_s6  ;;  %p3114_p7 = scmp.lt.s32.totalorder %s60_s27, %s60_s27 }
  0x33   :  { %p3115_p8 = scmp.lt.s32.totalorder %s3113_s30, %s3109_s6 }
  0x35   :  { %p3116_p9 = por %p3115_p8, %p3114_p7 }
  0x37   :  { %p3117_p10 = pnand %p3116_p9, %p3110_p6 }
  0x39   :  { %3120 = shalt.err (!%p3117_p10)
}
  0x3a   :  { %62 = dma.hbm_to_vmem [thread:$0]  %s3749_s3, 16, %s60_s27, [#allocation11]  }
  0x3b   :  { %s3129_s1 = scalar_lea.vmem %s81_s29, 512  ;;  %p3134_p12 = scmp.lt.s32.totalorder %s81_s29, %s81_s29 }
  0x3c   :  { %p3130_p11 = scmp.ne.s32.totalorder %s81_s29, %s3129_s1  ;;  %p3135_p13 = scmp.lt.s32.totalorder %s3129_s1, %s3129_s1 }
  0x3e   :  { %p3136_p0 = por %p3135_p13, %p3134_p12 }
  0x40   :  { %p3137_p1 = pnand %p3136_p0, %p3130_p11 }
  0x42   :  { %3140 = shalt.err (!%p3137_p1)
}
  0x43   :  { %86 = dma.hbm_to_vmem [thread:$0]  %s3751_s5, 512, %s81_s29, [#allocation14], %s3235_s23, %s3235_s23, %s3236_s24  }
  0x44   :  { %s3241_s19 = smov [#allocation18]  }
  0x45   :  { %s105_s20 = sshll.u32 %s3241_s19, 4  ;;  %s106_s20 = int_to_ptr.vmem [resolvable:$true] %s105_s20 }
  0x46   :  { %s3149_s22 = scalar_lea.vmem %s106_s20, 16  ;;  %s3153_s3 = scalar_lea.vmem %s106_s20, 32 }
  0x47   :  { %p3150_p2 = scmp.ne.s32.totalorder %s106_s20, %s3149_s22  ;;  %p3154_p3 = scmp.lt.s32.totalorder %s106_s20, %s106_s20 }
  0x48   :  { %p3155_p4 = scmp.lt.s32.totalorder %s3153_s3, %s3149_s22 }
  0x4a   :  { %p3156_p5 = por %p3155_p4, %p3154_p3 }
  0x4c   :  { %p3157_p6 = pnand %p3156_p5, %p3150_p2 }
  0x4e   :  { %3160 = shalt.err (!%p3157_p6)
}
  0x4f   :  { %108 = dma.hbm_to_vmem [thread:$0]  %s3754_s8, 16, %s106_s20, [#allocation17]  }
  0x50   :  { %3221 = dma.done.wait [#allocation8], 256  }
  0x51   :  { %3222 = vsyncadd [#allocation8], 4294967040 }
  0x52   :  { %3223 = dma.done.wait [#allocation11], 272  }
  0x53   :  { %3224 = vsyncadd [#allocation11], 4294967024 }
  0x54   :  { %3225 = dma.done.wait [#allocation14], 1024  }
  0x55   :  { %3226 = vsyncadd [#allocation14], 4294966272 }
  0x56   :  { %3227 = dma.done.wait [#allocation17], 32  }
  0x57   :  { %3228 = vsyncadd [#allocation17], 4294967264  ;;  %v161_v0 = vlaneseq  ;;  %v3242_v1 = vmov 1983009808   ;;  %v3243_v3 = vmov 0.0   ;;  %vm142_vm0 = vcmask 254976  }
  0x58   :  { %v159_v2 = vunpack.c.l.s4 %v3242_v1  ;;  %2698 = vmatprep.subr.mxu1 %v3243_v3  ;;  %v3244_v5 = vmov 1934713408   ;;  %vm3245_vm1 = vmmov 0   ;;  %143 = vst.msk [vmem:[#allocation2] sm:$0x3] %vm142_vm0, %v3243_v3  ;;  %v149_v10 = vld [vmem:[#allocation10 + $0x8] sm:$0xff] }
  0x59   :  { %v162_v4 = vshrl.u32 %v161_v0, 7  ;;  %v190_v6 = vunpack.c.l.s4 %v3244_v5  ;;  %2706 = vmatprep.mubr.msk.f32.mxu1 %vm3245_vm1, %v3243_v3  ;;  %144 = vst.msk [vmem:[#allocation2 + $0x2] sm:$0x3] %vm142_vm0, %v3243_v3  ;;  %145 = vst.msk [vmem:[#allocation3] sm:$0x3] %vm142_vm0, %v3243_v3  ;;  %v148_v11 = vld [vmem:[#allocation10] sm:$0xff]  ;;  %2691 = vmatprep.subr.mxu0 %v149_v10 }
  0x5a   :  { %146 = vst.msk [vmem:[#allocation3 + $0x2] sm:$0x3] %vm142_vm0, %v3243_v3  ;;  %147 = vst.msk [vmem:[#allocation4] sm:$0x3] %vm142_vm0, %v3243_v3  ;;  %v160_v7 = vunpack.c.0.s8 %v159_v2  ;;  %v155_v12 = vld [vmem:[#allocation7] sm:$0xff]  ;;  %v156_v13 = vld [vmem:[#allocation7 + $0x8] sm:$0xff]  ;;  %2692 = vmatpush3.msra.mxu0 %v149_v10 }
  0x5b   :  { %v191_v9 = vunpack.c.0.s8 %v190_v6  ;;  %v157_v14 = vcombine.high %v155_v12, %v3243_v3  ;;  %v3385_v16 = vld [vmem:[%s3748_s2 + $0x18] sm:$0xff]  ;;  %v3390_v17 = vld [vmem:[%s3748_s2 + $0x10] sm:$0xff]  ;;  %v172_v18 = vcombine.high %v156_v13, %v3243_v3  ;;  %2693 = vmatprep.subr.mxu0 %v148_v11  ;;  %v3400_v22 = vld [vmem:[%s3748_s2 + $0x8] sm:$0xff]  ;;  %vm406_vm2 = vcmask 261120   ;;  %s3247_s29 = smov 64   ;;  %s3248_s6 = smov 96  }
  0x5c   :  { %v3378_v8 = vsub.s32 %v160_v7, %v162_v4  ;;  %2699 = vmatpush3.msra.mxu1 %v3385_v16  ;;  %2694 = vmatpush3.msra.mxu0 %v148_v11  ;;  %v3408_v26 = vld [vmem:[%s3748_s2] sm:$0xff]  ;;  %vm271_vm3 = vcmask 130048   ;;  %v2556_v50 = vld [vmem:[#allocation12] ss:$0 sm:$0xff]  ;;  %s3246_s2 = smov 32   ;;  %vm2357_vm4 = vcmask 64512  }
  0x5d   :  { %v194_v20 = vsub.s32 %v191_v9, %v162_v4  ;;  %2700 = vmatprep.subr.mxu1 %v3243_v3  ;;  %2709 = vmatprep.subr.mxu0 %v3243_v3  ;;  %vm2347_vm5 = vcmask 58368   ;;  %s3249_s25 = smov [#allocation19]  }
  0x5e   :  { %v164_v15 = vrot.slane %v155_v12, %v3378_v8  ;;  %v179_v19 = vrot.slane %v156_v13, %v3378_v8  ;;  %v171_v21 = vrot.slane %v157_v14, %v3378_v8  ;;  %v186_v23 = vrot.slane %v172_v18, %v3378_v8  ;;  %2701 = vmatpush3.msra.mxu1 %v3390_v17  ;;  %s2517_s4 = sshll.u32 %s3249_s25, 4  ;;  %s2518_s4 = int_to_ptr.vmem [resolvable:$true] %s2517_s4 }
  0x5f   :  { %2702 = vmatprep.subr.mxu1 %v3243_v3  ;;  %v403_v31 = vld [vmem:[#allocation2] sm:$0x3]  ;;  %s3161_s5 = scalar_lea.vmem %s2518_s4, 32  ;;  %p3166_p8 = scmp.lt.s32.totalorder %s2518_s4, %s2518_s4 }
  0x60   :  { %v187_v24 = vcombine.low %v164_v15, %v179_v19  ;;  %v188_v25 = vcombine.high %v164_v15, %v179_v19  ;;  %v203_v29 = vcombine.low %v171_v21, %v186_v23  ;;  %v204_v30 = vcombine.high %v171_v21, %v186_v23  ;;  %2703 = vmatpush3.msra.mxu1 %v3400_v22  ;;  %v404_v5 = vld [vmem:[#allocation3] sm:$0x3]  ;;  %p3162_p7 = scmp.ne.s32.totalorder %s2518_s4, %s3161_s5  ;;  %p3167_p9 = scmp.lt.s32.totalorder %s3161_s5, %s3161_s5 }
  0x61   :  { %2704 = vmatprep.subr.mxu1 %v3243_v3 }
  0x62   :  { %v195_v27 = vrot.slane %v187_v24, %v194_v20  ;;  %v202_v28 = vrot.slane %v188_v25, %v194_v20  ;;  %v211_v34 = vrot.slane %v203_v29, %v194_v20  ;;  %v218_v35 = vrot.slane %v204_v30, %v194_v20  ;;  %2705 = vmatpush3.msra.mxu1 %v3408_v26  ;;  %p3168_p10 = por %p3167_p9, %p3166_p8 }
  0x63   :  { %2707 = vmatmul.mubr.msk.f32.vlgmr.msra.gmra.mxu1 %vm406_vm2, %v403_v31  ;;  %2720 = vmatprep.subr.mxu1 %v3243_v3 }
  0x64   :  { %v219_v32 = vcombine.high %v195_v27, %v3243_v3  ;;  %v220_v33 = vcombine.high %v202_v28, %v3243_v3  ;;  %v221_v38 = vcombine.high %v211_v34, %v3243_v3  ;;  %v222_v39 = vcombine.high %v218_v35, %v3243_v3  ;;  %2721 = vmatpush3.msra.mxu1 %v3385_v16  ;;  %p3169_p11 = pnand %p3168_p10, %p3162_p7 }
  0x65   :  { %2722 = vmatprep.subr.mxu1 %v3243_v3  ;;  %2728 = vmatprep.mubr.msk.f32.mxu1 %vm3245_vm1, %v3243_v3 }
  0x66   :  { %v237_v36 = vcombine.low %v195_v27, %v219_v32  ;;  %v238_v37 = vcombine.low %v202_v28, %v220_v33  ;;  %v254_v42 = vcombine.low %v211_v34, %v221_v38  ;;  %v255_v43 = vcombine.low %v218_v35, %v222_v39  ;;  %2723 = vmatpush3.msra.mxu1 %v3390_v17 }
  0x67   :  { %2724 = vmatprep.subr.mxu1 %v3243_v3 }
  0x68   :  { %v245_v40 = vrot.slane %v237_v36, %v3378_v8  ;;  %v252_v41 = vrot.slane %v238_v37, %v3378_v8  ;;  %v262_v45 = vrot.slane %v254_v42, %v3378_v8  ;;  %v269_v46 = vrot.slane %v255_v43, %v3378_v8  ;;  %2725 = vmatpush3.msra.mxu1 %v3400_v22 }
  0x69   :  { %2726 = vmatprep.subr.mxu1 %v3243_v3 }
  0x6a   :  { %v253_v44 = vcombine.low %v245_v40, %v252_v41  ;;  %v270_v47 = vcombine.low %v262_v45, %v269_v46  ;;  %2727 = vmatpush3.msra.mxu1 %v3408_v26 }
  0x6b   :  { %2742 = vmatprep.subr.mxu1 %v3243_v3 }
  0x6c   :  { %2695 = vmatprep.mubr.msk.f32.mxu0 %vm271_vm3, %v253_v44 }
  0x6d   :  { %2696 = vmatmul.mubr.msk.f32.vlgmr.msra.gmra.mxu0 %vm271_vm3, %v270_v47 }
  0x6e   :  { %2710 = vmatpush3.msra.mxu0 %v3385_v16  ;;  %2717 = vmatprep.mubr.msk.f32.mxu0 %vm3245_vm1, %v3243_v3 }
  0x6f   :  { %2711 = vmatprep.subr.mxu0 %v3243_v3 }
  0x70   :  { %2712 = vmatpush3.msra.mxu0 %v3390_v17 }
  0x71   :  { %2713 = vmatprep.subr.mxu0 %v3243_v3 }
  0x72   :  { %2714 = vmatpush3.msra.mxu0 %v3400_v22 }
  0x73   :  { %2715 = vmatprep.subr.mxu0 %v3243_v3 }
  0x74   :  { %2716 = vmatpush3.msra.mxu0 %v3408_v26 }
  0x75   :  { %2731 = vmatprep.subr.mxu0 %v3243_v3 }
 0x123   :  { %v476_v48 = vpop.f32.mrf.mxu1 }
 0x125   :  { %v2708_v49 = vpop.f32.mrf.mxu1 }
 0x12d   :  { %v2697_v51 = vpop.f32.mrf.mxu0 }
 0x12e   :  { %v348_v52 = vadd.f32 %v2697_v51, %v2556_v50 }
 0x12f   :  { %v342_v53 = vpop.f32.mrf.mxu0 }
 0x130   :  { %v370_v54 = vcombine.high %v348_v52, %v348_v52  ;;  %v377_v55 = vrot.slane %v348_v52, %v3378_v8  ;;  %2561 = vst.sshfl [vmem:[#allocation5 + $0x8] sm:$0x3 pattern:$0x76325410] %v348_v52  ;;  %v343_v56 = vadd.f32 %v2556_v50, %v342_v53 }
 0x132   :  { %v384_v57 = vrot.slane %v370_v54, %v3378_v8  ;;  %v385_v58 = vcombine.high %v377_v55, %v377_v55  ;;  %2562 = vst.sshfl [vmem:[#allocation5 + $0xc] sm:$0x3 pattern:$0x76325410] %v370_v54  ;;  %v353_v59 = vcombine.high %v343_v56, %v343_v56  ;;  %v360_v60 = vrot.slane %v343_v56, %v3378_v8 }
 0x133   :  { %2559 = vst.sshfl [vmem:[#allocation5] sm:$0x3 pattern:$0x76325410] %v343_v56 }
 0x134   :  { %v386_v61 = vcombine.high %v384_v57, %v384_v57  ;;  %400 = vst [vmem:[#allocation5 + $0xa] sm:$0x3] %v385_v58  ;;  %v367_v62 = vrot.slane %v353_v59, %v3378_v8  ;;  %v368_v63 = vcombine.high %v360_v60, %v360_v60  ;;  %2560 = vst.sshfl [vmem:[#allocation5 + $0x4] sm:$0x3 pattern:$0x76325410] %v353_v59 }
 0x136   :  { %402 = vst [vmem:[#allocation5 + $0xe] sm:$0x3] %v386_v61  ;;  %v369_v0 = vcombine.high %v367_v62, %v367_v62  ;;  %396 = vst [vmem:[#allocation5 + $0x2] sm:$0x3] %v368_v63 }
 0x138   :  { %398 = vst [vmem:[#allocation5 + $0x6] sm:$0x3] %v369_v0 }
 0x13a   :  { %v405_v1 = vld [vmem:[#allocation5] sm:$0x3] }
 0x13b   :  { %v480_v2 = vadd.f32 %v476_v48, %v405_v1  ;;  %v617_v43 = vld [vmem:[#allocation5 + $0x4] sm:$0x3] }
 0x13d   :  { %2925 = vtanh.f32 %v480_v2  ;;  %v481_v6 = vmul.f32 0.5, %v480_v2  ;;  %v514_v24 = vld [vmem:[#allocation5 + $0x2] sm:$0x3] }
 0x13f   :  { %2927 = vtanh.f32 %v481_v6  ;;  %v720_v61 = vld [vmem:[#allocation5 + $0x6] sm:$0x3] }
 0x14a   :  { %v2926_v4 = vpop.eup %2925 }
 0x14b   :  { %492 = vrot.lane.b32.xlu0 %v2926_v4, %s3246_s2 }
 0x14c   :  { %v2928_v7 = vpop.eup %2927 }
 0x14d   :  { %v483_v9 = vmul.f32 0.5, %v2928_v7 }
 0x14f   :  { %487 = vrot.lane.b32.xlu0 %v404_v5, %s3246_s2  ;;  %v484_v10 = vadd.f32 0.5, %v483_v9 }
 0x1bd   :  { %v493_v11 = vpop.permute.xlu0 %492 }
 0x1be   :  { %v495_v12 = vmul.f32 %v493_v11, %v484_v10 }
 0x1c0   :  { %497 = vrot.lane.b32.xlu1 %v495_v12, %s3246_s2 }
 0x1c1   :  { %v488_v13 = vpop.permute.xlu0 %487 }
 0x1c2   :  { %v490_v14 = vmul.f32 %v488_v13, %v484_v10 }
 0x232   :  { %v498_v15 = vpop.permute.xlu1 %497 }
 0x233   :  { %v500_v18 = vadd.f32 %v498_v15, %v490_v14 }
 0x235   :  { %2929 = vtanh.f32 %v500_v18 }
 0x242   :  { %v2930_v19 = vpop.eup %2929 }
 0x243   :  { %503 = vrot.lane.b32.xlu1 %v2930_v19, %s3246_s2  ;;  %v823_v19 = vld [vmem:[#allocation5 + $0x8] sm:$0x3] }
 0x2b5   :  { %v504_v20 = vpop.permute.xlu1 %503 }
 0x2b6   :  { %v506_v21 = vmul.f32 %v504_v20, %v484_v10 }
 0x2b8   :  { %508 = vrot.lane.b32.xlu0 %v506_v21, %s3247_s29 }
 0x32a   :  { %v509_v23 = vpop.permute.xlu0 %508 }
 0x32b   :  { %512 = vst.msk [vmem:[#allocation6] sm:$0x3] %vm142_vm0, %v509_v23  ;;  %2718 = vmatmul.mubr.msk.f32.vlgmr.msra.gmra.mxu0 %vm406_vm2, %v509_v23 }
 0x32c   :  { %2732 = vmatpush3.msra.mxu0 %v3385_v16  ;;  %2739 = vmatprep.mubr.msk.f32.mxu0 %vm3245_vm1, %v3243_v3 }
 0x32d   :  { %2733 = vmatprep.subr.mxu0 %v3243_v3 }
 0x32e   :  { %2734 = vmatpush3.msra.mxu0 %v3390_v17 }
 0x32f   :  { %2735 = vmatprep.subr.mxu0 %v3243_v3 }
 0x330   :  { %2736 = vmatpush3.msra.mxu0 %v3400_v22 }
 0x331   :  { %2737 = vmatprep.subr.mxu0 %v3243_v3 }
 0x332   :  { %2738 = vmatpush3.msra.mxu0 %v3408_v26 }
 0x333   :  { %2753 = vmatprep.subr.mxu0 %v3243_v3 }
 0x3eb   :  { %v583_v25 = vpop.f32.mrf.mxu0 }
 0x3ec   :  { %v587_v27 = vadd.f32 %v583_v25, %v514_v24 }
 0x3ed   :  { %v2719_v28 = vpop.f32.mrf.mxu0 }
 0x3ee   :  { %2931 = vtanh.f32 %v587_v27  ;;  %v588_v30 = vmul.f32 0.5, %v587_v27 }
 0x3f0   :  { %2933 = vtanh.f32 %v588_v30 }
 0x3fb   :  { %v2932_v29 = vpop.eup %2931 }
 0x3fc   :  { %595 = vrot.lane.b32.xlu1 %v2932_v29, %s3246_s2 }
 0x3fd   :  { %v2934_v31 = vpop.eup %2933 }
 0x3fe   :  { %v590_v32 = vmul.f32 0.5, %v2934_v31 }
 0x400   :  { %v591_v33 = vadd.f32 0.5, %v590_v32 }
 0x402   :  { %v593_v36 = vmul.f32 %v591_v33, %v500_v18 }
 0x46e   :  { %v596_v34 = vpop.permute.xlu1 %595 }
 0x46f   :  { %v598_v35 = vmul.f32 %v596_v34, %v591_v33 }
 0x471   :  { %600 = vrot.lane.b32.xlu0 %v598_v35, %s3246_s2 }
 0x4e3   :  { %v601_v37 = vpop.permute.xlu0 %600 }
 0x4e4   :  { %v603_v38 = vadd.f32 %v601_v37, %v593_v36 }
 0x4e6   :  { %2935 = vtanh.f32 %v603_v38 }
 0x4f3   :  { %v2936_v39 = vpop.eup %2935 }
 0x4f4   :  { %606 = vrot.lane.b32.xlu1 %v2936_v39, %s3246_s2  ;;  %v926_v39 = vld [vmem:[#allocation5 + $0xa] sm:$0x3] }
 0x566   :  { %v607_v40 = vpop.permute.xlu1 %606 }
 0x567   :  { %v609_v41 = vmul.f32 %v607_v40, %v591_v33 }
 0x569   :  { %611 = vrot.lane.b32.xlu0 %v609_v41, %s3247_s29 }
 0x5db   :  { %v612_v42 = vpop.permute.xlu0 %611 }
 0x5dc   :  { %615 = vst.msk [vmem:[#allocation6 + $0x2] sm:$0x3] %vm142_vm0, %v612_v42  ;;  %2729 = vmatmul.mubr.msk.f32.vlgmr.msra.gmra.mxu1 %vm406_vm2, %v612_v42 }
 0x5dd   :  { %2743 = vmatpush3.msra.mxu1 %v3385_v16  ;;  %2750 = vmatprep.mubr.msk.f32.mxu1 %vm3245_vm1, %v3243_v3 }
 0x5de   :  { %2744 = vmatprep.subr.mxu1 %v3243_v3 }
 0x5df   :  { %2745 = vmatpush3.msra.mxu1 %v3390_v17 }
 0x5e0   :  { %2746 = vmatprep.subr.mxu1 %v3243_v3 }
 0x5e1   :  { %2747 = vmatpush3.msra.mxu1 %v3400_v22 }
 0x5e2   :  { %2748 = vmatprep.subr.mxu1 %v3243_v3 }
 0x5e3   :  { %2749 = vmatpush3.msra.mxu1 %v3408_v26 }
 0x5e4   :  { %2764 = vmatprep.subr.mxu1 %v3243_v3 }
 0x69c   :  { %v686_v44 = vpop.f32.mrf.mxu1 }
 0x69d   :  { %v690_v45 = vadd.f32 %v686_v44, %v617_v43 }
 0x69e   :  { %v2730_v46 = vpop.f32.mrf.mxu1 }
 0x69f   :  { %2937 = vtanh.f32 %v690_v45  ;;  %v691_v48 = vmul.f32 0.5, %v690_v45 }
 0x6a1   :  { %2939 = vtanh.f32 %v691_v48 }
 0x6ac   :  { %v2938_v47 = vpop.eup %2937 }
 0x6ad   :  { %698 = vrot.lane.b32.xlu1 %v2938_v47, %s3246_s2 }
 0x6ae   :  { %v2940_v49 = vpop.eup %2939 }
 0x6af   :  { %v693_v50 = vmul.f32 0.5, %v2940_v49 }
 0x6b1   :  { %v694_v51 = vadd.f32 0.5, %v693_v50 }
 0x6b3   :  { %v696_v54 = vmul.f32 %v694_v51, %v603_v38 }
 0x71f   :  { %v699_v52 = vpop.permute.xlu1 %698 }
 0x720   :  { %v701_v53 = vmul.f32 %v699_v52, %v694_v51 }
 0x722   :  { %703 = vrot.lane.b32.xlu0 %v701_v53, %s3246_s2  ;;  %v1250_v53 = vld [vmem:[#allocation6 + $0x2] sm:$0x3] }
 0x794   :  { %v704_v55 = vpop.permute.xlu0 %703 }
 0x795   :  { %v706_v56 = vadd.f32 %v704_v55, %v696_v54 }
 0x797   :  { %2941 = vtanh.f32 %v706_v56 }
 0x7a4   :  { %v2942_v57 = vpop.eup %2941 }
 0x7a5   :  { %709 = vrot.lane.b32.xlu1 %v2942_v57, %s3246_s2 }
 0x817   :  { %v710_v58 = vpop.permute.xlu1 %709 }
 0x818   :  { %v712_v59 = vmul.f32 %v710_v58, %v694_v51 }
 0x81a   :  { %714 = vrot.lane.b32.xlu0 %v712_v59, %s3247_s29 }
 0x88c   :  { %v715_v60 = vpop.permute.xlu0 %714 }
 0x88d   :  { %718 = vst.msk [vmem:[#allocation6 + $0x4] sm:$0x3] %vm142_vm0, %v715_v60  ;;  %2740 = vmatmul.mubr.msk.f32.vlgmr.msra.gmra.mxu0 %vm406_vm2, %v715_v60 }
 0x88e   :  { %2754 = vmatpush3.msra.mxu0 %v3385_v16  ;;  %2761 = vmatprep.mubr.msk.f32.mxu0 %vm3245_vm1, %v3243_v3 }
 0x88f   :  { %2755 = vmatprep.subr.mxu0 %v3243_v3 }
 0x890   :  { %2756 = vmatpush3.msra.mxu0 %v3390_v17 }
 0x891   :  { %2757 = vmatprep.subr.mxu0 %v3243_v3 }
 0x892   :  { %2758 = vmatpush3.msra.mxu0 %v3400_v22 }
 0x893   :  { %2759 = vmatprep.subr.mxu0 %v3243_v3 }
 0x894   :  { %2760 = vmatpush3.msra.mxu0 %v3408_v26  ;;  %v1251_v54 = vld [vmem:[#allocation6 + $0x4] sm:$0x3] }
 0x895   :  { %2775 = vmatprep.subr.mxu0 %v3243_v3 }
 0x94d   :  { %v789_v62 = vpop.f32.mrf.mxu0 }
 0x94e   :  { %v793_v63 = vadd.f32 %v789_v62, %v720_v61  ;;  %v1029_v62 = vld [vmem:[#allocation5 + $0xc] sm:$0x3] }
 0x94f   :  { %v2741_v0 = vpop.f32.mrf.mxu0 }
 0x950   :  { %2943 = vtanh.f32 %v793_v63  ;;  %v794_v2 = vmul.f32 0.5, %v793_v63 }
 0x952   :  { %2945 = vtanh.f32 %v794_v2 }
 0x95d   :  { %v2944_v1 = vpop.eup %2943 }
 0x95e   :  { %801 = vrot.lane.b32.xlu1 %v2944_v1, %s3246_s2 }
 0x95f   :  { %v2946_v4 = vpop.eup %2945 }
 0x960   :  { %v796_v5 = vmul.f32 0.5, %v2946_v4 }
 0x962   :  { %v797_v6 = vadd.f32 0.5, %v796_v5 }
 0x964   :  { %v799_v10 = vmul.f32 %v797_v6, %v706_v56  ;;  %v1249_v56 = vld [vmem:[#allocation6] sm:$0x3] }
 0x965   :  { %v1271_v57 = vcombine.low %v1249_v56, %v1250_v53 }
 0x967   :  { %v1279_v59 = vrot.slane %v1271_v57, %v3378_v8  ;;  %v2571_v57 = vld [vmem:[#allocation16] ss:$0 sm:$0xff] }
 0x9d0   :  { %v802_v7 = vpop.permute.xlu1 %801 }
 0x9d1   :  { %v804_v9 = vmul.f32 %v802_v7, %v797_v6 }
 0x9d3   :  { %806 = vrot.lane.b32.xlu0 %v804_v9, %s3246_s2 }
 0xa45   :  { %v807_v11 = vpop.permute.xlu0 %806 }
 0xa46   :  { %v809_v12 = vadd.f32 %v807_v11, %v799_v10 }
 0xa48   :  { %2947 = vtanh.f32 %v809_v12 }
 0xa55   :  { %v2948_v13 = vpop.eup %2947 }
 0xa56   :  { %812 = vrot.lane.b32.xlu1 %v2948_v13, %s3246_s2 }
 0xac8   :  { %v813_v14 = vpop.permute.xlu1 %812 }
 0xac9   :  { %v815_v15 = vmul.f32 %v813_v14, %v797_v6 }
 0xacb   :  { %817 = vrot.lane.b32.xlu0 %v815_v15, %s3247_s29 }
 0xb3d   :  { %v818_v18 = vpop.permute.xlu0 %817 }
 0xb3e   :  { %821 = vst.msk [vmem:[#allocation6 + $0x6] sm:$0x3] %vm142_vm0, %v818_v18  ;;  %2751 = vmatmul.mubr.msk.f32.vlgmr.msra.gmra.mxu1 %vm406_vm2, %v818_v18 }
 0xb3f   :  { %2765 = vmatpush3.msra.mxu1 %v3385_v16  ;;  %2772 = vmatprep.mubr.msk.f32.mxu1 %vm3245_vm1, %v3243_v3 }
 0xb40   :  { %2766 = vmatprep.subr.mxu1 %v3243_v3 }
 0xb41   :  { %2767 = vmatpush3.msra.mxu1 %v3390_v17 }
 0xb42   :  { %2768 = vmatprep.subr.mxu1 %v3243_v3 }
 0xb43   :  { %2769 = vmatpush3.msra.mxu1 %v3400_v22 }
 0xb44   :  { %2770 = vmatprep.subr.mxu1 %v3243_v3 }
 0xb45   :  { %2771 = vmatpush3.msra.mxu1 %v3408_v26  ;;  %v1252_v52 = vld [vmem:[#allocation6 + $0x6] sm:$0x3] }
 0xb46   :  { %v1272_v55 = vcombine.low %v1251_v54, %v1252_v52 }
 0xb48   :  { %v1286_v58 = vrot.slane %v1272_v55, %v3378_v8 }
 0xb4a   :  { %v1287_v61 = vcombine.low %v1279_v59, %v1286_v58 }
 0xbfe   :  { %v892_v20 = vpop.f32.mrf.mxu1 }
 0xbff   :  { %v896_v21 = vadd.f32 %v892_v20, %v823_v19  ;;  %v1132_v20 = vld [vmem:[#allocation5 + $0xe] sm:$0x3] }
 0xc00   :  { %v2752_v23 = vpop.f32.mrf.mxu1 }
 0xc01   :  { %2949 = vtanh.f32 %v896_v21  ;;  %v897_v25 = vmul.f32 0.5, %v896_v21 }
 0xc03   :  { %2951 = vtanh.f32 %v897_v25 }
 0xc0e   :  { %v2950_v24 = vpop.eup %2949 }
 0xc0f   :  { %904 = vrot.lane.b32.xlu1 %v2950_v24, %s3246_s2 }
 0xc10   :  { %v2952_v27 = vpop.eup %2951 }
 0xc11   :  { %v899_v28 = vmul.f32 0.5, %v2952_v27 }
 0xc13   :  { %v900_v29 = vadd.f32 0.5, %v899_v28 }
 0xc15   :  { %v902_v32 = vmul.f32 %v900_v29, %v809_v12 }
 0xc81   :  { %v905_v30 = vpop.permute.xlu1 %904 }
 0xc82   :  { %v907_v31 = vmul.f32 %v905_v30, %v900_v29 }
 0xc84   :  { %909 = vrot.lane.b32.xlu0 %v907_v31, %s3246_s2 }
 0xcf6   :  { %v910_v33 = vpop.permute.xlu0 %909 }
 0xcf7   :  { %v912_v34 = vadd.f32 %v910_v33, %v902_v32 }
 0xcf9   :  { %2953 = vtanh.f32 %v912_v34 }
 0xd06   :  { %v2954_v35 = vpop.eup %2953 }
 0xd07   :  { %915 = vrot.lane.b32.xlu1 %v2954_v35, %s3246_s2 }
 0xd79   :  { %v916_v36 = vpop.permute.xlu1 %915 }
 0xd7a   :  { %v918_v37 = vmul.f32 %v916_v36, %v900_v29 }
 0xd7c   :  { %920 = vrot.lane.b32.xlu0 %v918_v37, %s3247_s29  ;;  %v1243_v37 = vld [vmem:[#allocation13 + $0x18] sm:$0xff] }
 0xd7d   :  { %2786 = vmatprep.subr.mxu1 %v1243_v37 }
 0xdee   :  { %v921_v38 = vpop.permute.xlu0 %920 }
 0xdef   :  { %924 = vst.msk [vmem:[#allocation6 + $0x8] sm:$0x3] %vm142_vm0, %v921_v38  ;;  %2762 = vmatmul.mubr.msk.f32.vlgmr.msra.gmra.mxu0 %vm406_vm2, %v921_v38  ;;  %v1242_v38 = vld [vmem:[#allocation13 + $0x10] sm:$0xff] }
 0xdf0   :  { %2776 = vmatpush3.msra.mxu0 %v3385_v16  ;;  %2783 = vmatprep.mubr.msk.f32.mxu0 %vm3245_vm1, %v3243_v3 }
 0xdf1   :  { %2777 = vmatprep.subr.mxu0 %v3243_v3 }
 0xdf2   :  { %2778 = vmatpush3.msra.mxu0 %v3390_v17 }
 0xdf3   :  { %2779 = vmatprep.subr.mxu0 %v3243_v3 }
 0xdf4   :  { %2780 = vmatpush3.msra.mxu0 %v3400_v22 }
 0xdf5   :  { %2781 = vmatprep.subr.mxu0 %v3243_v3 }
 0xdf6   :  { %2782 = vmatpush3.msra.mxu0 %v3408_v26 }
 0xdf7   :  { %2797 = vmatprep.subr.mxu0 %v3243_v3 }
 0xeaf   :  { %v995_v40 = vpop.f32.mrf.mxu0 }
 0xeb0   :  { %v999_v16 = vadd.f32 %v995_v40, %v926_v39  ;;  %v1241_v39 = vld [vmem:[#allocation13 + $0x8] sm:$0xff]  ;;  %v1240_v40 = vld [vmem:[#allocation13] sm:$0xff] }
 0xeb1   :  { %v2763_v41 = vpop.f32.mrf.mxu0 }
 0xeb2   :  { %2955 = vtanh.f32 %v999_v16  ;;  %v1000_v43 = vmul.f32 0.5, %v999_v16 }
 0xeb4   :  { %2957 = vtanh.f32 %v1000_v43  ;;  %v3555_v43 = vld [vmem:[#allocation15 + $0x10] sm:$0xff] }
 0xebf   :  { %v2956_v42 = vpop.eup %2955 }
 0xec0   :  { %1007 = vrot.lane.b32.xlu1 %v2956_v42, %s3246_s2  ;;  %v3553_v42 = vld [vmem:[#allocation15 + $0x18] sm:$0xff] }
 0xec1   :  { %v2958_v17 = vpop.eup %2957 }
 0xec2   :  { %v1002_v44 = vmul.f32 0.5, %v2958_v17  ;;  %v1439_v17 = vld [vmem:[#allocation3 + $0x2] sm:$0x3] }
 0xec4   :  { %v1003_v45 = vadd.f32 0.5, %v1002_v44  ;;  %v3559_v44 = vld [vmem:[#allocation15 + $0x8] sm:$0xff] }
 0xec6   :  { %v1005_v26 = vmul.f32 %v1003_v45, %v912_v34 }
 0xf32   :  { %v1008_v22 = vpop.permute.xlu1 %1007 }
 0xf33   :  { %v1010_v46 = vmul.f32 %v1008_v22, %v1003_v45  ;;  %v1437_v22 = vld [vmem:[#allocation2 + $0x2] sm:$0x3] }
 0xf35   :  { %1012 = vrot.lane.b32.xlu0 %v1010_v46, %s3246_s2 }
 0xfa7   :  { %v1013_v47 = vpop.permute.xlu0 %1012 }
 0xfa8   :  { %v1015_v48 = vadd.f32 %v1013_v47, %v1005_v26  ;;  %v1253_v47 = vld [vmem:[#allocation6 + $0x8] sm:$0x3] }
 0xfaa   :  { %2959 = vtanh.f32 %v1015_v48 }
 0xfb7   :  { %v2960_v49 = vpop.eup %2959 }
 0xfb8   :  { %1018 = vrot.lane.b32.xlu1 %v2960_v49, %s3246_s2 }
0x102a   :  { %v1019_v50 = vpop.permute.xlu1 %1018 }
0x102b   :  { %v1021_v51 = vmul.f32 %v1019_v50, %v1003_v45  ;;  %v3564_v45 = vld [vmem:[#allocation15] sm:$0xff] }
0x102d   :  { %1023 = vrot.lane.b32.xlu0 %v1021_v51, %s3247_s29 }
0x109f   :  { %v1024_v60 = vpop.permute.xlu0 %1023 }
0x10a0   :  { %1027 = vst.msk [vmem:[#allocation6 + $0xa] sm:$0x3] %vm142_vm0, %v1024_v60  ;;  %2773 = vmatmul.mubr.msk.f32.vlgmr.msra.gmra.mxu1 %vm406_vm2, %v1024_v60 }
0x10a1   :  { %2794 = vmatprep.mubr.msk.f32.mxu1 %vm406_vm2, %v1287_v61  ;;  %2787 = vmatpush3.msra.mxu1 %v1243_v37 }
0x10a2   :  { %2788 = vmatprep.subr.mxu1 %v1242_v38 }
0x10a3   :  { %2789 = vmatpush3.msra.mxu1 %v1242_v38 }
0x10a4   :  { %2790 = vmatprep.subr.mxu1 %v1241_v39 }
0x10a5   :  { %2791 = vmatpush3.msra.mxu1 %v1241_v39 }
0x10a6   :  { %2792 = vmatprep.subr.mxu1 %v1240_v40 }
0x10a7   :  { %2793 = vmatpush3.msra.mxu1 %v1240_v40  ;;  %v1254_v26 = vld [vmem:[#allocation6 + $0xa] sm:$0x3] }
0x10a8   :  { %2808 = vmatprep.subr.mxu1 %v3243_v3 }
0x1160   :  { %v1098_v63 = vpop.f32.mrf.mxu1 }
0x1161   :  { %v1102_v0 = vadd.f32 %v1098_v63, %v1029_v62 }
0x1162   :  { %v2774_v1 = vpop.f32.mrf.mxu1 }
0x1163   :  { %2961 = vtanh.f32 %v1102_v0  ;;  %v1103_v4 = vmul.f32 0.5, %v1102_v0 }
0x1165   :  { %2963 = vtanh.f32 %v1103_v4 }
0x1170   :  { %v2962_v2 = vpop.eup %2961 }
0x1171   :  { %1110 = vrot.lane.b32.xlu1 %v2962_v2, %s3246_s2 }
0x1172   :  { %v2964_v5 = vpop.eup %2963 }
0x1173   :  { %v1105_v6 = vmul.f32 0.5, %v2964_v5 }
0x1175   :  { %v1106_v7 = vadd.f32 0.5, %v1105_v6 }
0x1177   :  { %v1108_v11 = vmul.f32 %v1106_v7, %v1015_v48  ;;  %v1288_v48 = vcombine.low %v1253_v47, %v1254_v26 }
0x1179   :  { %v1296_v52 = vrot.slane %v1288_v48, %v3378_v8 }
0x11e3   :  { %v1111_v9 = vpop.permute.xlu1 %1110 }
0x11e4   :  { %v1113_v10 = vmul.f32 %v1111_v9, %v1106_v7 }
0x11e6   :  { %1115 = vrot.lane.b32.xlu0 %v1113_v10, %s3246_s2 }
0x1258   :  { %v1116_v12 = vpop.permute.xlu0 %1115 }
0x1259   :  { %v1118_v13 = vadd.f32 %v1116_v12, %v1108_v11 }
0x125b   :  { %2965 = vtanh.f32 %v1118_v13 }
0x1268   :  { %v2966_v14 = vpop.eup %2965 }
0x1269   :  { %1121 = vrot.lane.b32.xlu1 %v2966_v14, %s3246_s2 }
0x12db   :  { %v1122_v15 = vpop.permute.xlu1 %1121 }
0x12dc   :  { %v1124_v18 = vmul.f32 %v1122_v15, %v1106_v7 }
0x12de   :  { %1126 = vrot.lane.b32.xlu0 %v1124_v18, %s3247_s29 }
0x1350   :  { %v1127_v19 = vpop.permute.xlu0 %1126 }
0x1351   :  { %1130 = vst.msk [vmem:[#allocation6 + $0xc] sm:$0x3] %vm142_vm0, %v1127_v19  ;;  %2784 = vmatmul.mubr.msk.f32.vlgmr.msra.gmra.mxu0 %vm406_vm2, %v1127_v19 }
0x1352   :  { %2805 = vmatprep.mubr.msk.f32.mxu0 %vm3245_vm1, %v3243_v3  ;;  %2798 = vmatpush3.msra.mxu0 %v3553_v42 }
0x1353   :  { %2799 = vmatprep.subr.mxu0 %v3243_v3 }
0x1354   :  { %2800 = vmatpush3.msra.mxu0 %v3555_v43 }
0x1355   :  { %2801 = vmatprep.subr.mxu0 %v3243_v3 }
0x1356   :  { %2802 = vmatpush3.msra.mxu0 %v3559_v44 }
0x1357   :  { %2803 = vmatprep.subr.mxu0 %v3243_v3 }
0x1358   :  { %2804 = vmatpush3.msra.mxu0 %v3564_v45  ;;  %v1255_v49 = vld [vmem:[#allocation6 + $0xc] sm:$0x3] }
0x1359   :  { %2806 = vmatmul.mubr.msk.f32.vlgmr.msra.gmra.mxu0 %vm406_vm2, %v1437_v22  ;;  %2819 = vmatprep.subr.mxu0 %v3243_v3 }
0x135a   :  { %2820 = vmatpush3.msra.mxu0 %v3553_v42  ;;  %2827 = vmatprep.mubr.msk.f32.mxu0 %vm3245_vm1, %v3243_v3 }
0x135b   :  { %2821 = vmatprep.subr.mxu0 %v3243_v3 }
0x135c   :  { %2822 = vmatpush3.msra.mxu0 %v3555_v43 }
0x135d   :  { %2823 = vmatprep.subr.mxu0 %v3243_v3 }
0x135e   :  { %2824 = vmatpush3.msra.mxu0 %v3559_v44 }
0x135f   :  { %2825 = vmatprep.subr.mxu0 %v3243_v3 }
0x1360   :  { %2826 = vmatpush3.msra.mxu0 %v3564_v45 }
0x1361   :  { %2841 = vmatprep.subr.mxu0 %v3243_v3 }
0x1411   :  { %v1201_v21 = vpop.f32.mrf.mxu0 }
0x1412   :  { %v1205_v23 = vadd.f32 %v1201_v21, %v1132_v20 }
0x1413   :  { %v2785_v24 = vpop.f32.mrf.mxu0 }
0x1414   :  { %2967 = vtanh.f32 %v1205_v23  ;;  %v1206_v27 = vmul.f32 0.5, %v1205_v23 }
0x1416   :  { %2969 = vtanh.f32 %v1206_v27 }
0x1419   :  { %v1510_v55 = vpop.f32.mrf.mxu0 }
0x141b   :  { %v2807_v56 = vpop.f32.mrf.mxu0 }
0x1421   :  { %v2968_v25 = vpop.eup %2967 }
0x1422   :  { %1213 = vrot.lane.b32.xlu1 %v2968_v25, %s3246_s2 }
0x1423   :  { %v2970_v28 = vpop.eup %2969 }
0x1424   :  { %v1208_v29 = vmul.f32 0.5, %v2970_v28 }
0x1426   :  { %v1209_v30 = vadd.f32 0.5, %v1208_v29 }
0x1428   :  { %v1211_v33 = vmul.f32 %v1209_v30, %v1118_v13 }
0x1494   :  { %v1214_v31 = vpop.permute.xlu1 %1213 }
0x1495   :  { %v1216_v32 = vmul.f32 %v1214_v31, %v1209_v30 }
0x1497   :  { %1218 = vrot.lane.b32.xlu0 %v1216_v32, %s3246_s2 }
0x1509   :  { %v1219_v34 = vpop.permute.xlu0 %1218 }
0x150a   :  { %v3547_v35 = vadd.f32 %v1219_v34, %v1211_v33 }
0x150c   :  { %2971 = vtanh.f32 %v3547_v35 }
0x1519   :  { %v2972_v36 = vpop.eup %2971 }
0x151a   :  { %1224 = vrot.lane.b32.xlu1 %v2972_v36, %s3246_s2 }
0x158c   :  { %v1225_v16 = vpop.permute.xlu1 %1224 }
0x158d   :  { %v1227_v41 = vmul.f32 %v1225_v16, %v1209_v30 }
0x158f   :  { %1229 = vrot.lane.b32.xlu0 %v1227_v41, %s3247_s29 }
0x1593   :  { %1521 = vrot.lane.b32.xlu0 %v1439_v17, %s3246_s2 }
0x1601   :  { %v1230_v46 = vpop.permute.xlu0 %1229 }
0x1602   :  { %1233 = vst.msk [vmem:[#allocation6 + $0xe] sm:$0x3] %vm142_vm0, %v1230_v46  ;;  %1234 = vst.msk [vmem:[#allocation2] sm:$0x3] %vm142_vm0, %v1230_v46 }
0x1609   :  { %v1256_v50 = vld [vmem:[#allocation6 + $0xe] sm:$0x3] }
0x160a   :  { %v1289_v51 = vcombine.low %v1255_v49, %v1256_v50 }
0x160c   :  { %v1303_v53 = vrot.slane %v1289_v51, %v3378_v8 }
0x160e   :  { %v1304_v54 = vcombine.low %v1296_v52, %v1303_v53 }
0x1610   :  { %2795 = vmatmul.mubr.msk.f32.vlgmr.msra.gmra.mxu1 %vm406_vm2, %v1304_v54 }
0x1611   :  { %2809 = vmatpush3.msra.mxu1 %v3553_v42  ;;  %2816 = vmatprep.mubr.msk.f32.mxu1 %vm3245_vm1, %v3243_v3 }
0x1612   :  { %2810 = vmatprep.subr.mxu1 %v3243_v3 }
0x1613   :  { %2811 = vmatpush3.msra.mxu1 %v3555_v43 }
0x1614   :  { %2812 = vmatprep.subr.mxu1 %v3243_v3 }
0x1615   :  { %2813 = vmatpush3.msra.mxu1 %v3559_v44 }
0x1616   :  { %2814 = vmatprep.subr.mxu1 %v3243_v3 }
0x1617   :  { %2815 = vmatpush3.msra.mxu1 %v3564_v45 }
0x1618   :  { %2830 = vmatprep.subr.mxu1 %v3243_v3 }
0x16d0   :  { %v2796_v58 = vpop.f32.mrf.mxu1 }
0x16d1   :  { %v1381_v59 = vadd.f32 %v2796_v58, %v2571_v57 }
0x16d2   :  { %v1375_v60 = vpop.f32.mrf.mxu1 }
0x16d3   :  { %v1403_v61 = vcombine.high %v1381_v59, %v1381_v59  ;;  %v1410_v62 = vrot.slane %v1381_v59, %v3378_v8  ;;  %2576 = vst.sshfl [vmem:[#allocation5 + $0x8] sm:$0x3 pattern:$0x76325410] %v1381_v59  ;;  %v1376_v63 = vadd.f32 %v2571_v57, %v1375_v60 }
0x16d5   :  { %v1417_v0 = vrot.slane %v1403_v61, %v3378_v8  ;;  %v1418_v1 = vcombine.high %v1410_v62, %v1410_v62  ;;  %2577 = vst.sshfl [vmem:[#allocation5 + $0xc] sm:$0x3 pattern:$0x76325410] %v1403_v61  ;;  %v1386_v2 = vcombine.high %v1376_v63, %v1376_v63  ;;  %v1393_v4 = vrot.slane %v1376_v63, %v3378_v8 }
0x16d6   :  { %2574 = vst.sshfl [vmem:[#allocation5] sm:$0x3 pattern:$0x76325410] %v1376_v63 }
0x16d7   :  { %v1419_v5 = vcombine.high %v1417_v0, %v1417_v0  ;;  %1433 = vst [vmem:[#allocation5 + $0xa] sm:$0x3] %v1418_v1  ;;  %v1400_v6 = vrot.slane %v1386_v2, %v3378_v8  ;;  %v1401_v7 = vcombine.high %v1393_v4, %v1393_v4  ;;  %2575 = vst.sshfl [vmem:[#allocation5 + $0x4] sm:$0x3 pattern:$0x76325410] %v1386_v2  ;;  %v1522_v8 = vpop.permute.xlu0 %1521 }
0x16d9   :  { %1435 = vst [vmem:[#allocation5 + $0xe] sm:$0x3] %v1419_v5  ;;  %v1402_v9 = vcombine.high %v1400_v6, %v1400_v6  ;;  %1429 = vst [vmem:[#allocation5 + $0x2] sm:$0x3] %v1401_v7 }
0x16db   :  { %1431 = vst [vmem:[#allocation5 + $0x6] sm:$0x3] %v1402_v9 }
0x16dd   :  { %v1440_v10 = vld [vmem:[#allocation5] sm:$0x3] }
0x16de   :  { %v1514_v11 = vadd.f32 %v1510_v55, %v1440_v10  ;;  %v1642_v49 = vld [vmem:[#allocation5 + $0x4] sm:$0x3] }
0x16e0   :  { %2973 = vtanh.f32 %v1514_v11  ;;  %v1515_v13 = vmul.f32 0.5, %v1514_v11  ;;  %v1542_v30 = vld [vmem:[#allocation5 + $0x2] sm:$0x3] }
0x16e2   :  { %2975 = vtanh.f32 %v1515_v13  ;;  %v1742_v6 = vld [vmem:[#allocation5 + $0x6] sm:$0x3] }
0x16ed   :  { %v2974_v12 = vpop.eup %2973 }
0x16ee   :  { %1526 = vrot.lane.b32.xlu1 %v2974_v12, %s3246_s2 }
0x16ef   :  { %v2976_v14 = vpop.eup %2975 }
0x16f0   :  { %v1517_v15 = vmul.f32 0.5, %v2976_v14 }
0x16f2   :  { %v1518_v18 = vadd.f32 0.5, %v1517_v15 }
0x16f4   :  { %v1524_v21 = vmul.f32 %v1522_v8, %v1518_v18 }
0x1760   :  { %v1527_v19 = vpop.permute.xlu1 %1526 }
0x1761   :  { %v1529_v20 = vmul.f32 %v1527_v19, %v1518_v18 }
0x1763   :  { %1531 = vrot.lane.b32.xlu1 %v1529_v20, %s3246_s2 }
0x17d5   :  { %v1532_v23 = vpop.permute.xlu1 %1531 }
0x17d6   :  { %v1534_v24 = vadd.f32 %v1532_v23, %v1524_v21 }
0x17d8   :  { %2977 = vtanh.f32 %v1534_v24 }
0x17e5   :  { %v2978_v25 = vpop.eup %2977 }
0x17e6   :  { %1537 = vrot.lane.b32.xlu0 %v2978_v25, %s3246_s2 }
0x1858   :  { %v1538_v27 = vpop.permute.xlu0 %1537 }
0x1859   :  { %v3603_v28 = vmul.f32 %v1538_v27, %v1518_v18 }
0x185b   :  { %1544 = vrot.lane.b32.xlu1 %v3603_v28, %s3247_s29 }
0x18cd   :  { %v1545_v29 = vpop.permute.xlu1 %1544 }
0x18ce   :  { %2817 = vmatmul.mubr.msk.f32.vlgmr.msra.gmra.mxu1 %vm406_vm2, %v1545_v29  ;;  %v1842_v29 = vld [vmem:[#allocation5 + $0x8] sm:$0x3] }
0x18cf   :  { %2831 = vmatpush3.msra.mxu1 %v3553_v42  ;;  %2838 = vmatprep.mubr.msk.f32.mxu1 %vm3245_vm1, %v3243_v3 }
0x18d0   :  { %2832 = vmatprep.subr.mxu1 %v3243_v3 }
0x18d1   :  { %2833 = vmatpush3.msra.mxu1 %v3555_v43 }
0x18d2   :  { %2834 = vmatprep.subr.mxu1 %v3243_v3 }
0x18d3   :  { %2835 = vmatpush3.msra.mxu1 %v3559_v44 }
0x18d4   :  { %2836 = vmatprep.subr.mxu1 %v3243_v3 }
0x18d5   :  { %2837 = vmatpush3.msra.mxu1 %v3564_v45 }
0x18d6   :  { %2852 = vmatprep.subr.mxu1 %v3243_v3 }
0x198e   :  { %v1614_v31 = vpop.f32.mrf.mxu1 }
0x198f   :  { %v1618_v32 = vadd.f32 %v1614_v31, %v1542_v30 }
0x1990   :  { %v2818_v33 = vpop.f32.mrf.mxu1 }
0x1991   :  { %2979 = vtanh.f32 %v1618_v32  ;;  %v1619_v36 = vmul.f32 0.5, %v1618_v32 }
0x1993   :  { %2981 = vtanh.f32 %v1619_v36 }
0x199e   :  { %v2980_v34 = vpop.eup %2979 }
0x199f   :  { %1626 = vrot.lane.b32.xlu0 %v2980_v34, %s3246_s2 }
0x19a0   :  { %v2982_v37 = vpop.eup %2981 }
0x19a1   :  { %v1621_v38 = vmul.f32 0.5, %v2982_v37 }
0x19a3   :  { %v1622_v39 = vadd.f32 0.5, %v1621_v38 }
0x19a5   :  { %v1624_v41 = vmul.f32 %v1622_v39, %v1534_v24 }
0x1a11   :  { %v1627_v40 = vpop.permute.xlu0 %1626 }
0x1a12   :  { %v1629_v16 = vmul.f32 %v1627_v40, %v1622_v39 }
0x1a14   :  { %1631 = vrot.lane.b32.xlu1 %v1629_v16, %s3246_s2 }
0x1a86   :  { %v1632_v17 = vpop.permute.xlu1 %1631 }
0x1a87   :  { %v1634_v22 = vadd.f32 %v1632_v17, %v1624_v41 }
0x1a89   :  { %2983 = vtanh.f32 %v1634_v22 }
0x1a96   :  { %v2984_v46 = vpop.eup %2983 }
0x1a97   :  { %1637 = vrot.lane.b32.xlu0 %v2984_v46, %s3246_s2 }
0x1b09   :  { %v1638_v26 = vpop.permute.xlu0 %1637 }
0x1b0a   :  { %v1640_v47 = vmul.f32 %v1638_v26, %v1622_v39 }
0x1b0c   :  { %1644 = vrot.lane.b32.xlu1 %v1640_v47, %s3247_s29  ;;  %v1641_v1 = vadd.f32 %v1640_v47, %v3603_v28 }
0x1b7e   :  { %v1645_v48 = vpop.permute.xlu1 %1644 }
0x1b7f   :  { %2828 = vmatmul.mubr.msk.f32.vlgmr.msra.gmra.mxu0 %vm406_vm2, %v1645_v48 }
0x1b80   :  { %2842 = vmatpush3.msra.mxu0 %v3553_v42  ;;  %2849 = vmatprep.mubr.msk.f32.mxu0 %vm3245_vm1, %v3243_v3 }
0x1b81   :  { %2843 = vmatprep.subr.mxu0 %v3243_v3 }
0x1b82   :  { %2844 = vmatpush3.msra.mxu0 %v3555_v43 }
0x1b83   :  { %2845 = vmatprep.subr.mxu0 %v3243_v3 }
0x1b84   :  { %2846 = vmatpush3.msra.mxu0 %v3559_v44 }
0x1b85   :  { %2847 = vmatprep.subr.mxu0 %v3243_v3 }
0x1b86   :  { %2848 = vmatpush3.msra.mxu0 %v3564_v45 }
0x1b87   :  { %2863 = vmatprep.subr.mxu0 %v3243_v3 }
0x1c3f   :  { %v1714_v50 = vpop.f32.mrf.mxu0 }
0x1c40   :  { %v1718_v51 = vadd.f32 %v1714_v50, %v1642_v49  ;;  %v1942_v49 = vld [vmem:[#allocation5 + $0xa] sm:$0x3] }
0x1c41   :  { %v2829_v52 = vpop.f32.mrf.mxu0 }
0x1c42   :  { %2985 = vtanh.f32 %v1718_v51  ;;  %v1719_v54 = vmul.f32 0.5, %v1718_v51 }
0x1c44   :  { %2987 = vtanh.f32 %v1719_v54 }
0x1c4f   :  { %v2986_v53 = vpop.eup %2985 }
0x1c50   :  { %1726 = vrot.lane.b32.xlu0 %v2986_v53, %s3246_s2 }
0x1c51   :  { %v2988_v55 = vpop.eup %2987 }
0x1c52   :  { %v1721_v56 = vmul.f32 0.5, %v2988_v55 }
0x1c54   :  { %v1722_v57 = vadd.f32 0.5, %v1721_v56 }
0x1c56   :  { %v1724_v60 = vmul.f32 %v1722_v57, %v1634_v22 }
0x1cc2   :  { %v1727_v58 = vpop.permute.xlu0 %1726 }
0x1cc3   :  { %v1729_v59 = vmul.f32 %v1727_v58, %v1722_v57 }
0x1cc5   :  { %1731 = vrot.lane.b32.xlu1 %v1729_v59, %s3246_s2 }
0x1d37   :  { %v1732_v61 = vpop.permute.xlu1 %1731 }
0x1d38   :  { %v1734_v62 = vadd.f32 %v1732_v61, %v1724_v60 }
0x1d3a   :  { %2989 = vtanh.f32 %v1734_v62 }
0x1d47   :  { %v2990_v63 = vpop.eup %2989 }
0x1d48   :  { %1737 = vrot.lane.b32.xlu0 %v2990_v63, %s3246_s2 }
0x1dba   :  { %v1738_v0 = vpop.permute.xlu0 %1737 }
0x1dbb   :  { %v1740_v2 = vmul.f32 %v1738_v0, %v1722_v57  ;;  %v2042_v0 = vld [vmem:[#allocation5 + $0xc] sm:$0x3] }
0x1dbd   :  { %v1741_v4 = vadd.f32 %v1740_v2, %v1641_v1  ;;  %1744 = vrot.lane.b32.xlu1 %v1740_v2, %s3247_s29 }
0x1e2f   :  { %v1745_v5 = vpop.permute.xlu1 %1744 }
0x1e30   :  { %2839 = vmatmul.mubr.msk.f32.vlgmr.msra.gmra.mxu1 %vm406_vm2, %v1745_v5 }
0x1e31   :  { %2853 = vmatpush3.msra.mxu1 %v3553_v42  ;;  %2860 = vmatprep.mubr.msk.f32.mxu1 %vm3245_vm1, %v3243_v3 }
0x1e32   :  { %2854 = vmatprep.subr.mxu1 %v3243_v3 }
0x1e33   :  { %2855 = vmatpush3.msra.mxu1 %v3555_v43 }
0x1e34   :  { %2856 = vmatprep.subr.mxu1 %v3243_v3 }
0x1e35   :  { %2857 = vmatpush3.msra.mxu1 %v3559_v44 }
0x1e36   :  { %2858 = vmatprep.subr.mxu1 %v3243_v3 }
0x1e37   :  { %2859 = vmatpush3.msra.mxu1 %v3564_v45 }
0x1e38   :  { %2874 = vmatprep.subr.mxu1 %v3243_v3 }
0x1ef0   :  { %v1814_v7 = vpop.f32.mrf.mxu1 }
0x1ef1   :  { %v1818_v9 = vadd.f32 %v1814_v7, %v1742_v6 }
0x1ef2   :  { %v2840_v10 = vpop.f32.mrf.mxu1 }
0x1ef3   :  { %2991 = vtanh.f32 %v1818_v9  ;;  %v1819_v12 = vmul.f32 0.5, %v1818_v9 }
0x1ef5   :  { %2993 = vtanh.f32 %v1819_v12 }
0x1f00   :  { %v2992_v11 = vpop.eup %2991 }
0x1f01   :  { %1826 = vrot.lane.b32.xlu0 %v2992_v11, %s3246_s2 }
0x1f02   :  { %v2994_v13 = vpop.eup %2993 }
0x1f03   :  { %v1821_v14 = vmul.f32 0.5, %v2994_v13 }
0x1f05   :  { %v1822_v15 = vadd.f32 0.5, %v1821_v14 }
0x1f07   :  { %v1824_v20 = vmul.f32 %v1822_v15, %v1734_v62 }
0x1f73   :  { %v1827_v18 = vpop.permute.xlu0 %1826 }
0x1f74   :  { %v1829_v19 = vmul.f32 %v1827_v18, %v1822_v15 }
0x1f76   :  { %1831 = vrot.lane.b32.xlu1 %v1829_v19, %s3246_s2 }
0x1fe8   :  { %v1832_v8 = vpop.permute.xlu1 %1831 }
0x1fe9   :  { %v1834_v21 = vadd.f32 %v1832_v8, %v1824_v20 }
0x1feb   :  { %2995 = vtanh.f32 %v1834_v21 }
0x1ff8   :  { %v2996_v23 = vpop.eup %2995 }
0x1ff9   :  { %1837 = vrot.lane.b32.xlu0 %v2996_v23, %s3246_s2  ;;  %v2142_v23 = vld [vmem:[#allocation5 + $0xe] sm:$0x3] }
0x206b   :  { %v1838_v24 = vpop.permute.xlu0 %1837 }
0x206c   :  { %v1840_v25 = vmul.f32 %v1838_v24, %v1822_v15 }
0x206e   :  { %v1841_v27 = vadd.f32 %v1840_v25, %v1741_v4  ;;  %1844 = vrot.lane.b32.xlu1 %v1840_v25, %s3247_s29 }
0x20e0   :  { %v1845_v28 = vpop.permute.xlu1 %1844 }
0x20e1   :  { %2850 = vmatmul.mubr.msk.f32.vlgmr.msra.gmra.mxu0 %vm406_vm2, %v1845_v28 }
0x20e2   :  { %2864 = vmatpush3.msra.mxu0 %v3553_v42  ;;  %2871 = vmatprep.mubr.msk.f32.mxu0 %vm3245_vm1, %v3243_v3 }
0x20e3   :  { %2865 = vmatprep.subr.mxu0 %v3243_v3 }
0x20e4   :  { %2866 = vmatpush3.msra.mxu0 %v3555_v43 }
0x20e5   :  { %2867 = vmatprep.subr.mxu0 %v3243_v3 }
0x20e6   :  { %2868 = vmatpush3.msra.mxu0 %v3559_v44 }
0x20e7   :  { %2869 = vmatprep.subr.mxu0 %v3243_v3 }
0x20e8   :  { %2870 = vmatpush3.msra.mxu0 %v3564_v45 }
0x20e9   :  { %2885 = vmatprep.subr.mxu0 %v3243_v3 }
0x21a1   :  { %v1914_v30 = vpop.f32.mrf.mxu0 }
0x21a2   :  { %v1918_v31 = vadd.f32 %v1914_v30, %v1842_v29 }
0x21a3   :  { %v2851_v32 = vpop.f32.mrf.mxu0 }
0x21a4   :  { %2997 = vtanh.f32 %v1918_v31  ;;  %v1919_v34 = vmul.f32 0.5, %v1918_v31 }
0x21a6   :  { %2999 = vtanh.f32 %v1919_v34 }
0x21b1   :  { %v2998_v33 = vpop.eup %2997 }
0x21b2   :  { %1926 = vrot.lane.b32.xlu0 %v2998_v33, %s3246_s2 }
0x21b3   :  { %v3000_v36 = vpop.eup %2999 }
0x21b4   :  { %v1921_v37 = vmul.f32 0.5, %v3000_v36 }
0x21b6   :  { %v1922_v38 = vadd.f32 0.5, %v1921_v37 }
0x21b8   :  { %v1924_v16 = vmul.f32 %v1922_v38, %v1834_v21 }
0x2224   :  { %v1927_v39 = vpop.permute.xlu0 %1926 }
0x2225   :  { %v1929_v40 = vmul.f32 %v1927_v39, %v1922_v38 }
0x2227   :  { %1931 = vrot.lane.b32.xlu1 %v1929_v40, %s3246_s2  ;;  %v2266_v40 = vld [vmem:[%s3753_s7 + $0x18] sm:$0xff] }
0x2299   :  { %v1932_v41 = vpop.permute.xlu1 %1931 }
0x229a   :  { %v1934_v17 = vadd.f32 %v1932_v41, %v1924_v16  ;;  %v2265_v16 = vld [vmem:[%s3753_s7 + $0x10] sm:$0xff]  ;;  %v2264_v41 = vld [vmem:[%s3753_s7 + $0x8] sm:$0xff] }
0x229c   :  { %3001 = vtanh.f32 %v1934_v17 }
0x22a9   :  { %v3002_v22 = vpop.eup %3001 }
0x22aa   :  { %1937 = vrot.lane.b32.xlu0 %v3002_v22, %s3246_s2 }
0x231c   :  { %v1938_v46 = vpop.permute.xlu0 %1937 }
0x231d   :  { %v1940_v26 = vmul.f32 %v1938_v46, %v1922_v38  ;;  %v2349_v46 = vld [vmem:[%s3755_s9] sm:$0xff] }
0x231f   :  { %v1941_v47 = vadd.f32 %v1940_v26, %v1841_v27  ;;  %1944 = vrot.lane.b32.xlu1 %v1940_v26, %s3247_s29 }
0x2391   :  { %v1945_v48 = vpop.permute.xlu1 %1944 }
0x2392   :  { %2861 = vmatmul.mubr.msk.f32.vlgmr.msra.gmra.mxu1 %vm406_vm2, %v1945_v48 }
0x2393   :  { %2875 = vmatpush3.msra.mxu1 %v3553_v42  ;;  %2882 = vmatprep.mubr.msk.f32.mxu1 %vm3245_vm1, %v3243_v3 }
0x2394   :  { %2876 = vmatprep.subr.mxu1 %v3243_v3 }
0x2395   :  { %2877 = vmatpush3.msra.mxu1 %v3555_v43 }
0x2396   :  { %2878 = vmatprep.subr.mxu1 %v3243_v3 }
0x2397   :  { %2879 = vmatpush3.msra.mxu1 %v3559_v44 }
0x2398   :  { %2880 = vmatprep.subr.mxu1 %v3243_v3 }
0x2399   :  { %2881 = vmatpush3.msra.mxu1 %v3564_v45 }
0x239a   :  { %2896 = vmatprep.subr.mxu1 %v3243_v3 }
0x2452   :  { %v2014_v50 = vpop.f32.mrf.mxu1 }
0x2453   :  { %v2018_v42 = vadd.f32 %v2014_v50, %v1942_v49  ;;  %v2252_v49 = vld [vmem:[#allocation4] sm:$0x3] }
0x2454   :  { %v2862_v51 = vpop.f32.mrf.mxu1 }
0x2455   :  { %3003 = vtanh.f32 %v2018_v42  ;;  %v2019_v53 = vmul.f32 0.5, %v2018_v42 }
0x2457   :  { %3005 = vtanh.f32 %v2019_v53  ;;  %v2432_v53 = vld [vmem:[%s3757_s11] sm:$0xff] }
0x2462   :  { %v3004_v52 = vpop.eup %3003 }
0x2463   :  { %2026 = vrot.lane.b32.xlu0 %v3004_v52, %s3246_s2 }
0x2464   :  { %v3006_v43 = vpop.eup %3005 }
0x2465   :  { %v2021_v54 = vmul.f32 0.5, %v3006_v43  ;;  %v2586_v43 = vld [vmem:[#allocation18] ss:$0 sm:$0xff] }
0x2467   :  { %v2022_v55 = vadd.f32 0.5, %v2021_v54 }
0x2469   :  { %v2024_v45 = vmul.f32 %v2022_v55, %v1934_v17 }
0x24d5   :  { %v2027_v44 = vpop.permute.xlu0 %2026 }
0x24d6   :  { %v2029_v56 = vmul.f32 %v2027_v44, %v2022_v55 }
0x24d8   :  { %2031 = vrot.lane.b32.xlu1 %v2029_v56, %s3246_s2 }
0x254a   :  { %v2032_v57 = vpop.permute.xlu1 %2031 }
0x254b   :  { %v2034_v58 = vadd.f32 %v2032_v57, %v2024_v45 }
0x254d   :  { %3007 = vtanh.f32 %v2034_v58 }
0x255a   :  { %v3008_v59 = vpop.eup %3007 }
0x255b   :  { %2037 = vrot.lane.b32.xlu0 %v3008_v59, %s3246_s2 }
0x25cd   :  { %v2038_v60 = vpop.permute.xlu0 %2037 }
0x25ce   :  { %v2040_v61 = vmul.f32 %v2038_v60, %v2022_v55 }
0x25d0   :  { %v2041_v62 = vadd.f32 %v2040_v61, %v1941_v47  ;;  %2044 = vrot.lane.b32.xlu1 %v2040_v61, %s3247_s29 }
0x2642   :  { %v2045_v63 = vpop.permute.xlu1 %2044 }
0x2643   :  { %2872 = vmatmul.mubr.msk.f32.vlgmr.msra.gmra.mxu0 %vm406_vm2, %v2045_v63 }
0x2644   :  { %2893 = vmatprep.mubr.msk.f32.mxu0 %vm3245_vm1, %v3243_v3  ;;  %2886 = vmatpush3.msra.mxu0 %v2266_v40 }
0x2645   :  { %2887 = vmatprep.subr.mxu0 %v3243_v3 }
0x2646   :  { %2888 = vmatpush3.msra.mxu0 %v2265_v16 }
0x2647   :  { %2889 = vmatprep.subr.mxu0 %v3243_v3 }
0x2648   :  { %2890 = vmatpush3.msra.mxu0 %v2264_v41 }
0x2649   :  { %2891 = vmatprep.subr.mxu0 %v3243_v3 }
0x2703   :  { %v2114_v1 = vpop.f32.mrf.mxu0 }
0x2704   :  { %v2118_v2 = vadd.f32 %v2114_v1, %v2042_v0 }
0x2705   :  { %v2873_v4 = vpop.f32.mrf.mxu0 }
0x2706   :  { %3009 = vtanh.f32 %v2118_v2  ;;  %v2119_v6 = vmul.f32 0.5, %v2118_v2 }
0x2708   :  { %3011 = vtanh.f32 %v2119_v6 }
0x2713   :  { %v3010_v5 = vpop.eup %3009 }
0x2714   :  { %2126 = vrot.lane.b32.xlu0 %v3010_v5, %s3246_s2 }
0x2715   :  { %v3012_v7 = vpop.eup %3011 }
0x2716   :  { %v2121_v9 = vmul.f32 0.5, %v3012_v7 }
0x2718   :  { %v2122_v10 = vadd.f32 0.5, %v2121_v9 }
0x271a   :  { %v2124_v13 = vmul.f32 %v2122_v10, %v2034_v58 }
0x2786   :  { %v2127_v11 = vpop.permute.xlu0 %2126 }
0x2787   :  { %v2129_v12 = vmul.f32 %v2127_v11, %v2122_v10 }
0x2789   :  { %2131 = vrot.lane.b32.xlu1 %v2129_v12, %s3246_s2 }
0x27fb   :  { %v2132_v14 = vpop.permute.xlu1 %2131 }
0x27fc   :  { %v2134_v15 = vadd.f32 %v2132_v14, %v2124_v13 }
0x27fe   :  { %3013 = vtanh.f32 %v2134_v15 }
0x280b   :  { %v3014_v18 = vpop.eup %3013 }
0x280c   :  { %2137 = vrot.lane.b32.xlu0 %v3014_v18, %s3246_s2 }
0x287e   :  { %v2138_v19 = vpop.permute.xlu0 %2137 }
0x287f   :  { %v2140_v20 = vmul.f32 %v2138_v19, %v2122_v10 }
0x2881   :  { %v2141_v8 = vadd.f32 %v2140_v20, %v2041_v62  ;;  %2144 = vrot.lane.b32.xlu1 %v2140_v20, %s3247_s29 }
0x28f3   :  { %v2145_v21 = vpop.permute.xlu1 %2144 }
0x28f4   :  { %2883 = vmatmul.mubr.msk.f32.vlgmr.msra.gmra.mxu1 %vm406_vm2, %v2145_v21 }
0x28f5   :  { %2898 = vmatprep.mubr.msk.f32.mxu1 %vm3245_vm1, %v3243_v3  ;;  %2897 = vmatpush3.msra.mxu1 %v2349_v46 }
0x29b4   :  { %v2214_v24 = vpop.f32.mrf.mxu1 }
0x29b5   :  { %v2218_v25 = vadd.f32 %v2214_v24, %v2142_v23 }
0x29b6   :  { %v2884_v27 = vpop.f32.mrf.mxu1 }
0x29b7   :  { %3015 = vtanh.f32 %v2218_v25  ;;  %v2219_v29 = vmul.f32 0.5, %v2218_v25 }
0x29b9   :  { %3017 = vtanh.f32 %v2219_v29 }
0x29c4   :  { %v3016_v28 = vpop.eup %3015 }
0x29c5   :  { %2226 = vrot.lane.b32.xlu0 %v3016_v28, %s3246_s2 }
0x29c6   :  { %v3018_v30 = vpop.eup %3017 }
0x29c7   :  { %v2221_v31 = vmul.f32 0.5, %v3018_v30 }
0x29c9   :  { %v2222_v32 = vadd.f32 0.5, %v2221_v31 }
0x29cb   :  { %v2224_v36 = vmul.f32 %v2222_v32, %v2134_v15 }
0x2a37   :  { %v2227_v33 = vpop.permute.xlu0 %2226 }
0x2a38   :  { %v2229_v34 = vmul.f32 %v2227_v33, %v2222_v32 }
0x2a3a   :  { %2231 = vrot.lane.b32.xlu1 %v2229_v34, %s3246_s2 }
0x2aac   :  { %v2232_v37 = vpop.permute.xlu1 %2231 }
0x2aad   :  { %v2234_v38 = vadd.f32 %v2232_v37, %v2224_v36 }
0x2aaf   :  { %3019 = vtanh.f32 %v2234_v38 }
0x2abc   :  { %v3020_v39 = vpop.eup %3019 }
0x2abd   :  { %2237 = vrot.lane.b32.xlu0 %v3020_v39, %s3246_s2 }
0x2ac1   :  { %1236 = vrot.lane.b32.xlu0 %v3547_v35, %s3248_s6  ;;  %v2263_v35 = vld [vmem:[%s3753_s7] sm:$0xff] }
0x2ac2   :  { %2892 = vmatpush3.msra.mxu0 %v2263_v35 }
0x2ac3   :  { %2901 = vmatprep.subr.mxu0 %v3243_v3 }
0x2ac5   :  { %2248 = vrot.lane.b32.xlu0 %v2234_v38, %s3248_s6 }
0x2b2f   :  { %v2238_v17 = vpop.permute.xlu0 %2237 }
0x2b30   :  { %v2240_v22 = vmul.f32 %v2238_v17, %v2222_v32 }
0x2b32   :  { %v2241_v26 = vadd.f32 %v2240_v22, %v2141_v8 }
0x2b33   :  { %v1237_v47 = vpop.permute.xlu0 %1236 }
0x2b34   :  { %1239 = vst.msk [vmem:[#allocation3] sm:$0x3] %vm142_vm0, %v1237_v47  ;;  %2254 = vrot.lane.b32.xlu1 %v2241_v26, %s3247_s29 }
0x2b37   :  { %v2249_v48 = vpop.permute.xlu0 %2248 }
0x2b38   :  { %2251 = vst.msk [vmem:[#allocation3 + $0x2] sm:$0x3] %vm142_vm0, %v2249_v48  ;;  %2243 = vrot.lane.b32.xlu1 %v2240_v22, %s3247_s29 }
0x2ba6   :  { %v2255_v50 = vpop.permute.xlu1 %2254 }
0x2ba7   :  { %v2257_v42 = vadd.f32 %v2255_v50, %v2252_v49 }
0x2ba9   :  { %2258 = vst.msk [vmem:[#allocation4] sm:$0x3] %vm142_vm0, %v2257_v42 }
0x2baa   :  { %v2244_v51 = vpop.permute.xlu1 %2243 }
0x2bab   :  { %2246 = vst.msk [vmem:[#allocation2 + $0x2] sm:$0x3] %vm142_vm0, %v2244_v51 }
0x2bb0   :  { %v2262_v52 = vld [vmem:[#allocation4] sm:$0x3] }
0x2bb1   :  { %2894 = vmatmul.mubr.msk.f32.vlgmr.msra.gmra.mxu0 %vm406_vm2, %v2262_v52 }
0x2bb2   :  { %2903 = vmatprep.mubr.msk.f32.mxu0 %vm3245_vm1, %v3243_v3  ;;  %2902 = vmatpush3.msra.mxu0 %v2432_v53 }
0x2c71   :  { %v2343_v54 = vpop.f32.mrf.mxu0 }
0x2c72   :  { %v2344_v55 = vadd.f32 %v2586_v43, %v2343_v54 }
0x2c73   :  { %v2895_v44 = vpop.f32.mrf.mxu0 }
0x2c74   :  { %2899 = vmatmul.mubr.msk.f32.vlgmr.msra.gmra.mxu1 %vm2357_vm4, %v2344_v55  ;;  %2904 = vmatmul.mubr.msk.f32.vlgmr.msra.gmra.mxu0 %vm2357_vm4, %v2344_v55  ;;  %2348 = vst.msk [vmem:[#allocation19] sm:$0x3] %vm2347_vm5, %v2344_v55 }
0x2c75   :  { %3172 = shalt.err (!%p3169_p11)
}
0x2c76   :  { %2520 = dma.vmem_to_hbm [thread:$0]  %s2518_s4, 32, %s3759_s13, [#allocation9]   ;;  %v2588_v3 = vld [vmem:[%s3756_s10] ss:$0 sm:$0xff] }
0x2c77   :  { %v2590_v56 = vld [vmem:[%s3758_s12] ss:$0 sm:$0xff]  ;;  %s3250_s27 = smov [#allocation20]   ;;  %s3251_s2 = smov [#allocation22]  }
0x2c78   :  { %s2527_s28 = sshll.u32 %s3250_s27, 4  ;;  %s2537_s29 = sshll.u32 %s3251_s2, 4  ;;  %s2528_s28 = int_to_ptr.vmem [resolvable:$true] %s2527_s28  ;;  %s2538_s29 = int_to_ptr.vmem [resolvable:$true] %s2537_s29 }
0x2c79   :  { %s3181_s10 = scalar_lea.vmem %s2528_s28, 32  ;;  %p3186_p13 = scmp.lt.s32.totalorder %s2528_s28, %s2528_s28 }
0x2c7a   :  { %p3182_p12 = scmp.ne.s32.totalorder %s2528_s28, %s3181_s10  ;;  %p3187_p0 = scmp.lt.s32.totalorder %s3181_s10, %s3181_s10 }
0x2c7c   :  { %p3188_p1 = por %p3187_p0, %p3186_p13 }
0x2c7e   :  { %p3189_p2 = pnand %p3188_p1, %p3182_p12 }
0x2d34   :  { %v2427_v45 = vpop.f32.mrf.mxu1  ;;  %v2506_v57 = vpop.f32.mrf.mxu0 }
0x2d35   :  { %v2428_v58 = vadd.f32 %v2588_v3, %v2427_v45  ;;  %v2507_v59 = vadd.f32 %v2590_v56, %v2506_v57 }
0x2d36   :  { %v2900_v60 = vpop.f32.mrf.mxu1  ;;  %v2905_v61 = vpop.f32.mrf.mxu0 }
0x2d37   :  { %2431 = vst.msk [vmem:[#allocation20] sm:$0x3] %vm2347_vm5, %v2428_v58  ;;  %2510 = vst.msk [vmem:[#allocation22] sm:$0x3] %vm2347_vm5, %v2507_v59 }
0x2d38   :  { %3192 = shalt.err (!%p3189_p2)
}
0x2d39   :  { %2530 = dma.vmem_to_hbm [thread:$0]  %s2528_s28, 32, %s3760_s14, [#allocation21]  }
0x2d3a   :  { %s3201_s6 = scalar_lea.vmem %s2538_s29, 32  ;;  %p3206_p4 = scmp.lt.s32.totalorder %s2538_s29, %s2538_s29 }
0x2d3b   :  { %p3202_p3 = scmp.ne.s32.totalorder %s2538_s29, %s3201_s6  ;;  %p3207_p5 = scmp.lt.s32.totalorder %s3201_s6, %s3201_s6 }
0x2d3d   :  { %p3208_p6 = por %p3207_p5, %p3206_p4 }
0x2d3f   :  { %p3209_p7 = pnand %p3208_p6, %p3202_p3 }
0x2d41   :  { %3212 = shalt.err (!%p3209_p7)
}
0x2d42   :  { %2540 = dma.vmem_to_hbm [thread:$0]  %s2538_s29, 32, %s3761_s15, [#allocation21]  }
0x2d43   :  { %3229 = dma.done.wait [#allocation9], 32  }
0x2d44   :  { %3230 = vsyncadd [#allocation9], 4294967264 }
0x2d45   :  { %3231 = dma.done.wait [#allocation21], 64  }
0x2d46   :  { %3232 = vsyncadd [#allocation21], 4294967232 }
0x2d47   :  { %2550 = vsyncpa [#allocation8], 1 }
0x2d48   :  { %2551 = vsyncpa [#allocation11], 1 }
0x2d49   :  { %2552 = vsyncpa [#allocation14], 1 }
0x2d4a   :  { %2553 = vsyncpa [#allocation17], 1 }
0x2d4b   :  { %2554 = vsyncpa [#allocation9], 1 }
0x2d4c   :  { %2555 = vsyncpa [#allocation21], 1 }

// kernel: tpu_custom_call.1
= control target key start
LH: loop header
LB: loop body
LE: loop exit
PB: predicated region body
PF: predicated region fallthrough
CT: control target
= control target key end

     0   :  { %21 = vsyncpa [#allocation8], 0  ;;  %s3746_s0 = inlined_call_operand.hbm [shape: f32[2,8,16], index: 0, kind: input, shape index: {}]   ;;  %s3747_s1 = inlined_call_operand.hbm [shape: f32[16,128], index: 1, kind: input, shape index: {}]   ;;  %s3748_s2 = inlined_call_operand.vmem [shape: f32[32,128], index: 2, kind: input, shape index: {}]   ;;  %s3749_s3 = inlined_call_operand.hbm [shape: f32[1,128], index: 3, kind: input, shape index: {}]   ;;  %s3750_s4 = inlined_call_operand.hbm [shape: f32[32,128], index: 4, kind: input, shape index: {}]   ;;  %s3751_s5 = inlined_call_operand.hbm [shape: f32[32,128], index: 5, kind: input, shape index: {}]   ;;  %s3752_s6 = inlined_call_operand.hbm [shape: f32[1,128], index: 6, kind: input, shape index: {}]   ;;  %s3753_s7 = inlined_call_operand.vmem [shape: f32[32,8], index: 7, kind: input, shape index: {}]   ;;  %s3754_s8 = inlined_call_operand.hbm [shape: f32[1,8], index: 8, kind: input, shape index: {}]   ;;  %s3755_s9 = inlined_call_operand.vmem [shape: f32[8,8], index: 9, kind: input, shape index: {}]   ;;  %s3756_s10 = inlined_call_operand.vmem [shape: f32[1,8], index: 10, kind: input, shape index: {}]   ;;  %s3757_s11 = inlined_call_operand.vmem [shape: f32[8,8], index: 11, kind: input, shape index: {}]   ;;  %s3758_s12 = inlined_call_operand.vmem [shape: f32[1,8], index: 12, kind: input, shape index: {}]   ;;  %s3759_s13 = inlined_call_operand.hbm [shape: f32[2,8], index: 13, kind: output, shape index: {0}]   ;;  %s3760_s14 = inlined_call_operand.hbm [shape: f32[2,8], index: 14, kind: output, shape index: {1}]   ;;  %s3761_s15 = inlined_call_operand.hbm [shape: f32[2,8], index: 15, kind: output, shape index: {2}]  }
   0x1   :  { %22 = vsyncpa [#allocation11], 0 }
   0x2   :  { %23 = vsyncpa [#allocation14], 0 }
   0x3   :  { %24 = vsyncpa [#allocation17], 0 }
   0x4   :  { %25 = vsyncpa [#allocation9], 0 }
   0x5   :  { %26 = vsyncpa [#allocation21], 0  ;;  %s3233_s18 = smov [#allocation10]   ;;  %s3234_s20 = smov [#allocation13]  }
   0x6   :  { %s44_s19 = sshll.u32 %s3233_s18, 4  ;;  %s68_s21 = sshll.u32 %s3234_s20, 4  ;;  %s45_s19 = int_to_ptr.vmem [resolvable:$true] %s44_s19  ;;  %s69_s21 = int_to_ptr.vmem [resolvable:$true] %s68_s21 }
   0x7   :  { %s3029_s22 = scalar_lea.vmem %s45_s19, 256  ;;  %p3034_p1 = scmp.lt.s32.totalorder %s45_s19, %s45_s19 }
   0x8   :  { %p3030_p0 = scmp.ne.s32.totalorder %s45_s19, %s3029_s22  ;;  %p3035_p2 = scmp.lt.s32.totalorder %s3029_s22, %s3029_s22 }
   0xa   :  { %p3036_p3 = por %p3035_p2, %p3034_p1 }
   0xc   :  { %p3037_p4 = pnand %p3036_p3, %p3030_p0 }
   0xe   :  { %3040 = shalt.err (!%p3037_p4)
}
   0xf   :  { %s3235_s23 = smov 128   ;;  %s3236_s24 = smov 8  }
  0x10   :  { %50 = dma.hbm_to_vmem [thread:$0]  %s3747_s1, 256, %s45_s19, [#allocation11], %s3235_s23, %s3235_s23, %s3236_s24  }
  0x11   :  { %s3049_s27 = scalar_lea.vmem %s69_s21, 512  ;;  %p3054_p6 = scmp.lt.s32.totalorder %s69_s21, %s69_s21 }
  0x12   :  { %p3050_p5 = scmp.ne.s32.totalorder %s69_s21, %s3049_s27  ;;  %p3055_p7 = scmp.lt.s32.totalorder %s3049_s27, %s3049_s27 }
  0x14   :  { %p3056_p8 = por %p3055_p7, %p3054_p6 }
  0x16   :  { %p3057_p9 = pnand %p3056_p8, %p3050_p5 }
  0x18   :  { %3060 = shalt.err (!%p3057_p9)
}
  0x19   :  { %74 = dma.hbm_to_vmem [thread:$0]  %s3750_s4, 512, %s69_s21, [#allocation14], %s3235_s23, %s3235_s23, %s3236_s24  }
  0x1a   :  { %s3237_s30 = smov [#allocation16]   ;;  %s3238_s17 = smov [#allocation7]  }
  0x1b   :  { %s93_s16 = sshll.u32 %s3237_s30, 4  ;;  %s32_s18 = sshll.u32 %s3238_s17, 4  ;;  %s94_s16 = int_to_ptr.vmem [resolvable:$true] %s93_s16  ;;  %s33_s18 = int_to_ptr.vmem [resolvable:$true] %s32_s18 }
  0x1c   :  { %s3069_s1 = scalar_lea.vmem %s94_s16, 16  ;;  %s3073_s19 = scalar_lea.vmem %s94_s16, 32 }
  0x1d   :  { %p3070_p10 = scmp.ne.s32.totalorder %s94_s16, %s3069_s1  ;;  %p3074_p11 = scmp.lt.s32.totalorder %s94_s16, %s94_s16 }
  0x1e   :  { %p3075_p12 = scmp.lt.s32.totalorder %s3073_s19, %s3069_s1 }
  0x20   :  { %p3076_p13 = por %p3075_p12, %p3074_p11 }
  0x22   :  { %p3077_p0 = pnand %p3076_p13, %p3070_p10 }
  0x24   :  { %3080 = shalt.err (!%p3077_p0)
}
  0x25   :  { %96 = dma.hbm_to_vmem [thread:$0]  %s3752_s6, 16, %s94_s16, [#allocation17]  }
  0x26   :  { %s3089_s25 = scalar_lea.vmem %s33_s18, 256  ;;  %p3094_p2 = scmp.lt.s32.totalorder %s33_s18, %s33_s18 }
  0x27   :  { %p3090_p1 = scmp.ne.s32.totalorder %s33_s18, %s3089_s25  ;;  %p3095_p3 = scmp.lt.s32.totalorder %s3089_s25, %s3089_s25 }
  0x29   :  { %p3096_p4 = por %p3095_p3, %p3094_p2 }
  0x2b   :  { %p3097_p5 = pnand %p3096_p4, %p3090_p1 }
  0x2d   :  { %3100 = shalt.err (!%p3097_p5)
}
  0x2e   :  { %38 = dma.hbm_to_vmem [thread:$0]  %s3746_s0, 256, %s33_s18, [#allocation8], %s3235_s23, %s3235_s23, %s3236_s24  }
  0x2f   :  { %s3239_s26 = smov [#allocation12]   ;;  %s3240_s28 = smov [#allocation15]  }
  0x30   :  { %s59_s27 = sshll.u32 %s3239_s26, 4  ;;  %s80_s29 = sshll.u32 %s3240_s28, 4  ;;  %s60_s27 = int_to_ptr.vmem [resolvable:$true] %s59_s27  ;;  %s81_s29 = int_to_ptr.vmem [resolvable:$true] %s80_s29 }
  0x31   :  { %s3109_s6 = scalar_lea.vmem %s60_s27, 16  ;;  %s3113_s30 = scalar_lea.vmem %s60_s27, 32 }
  0x32   :  { %p3110_p6 = scmp.ne.s32.totalorder %s60_s27, %s3109_s6  ;;  %p3114_p7 = scmp.lt.s32.totalorder %s60_s27, %s60_s27 }
  0x33   :  { %p3115_p8 = scmp.lt.s32.totalorder %s3113_s30, %s3109_s6 }
  0x35   :  { %p3116_p9 = por %p3115_p8, %p3114_p7 }
  0x37   :  { %p3117_p10 = pnand %p3116_p9, %p3110_p6 }
  0x39   :  { %3120 = shalt.err (!%p3117_p10)
}
  0x3a   :  { %62 = dma.hbm_to_vmem [thread:$0]  %s3749_s3, 16, %s60_s27, [#allocation11]  }
  0x3b   :  { %s3129_s1 = scalar_lea.vmem %s81_s29, 512  ;;  %p3134_p12 = scmp.lt.s32.totalorder %s81_s29, %s81_s29 }
  0x3c   :  { %p3130_p11 = scmp.ne.s32.totalorder %s81_s29, %s3129_s1  ;;  %p3135_p13 = scmp.lt.s32.totalorder %s3129_s1, %s3129_s1 }
  0x3e   :  { %p3136_p0 = por %p3135_p13, %p3134_p12 }
  0x40   :  { %p3137_p1 = pnand %p3136_p0, %p3130_p11 }
  0x42   :  { %3140 = shalt.err (!%p3137_p1)
}
  0x43   :  { %86 = dma.hbm_to_vmem [thread:$0]  %s3751_s5, 512, %s81_s29, [#allocation14], %s3235_s23, %s3235_s23, %s3236_s24  }
  0x44   :  { %s3241_s19 = smov [#allocation18]  }
  0x45   :  { %s105_s20 = sshll.u32 %s3241_s19, 4  ;;  %s106_s20 = int_to_ptr.vmem [resolvable:$true] %s105_s20 }
  0x46   :  { %s3149_s22 = scalar_lea.vmem %s106_s20, 16  ;;  %s3153_s3 = scalar_lea.vmem %s106_s20, 32 }
  0x47   :  { %p3150_p2 = scmp.ne.s32.totalorder %s106_s20, %s3149_s22  ;;  %p3154_p3 = scmp.lt.s32.totalorder %s106_s20, %s106_s20 }
  0x48   :  { %p3155_p4 = scmp.lt.s32.totalorder %s3153_s3, %s3149_s22 }
  0x4a   :  { %p3156_p5 = por %p3155_p4, %p3154_p3 }
  0x4c   :  { %p3157_p6 = pnand %p3156_p5, %p3150_p2 }
  0x4e   :  { %3160 = shalt.err (!%p3157_p6)
}
  0x4f   :  { %108 = dma.hbm_to_vmem [thread:$0]  %s3754_s8, 16, %s106_s20, [#allocation17]  }
  0x50   :  { %3221 = dma.done.wait [#allocation8], 256  }
  0x51   :  { %3222 = vsyncadd [#allocation8], 4294967040 }
  0x52   :  { %3223 = dma.done.wait [#allocation11], 272  }
  0x53   :  { %3224 = vsyncadd [#allocation11], 4294967024 }
  0x54   :  { %3225 = dma.done.wait [#allocation14], 1024  }
  0x55   :  { %3226 = vsyncadd [#allocation14], 4294966272 }
  0x56   :  { %3227 = dma.done.wait [#allocation17], 32  }
  0x57   :  { %3228 = vsyncadd [#allocation17], 4294967264  ;;  %v161_v0 = vlaneseq  ;;  %v3242_v1 = vmov 1983009808   ;;  %v3243_v3 = vmov 0.0   ;;  %vm142_vm0 = vcmask 254976  }
  0x58   :  { %v159_v2 = vunpack.c.l.s4 %v3242_v1  ;;  %2698 = vmatprep.subr.mxu1 %v3243_v3  ;;  %v3244_v5 = vmov 1934713408   ;;  %vm3245_vm1 = vmmov 0   ;;  %143 = vst.msk [vmem:[#allocation2] sm:$0x3] %vm142_vm0, %v3243_v3  ;;  %v149_v10 = vld [vmem:[#allocation10 + $0x8] sm:$0xff] }
  0x59   :  { %v162_v4 = vshrl.u32 %v161_v0, 7  ;;  %v190_v6 = vunpack.c.l.s4 %v3244_v5  ;;  %2706 = vmatprep.mubr.msk.f32.mxu1 %vm3245_vm1, %v3243_v3  ;;  %144 = vst.msk [vmem:[#allocation2 + $0x2] sm:$0x3] %vm142_vm0, %v3243_v3  ;;  %145 = vst.msk [vmem:[#allocation3] sm:$0x3] %vm142_vm0, %v3243_v3  ;;  %v148_v11 = vld [vmem:[#allocation10] sm:$0xff]  ;;  %2691 = vmatprep.subr.mxu0 %v149_v10 }
  0x5a   :  { %146 = vst.msk [vmem:[#allocation3 + $0x2] sm:$0x3] %vm142_vm0, %v3243_v3  ;;  %147 = vst.msk [vmem:[#allocation4] sm:$0x3] %vm142_vm0, %v3243_v3  ;;  %v160_v7 = vunpack.c.0.s8 %v159_v2  ;;  %v155_v12 = vld [vmem:[#allocation7] sm:$0xff]  ;;  %v156_v13 = vld [vmem:[#allocation7 + $0x8] sm:$0xff]  ;;  %2692 = vmatpush3.msra.mxu0 %v149_v10 }
  0x5b   :  { %v191_v9 = vunpack.c.0.s8 %v190_v6  ;;  %v157_v14 = vcombine.high %v155_v12, %v3243_v3  ;;  %v3385_v16 = vld [vmem:[%s3748_s2 + $0x18] sm:$0xff]  ;;  %v3390_v17 = vld [vmem:[%s3748_s2 + $0x10] sm:$0xff]  ;;  %v172_v18 = vcombine.high %v156_v13, %v3243_v3  ;;  %2693 = vmatprep.subr.mxu0 %v148_v11  ;;  %v3400_v22 = vld [vmem:[%s3748_s2 + $0x8] sm:$0xff]  ;;  %vm406_vm2 = vcmask 261120   ;;  %s3247_s29 = smov 64   ;;  %s3248_s6 = smov 96  }
  0x5c   :  { %v3378_v8 = vsub.s32 %v160_v7, %v162_v4  ;;  %2699 = vmatpush3.msra.mxu1 %v3385_v16  ;;  %2694 = vmatpush3.msra.mxu0 %v148_v11  ;;  %v3408_v26 = vld [vmem:[%s3748_s2] sm:$0xff]  ;;  %vm271_vm3 = vcmask 130048   ;;  %v2556_v50 = vld [vmem:[#allocation12] ss:$0 sm:$0xff]  ;;  %s3246_s2 = smov 32   ;;  %vm2357_vm4 = vcmask 64512  }
  0x5d   :  { %v194_v20 = vsub.s32 %v191_v9, %v162_v4  ;;  %2700 = vmatprep.subr.mxu1 %v3243_v3  ;;  %2709 = vmatprep.subr.mxu0 %v3243_v3  ;;  %vm2347_vm5 = vcmask 58368   ;;  %s3249_s25 = smov [#allocation19]  }
  0x5e   :  { %v164_v15 = vrot.slane %v155_v12, %v3378_v8  ;;  %v179_v19 = vrot.slane %v156_v13, %v3378_v8  ;;  %v171_v21 = vrot.slane %v157_v14, %v3378_v8  ;;  %v186_v23 = vrot.slane %v172_v18, %v3378_v8  ;;  %2701 = vmatpush3.msra.mxu1 %v3390_v17  ;;  %s2517_s4 = sshll.u32 %s3249_s25, 4  ;;  %s2518_s4 = int_to_ptr.vmem [resolvable:$true] %s2517_s4 }
  0x5f   :  { %2702 = vmatprep.subr.mxu1 %v3243_v3  ;;  %v403_v31 = vld [vmem:[#allocation2] sm:$0x3]  ;;  %s3161_s5 = scalar_lea.vmem %s2518_s4, 32  ;;  %p3166_p8 = scmp.lt.s32.totalorder %s2518_s4, %s2518_s4 }
  0x60   :  { %v187_v24 = vcombine.low %v164_v15, %v179_v19  ;;  %v188_v25 = vcombine.high %v164_v15, %v179_v19  ;;  %v203_v29 = vcombine.low %v171_v21, %v186_v23  ;;  %v204_v30 = vcombine.high %v171_v21, %v186_v23  ;;  %2703 = vmatpush3.msra.mxu1 %v3400_v22  ;;  %v404_v5 = vld [vmem:[#allocation3] sm:$0x3]  ;;  %p3162_p7 = scmp.ne.s32.totalorder %s2518_s4, %s3161_s5  ;;  %p3167_p9 = scmp.lt.s32.totalorder %s3161_s5, %s3161_s5 }
  0x61   :  { %2704 = vmatprep.subr.mxu1 %v3243_v3 }
  0x62   :  { %v195_v27 = vrot.slane %v187_v24, %v194_v20  ;;  %v202_v28 = vrot.slane %v188_v25, %v194_v20  ;;  %v211_v34 = vrot.slane %v203_v29, %v194_v20  ;;  %v218_v35 = vrot.slane %v204_v30, %v194_v20  ;;  %2705 = vmatpush3.msra.mxu1 %v3408_v26  ;;  %p3168_p10 = por %p3167_p9, %p3166_p8 }
  0x63   :  { %2707 = vmatmul.mubr.msk.f32.vlgmr.msra.gmra.mxu1 %vm406_vm2, %v403_v31  ;;  %2720 = vmatprep.subr.mxu1 %v3243_v3 }
  0x64   :  { %v219_v32 = vcombine.high %v195_v27, %v3243_v3  ;;  %v220_v33 = vcombine.high %v202_v28, %v3243_v3  ;;  %v221_v38 = vcombine.high %v211_v34, %v3243_v3  ;;  %v222_v39 = vcombine.high %v218_v35, %v3243_v3  ;;  %2721 = vmatpush3.msra.mxu1 %v3385_v16  ;;  %p3169_p11 = pnand %p3168_p10, %p3162_p7 }
  0x65   :  { %2722 = vmatprep.subr.mxu1 %v3243_v3  ;;  %2728 = vmatprep.mubr.msk.f32.mxu1 %vm3245_vm1, %v3243_v3 }
  0x66   :  { %v237_v36 = vcombine.low %v195_v27, %v219_v32  ;;  %v238_v37 = vcombine.low %v202_v28, %v220_v33  ;;  %v254_v42 = vcombine.low %v211_v34, %v221_v38  ;;  %v255_v43 = vcombine.low %v218_v35, %v222_v39  ;;  %2723 = vmatpush3.msra.mxu1 %v3390_v17 }
  0x67   :  { %2724 = vmatprep.subr.mxu1 %v3243_v3 }
  0x68   :  { %v245_v40 = vrot.slane %v237_v36, %v3378_v8  ;;  %v252_v41 = vrot.slane %v238_v37, %v3378_v8  ;;  %v262_v45 = vrot.slane %v254_v42, %v3378_v8  ;;  %v269_v46 = vrot.slane %v255_v43, %v3378_v8  ;;  %2725 = vmatpush3.msra.mxu1 %v3400_v22 }
  0x69   :  { %2726 = vmatprep.subr.mxu1 %v3243_v3 }
  0x6a   :  { %v253_v44 = vcombine.low %v245_v40, %v252_v41  ;;  %v270_v47 = vcombine.low %v262_v45, %v269_v46  ;;  %2727 = vmatpush3.msra.mxu1 %v3408_v26 }
  0x6b   :  { %2742 = vmatprep.subr.mxu1 %v3243_v3 }
  0x6c   :  { %2695 = vmatprep.mubr.msk.f32.mxu0 %vm271_vm3, %v253_v44 }
  0x6d   :  { %2696 = vmatmul.mubr.msk.f32.vlgmr.msra.gmra.mxu0 %vm271_vm3, %v270_v47 }
  0x6e   :  { %2710 = vmatpush3.msra.mxu0 %v3385_v16  ;;  %2717 = vmatprep.mubr.msk.f32.mxu0 %vm3245_vm1, %v3243_v3 }
  0x6f   :  { %2711 = vmatprep.subr.mxu0 %v3243_v3 }
  0x70   :  { %2712 = vmatpush3.msra.mxu0 %v3390_v17 }
  0x71   :  { %2713 = vmatprep.subr.mxu0 %v3243_v3 }
  0x72   :  { %2714 = vmatpush3.msra.mxu0 %v3400_v22 }
  0x73   :  { %2715 = vmatprep.subr.mxu0 %v3243_v3 }
  0x74   :  { %2716 = vmatpush3.msra.mxu0 %v3408_v26 }
  0x75   :  { %2731 = vmatprep.subr.mxu0 %v3243_v3 }
 0x123   :  { %v476_v48 = vpop.f32.mrf.mxu1 }
 0x125   :  { %v2708_v49 = vpop.f32.mrf.mxu1 }
 0x12d   :  { %v2697_v51 = vpop.f32.mrf.mxu0 }
 0x12e   :  { %v348_v52 = vadd.f32 %v2697_v51, %v2556_v50 }
 0x12f   :  { %v342_v53 = vpop.f32.mrf.mxu0 }
 0x130   :  { %v370_v54 = vcombine.high %v348_v52, %v348_v52  ;;  %v377_v55 = vrot.slane %v348_v52, %v3378_v8  ;;  %2561 = vst.sshfl [vmem:[#allocation5 + $0x8] sm:$0x3 pattern:$0x76325410] %v348_v52  ;;  %v343_v56 = vadd.f32 %v2556_v50, %v342_v53 }
 0x132   :  { %v384_v57 = vrot.slane %v370_v54, %v3378_v8  ;;  %v385_v58 = vcombine.high %v377_v55, %v377_v55  ;;  %2562 = vst.sshfl [vmem:[#allocation5 + $0xc] sm:$0x3 pattern:$0x76325410] %v370_v54  ;;  %v353_v59 = vcombine.high %v343_v56, %v343_v56  ;;  %v360_v60 = vrot.slane %v343_v56, %v3378_v8 }
 0x133   :  { %2559 = vst.sshfl [vmem:[#allocation5] sm:$0x3 pattern:$0x76325410] %v343_v56 }
 0x134   :  { %v386_v61 = vcombine.high %v384_v57, %v384_v57  ;;  %400 = vst [vmem:[#allocation5 + $0xa] sm:$0x3] %v385_v58  ;;  %v367_v62 = vrot.slane %v353_v59, %v3378_v8  ;;  %v368_v63 = vcombine.high %v360_v60, %v360_v60  ;;  %2560 = vst.sshfl [vmem:[#allocation5 + $0x4] sm:$0x3 pattern:$0x76325410] %v353_v59 }
 0x136   :  { %402 = vst [vmem:[#allocation5 + $0xe] sm:$0x3] %v386_v61  ;;  %v369_v0 = vcombine.high %v367_v62, %v367_v62  ;;  %396 = vst [vmem:[#allocation5 + $0x2] sm:$0x3] %v368_v63 }
 0x138   :  { %398 = vst [vmem:[#allocation5 + $0x6] sm:$0x3] %v369_v0 }
 0x13a   :  { %v405_v1 = vld [vmem:[#allocation5] sm:$0x3] }
 0x13b   :  { %v480_v2 = vadd.f32 %v476_v48, %v405_v1  ;;  %v617_v43 = vld [vmem:[#allocation5 + $0x4] sm:$0x3] }
 0x13d   :  { %2925 = vtanh.f32 %v480_v2  ;;  %v481_v6 = vmul.f32 0.5, %v480_v2  ;;  %v514_v24 = vld [vmem:[#allocation5 + $0x2] sm:$0x3] }
 0x13f   :  { %2927 = vtanh.f32 %v481_v6  ;;  %v720_v61 = vld [vmem:[#allocation5 + $0x6] sm:$0x3] }
 0x14a   :  { %v2926_v4 = vpop.eup %2925 }
 0x14b   :  { %492 = vrot.lane.b32.xlu0 %v2926_v4, %s3246_s2 }
 0x14c   :  { %v2928_v7 = vpop.eup %2927 }
 0x14d   :  { %v483_v9 = vmul.f32 0.5, %v2928_v7 }
 0x14f   :  { %487 = vrot.lane.b32.xlu0 %v404_v5, %s3246_s2  ;;  %v484_v10 = vadd.f32 0.5, %v483_v9 }
 0x1bd   :  { %v493_v11 = vpop.permute.xlu0 %492 }
 0x1be   :  { %v495_v12 = vmul.f32 %v493_v11, %v484_v10 }
 0x1c0   :  { %497 = vrot.lane.b32.xlu1 %v495_v12, %s3246_s2 }
 0x1c1   :  { %v488_v13 = vpop.permute.xlu0 %487 }
 0x1c2   :  { %v490_v14 = vmul.f32 %v488_v13, %v484_v10 }
 0x232   :  { %v498_v15 = vpop.permute.xlu1 %497 }
 0x233   :  { %v500_v18 = vadd.f32 %v498_v15, %v490_v14 }
 0x235   :  { %2929 = vtanh.f32 %v500_v18 }
 0x242   :  { %v2930_v19 = vpop.eup %2929 }
 0x243   :  { %503 = vrot.lane.b32.xlu1 %v2930_v19, %s3246_s2  ;;  %v823_v19 = vld [vmem:[#allocation5 + $0x8] sm:$0x3] }
 0x2b5   :  { %v504_v20 = vpop.permute.xlu1 %503 }
 0x2b6   :  { %v506_v21 = vmul.f32 %v504_v20, %v484_v10 }
 0x2b8   :  { %508 = vrot.lane.b32.xlu0 %v506_v21, %s3247_s29 }
 0x32a   :  { %v509_v23 = vpop.permute.xlu0 %508 }
 0x32b   :  { %512 = vst.msk [vmem:[#allocation6] sm:$0x3] %vm142_vm0, %v509_v23  ;;  %2718 = vmatmul.mubr.msk.f32.vlgmr.msra.gmra.mxu0 %vm406_vm2, %v509_v23 }
 0x32c   :  { %2732 = vmatpush3.msra.mxu0 %v3385_v16  ;;  %2739 = vmatprep.mubr.msk.f32.mxu0 %vm3245_vm1, %v3243_v3 }
 0x32d   :  { %2733 = vmatprep.subr.mxu0 %v3243_v3 }
 0x32e   :  { %2734 = vmatpush3.msra.mxu0 %v3390_v17 }
 0x32f   :  { %2735 = vmatprep.subr.mxu0 %v3243_v3 }
 0x330   :  { %2736 = vmatpush3.msra.mxu0 %v3400_v22 }
 0x331   :  { %2737 = vmatprep.subr.mxu0 %v3243_v3 }
 0x332   :  { %2738 = vmatpush3.msra.mxu0 %v3408_v26 }
 0x333   :  { %2753 = vmatprep.subr.mxu0 %v3243_v3 }
 0x3eb   :  { %v583_v25 = vpop.f32.mrf.mxu0 }
 0x3ec   :  { %v587_v27 = vadd.f32 %v583_v25, %v514_v24 }
 0x3ed   :  { %v2719_v28 = vpop.f32.mrf.mxu0 }
 0x3ee   :  { %2931 = vtanh.f32 %v587_v27  ;;  %v588_v30 = vmul.f32 0.5, %v587_v27 }
 0x3f0   :  { %2933 = vtanh.f32 %v588_v30 }
 0x3fb   :  { %v2932_v29 = vpop.eup %2931 }
 0x3fc   :  { %595 = vrot.lane.b32.xlu1 %v2932_v29, %s3246_s2 }
 0x3fd   :  { %v2934_v31 = vpop.eup %2933 }
 0x3fe   :  { %v590_v32 = vmul.f32 0.5, %v2934_v31 }
 0x400   :  { %v591_v33 = vadd.f32 0.5, %v590_v32 }
 0x402   :  { %v593_v36 = vmul.f32 %v591_v33, %v500_v18 }
 0x46e   :  { %v596_v34 = vpop.permute.xlu1 %595 }
 0x46f   :  { %v598_v35 = vmul.f32 %v596_v34, %v591_v33 }
 0x471   :  { %600 = vrot.lane.b32.xlu0 %v598_v35, %s3246_s2 }
 0x4e3   :  { %v601_v37 = vpop.permute.xlu0 %600 }
 0x4e4   :  { %v603_v38 = vadd.f32 %v601_v37, %v593_v36 }
 0x4e6   :  { %2935 = vtanh.f32 %v603_v38 }
 0x4f3   :  { %v2936_v39 = vpop.eup %2935 }
 0x4f4   :  { %606 = vrot.lane.b32.xlu1 %v2936_v39, %s3246_s2  ;;  %v926_v39 = vld [vmem:[#allocation5 + $0xa] sm:$0x3] }
 0x566   :  { %v607_v40 = vpop.permute.xlu1 %606 }
 0x567   :  { %v609_v41 = vmul.f32 %v607_v40, %v591_v33 }
 0x569   :  { %611 = vrot.lane.b32.xlu0 %v609_v41, %s3247_s29 }
 0x5db   :  { %v612_v42 = vpop.permute.xlu0 %611 }
 0x5dc   :  { %615 = vst.msk [vmem:[#allocation6 + $0x2] sm:$0x3] %vm142_vm0, %v612_v42  ;;  %2729 = vmatmul.mubr.msk.f32.vlgmr.msra.gmra.mxu1 %vm406_vm2, %v612_v42 }
 0x5dd   :  { %2743 = vmatpush3.msra.mxu1 %v3385_v16  ;;  %2750 = vmatprep.mubr.msk.f32.mxu1 %vm3245_vm1, %v3243_v3 }
 0x5de   :  { %2744 = vmatprep.subr.mxu1 %v3243_v3 }
 0x5df   :  { %2745 = vmatpush3.msra.mxu1 %v3390_v17 }
 0x5e0   :  { %2746 = vmatprep.subr.mxu1 %v3243_v3 }
 0x5e1   :  { %2747 = vmatpush3.msra.mxu1 %v3400_v22 }
 0x5e2   :  { %2748 = vmatprep.subr.mxu1 %v3243_v3 }
 0x5e3   :  { %2749 = vmatpush3.msra.mxu1 %v3408_v26 }
 0x5e4   :  { %2764 = vmatprep.subr.mxu1 %v3243_v3 }
 0x69c   :  { %v686_v44 = vpop.f32.mrf.mxu1 }
 0x69d   :  { %v690_v45 = vadd.f32 %v686_v44, %v617_v43 }
 0x69e   :  { %v2730_v46 = vpop.f32.mrf.mxu1 }
 0x69f   :  { %2937 = vtanh.f32 %v690_v45  ;;  %v691_v48 = vmul.f32 0.5, %v690_v45 }
 0x6a1   :  { %2939 = vtanh.f32 %v691_v48 }
 0x6ac   :  { %v2938_v47 = vpop.eup %2937 }
 0x6ad   :  { %698 = vrot.lane.b32.xlu1 %v2938_v47, %s3246_s2 }
 0x6ae   :  { %v2940_v49 = vpop.eup %2939 }
 0x6af   :  { %v693_v50 = vmul.f32 0.5, %v2940_v49 }
 0x6b1   :  { %v694_v51 = vadd.f32 0.5, %v693_v50 }
 0x6b3   :  { %v696_v54 = vmul.f32 %v694_v51, %v603_v38 }
 0x71f   :  { %v699_v52 = vpop.permute.xlu1 %698 }
 0x720   :  { %v701_v53 = vmul.f32 %v699_v52, %v694_v51 }
 0x722   :  { %703 = vrot.lane.b32.xlu0 %v701_v53, %s3246_s2  ;;  %v1250_v53 = vld [vmem:[#allocation6 + $0x2] sm:$0x3] }
 0x794   :  { %v704_v55 = vpop.permute.xlu0 %703 }
 0x795   :  { %v706_v56 = vadd.f32 %v704_v55, %v696_v54 }
 0x797   :  { %2941 = vtanh.f32 %v706_v56 }
 0x7a4   :  { %v2942_v57 = vpop.eup %2941 }
 0x7a5   :  { %709 = vrot.lane.b32.xlu1 %v2942_v57, %s3246_s2 }
 0x817   :  { %v710_v58 = vpop.permute.xlu1 %709 }
 0x818   :  { %v712_v59 = vmul.f32 %v710_v58, %v694_v51 }
 0x81a   :  { %714 = vrot.lane.b32.xlu0 %v712_v59, %s3247_s29 }
 0x88c   :  { %v715_v60 = vpop.permute.xlu0 %714 }
 0x88d   :  { %718 = vst.msk [vmem:[#allocation6 + $0x4] sm:$0x3] %vm142_vm0, %v715_v60  ;;  %2740 = vmatmul.mubr.msk.f32.vlgmr.msra.gmra.mxu0 %vm406_vm2, %v715_v60 }
 0x88e   :  { %2754 = vmatpush3.msra.mxu0 %v3385_v16  ;;  %2761 = vmatprep.mubr.msk.f32.mxu0 %vm3245_vm1, %v3243_v3 }
 0x88f   :  { %2755 = vmatprep.subr.mxu0 %v3243_v3 }
 0x890   :  { %2756 = vmatpush3.msra.mxu0 %v3390_v17 }
 0x891   :  { %2757 = vmatprep.subr.mxu0 %v3243_v3 }
 0x892   :  { %2758 = vmatpush3.msra.mxu0 %v3400_v22 }
 0x893   :  { %2759 = vmatprep.subr.mxu0 %v3243_v3 }
 0x894   :  { %2760 = vmatpush3.msra.mxu0 %v3408_v26  ;;  %v1251_v54 = vld [vmem:[#allocation6 + $0x4] sm:$0x3] }
 0x895   :  { %2775 = vmatprep.subr.mxu0 %v3243_v3 }
 0x94d   :  { %v789_v62 = vpop.f32.mrf.mxu0 }
 0x94e   :  { %v793_v63 = vadd.f32 %v789_v62, %v720_v61  ;;  %v1029_v62 = vld [vmem:[#allocation5 + $0xc] sm:$0x3] }
 0x94f   :  { %v2741_v0 = vpop.f32.mrf.mxu0 }
 0x950   :  { %2943 = vtanh.f32 %v793_v63  ;;  %v794_v2 = vmul.f32 0.5, %v793_v63 }
 0x952   :  { %2945 = vtanh.f32 %v794_v2 }
 0x95d   :  { %v2944_v1 = vpop.eup %2943 }
 0x95e   :  { %801 = vrot.lane.b32.xlu1 %v2944_v1, %s3246_s2 }
 0x95f   :  { %v2946_v4 = vpop.eup %2945 }
 0x960   :  { %v796_v5 = vmul.f32 0.5, %v2946_v4 }
 0x962   :  { %v797_v6 = vadd.f32 0.5, %v796_v5 }
 0x964   :  { %v799_v10 = vmul.f32 %v797_v6, %v706_v56  ;;  %v1249_v56 = vld [vmem:[#allocation6] sm:$0x3] }
 0x965   :  { %v1271_v57 = vcombine.low %v1249_v56, %v1250_v53 }
 0x967   :  { %v1279_v59 = vrot.slane %v1271_v57, %v3378_v8  ;;  %v2571_v57 = vld [vmem:[#allocation16] ss:$0 sm:$0xff] }
 0x9d0   :  { %v802_v7 = vpop.permute.xlu1 %801 }
 0x9d1   :  { %v804_v9 = vmul.f32 %v802_v7, %v797_v6 }
 0x9d3   :  { %806 = vrot.lane.b32.xlu0 %v804_v9, %s3246_s2 }
 0xa45   :  { %v807_v11 = vpop.permute.xlu0 %806 }
 0xa46   :  { %v809_v12 = vadd.f32 %v807_v11, %v799_v10 }
 0xa48   :  { %2947 = vtanh.f32 %v809_v12 }
 0xa55   :  { %v2948_v13 = vpop.eup %2947 }
 0xa56   :  { %812 = vrot.lane.b32.xlu1 %v2948_v13, %s3246_s2 }
 0xac8   :  { %v813_v14 = vpop.permute.xlu1 %812 }
 0xac9   :  { %v815_v15 = vmul.f32 %v813_v14, %v797_v6 }
 0xacb   :  { %817 = vrot.lane.b32.xlu0 %v815_v15, %s3247_s29 }
 0xb3d   :  { %v818_v18 = vpop.permute.xlu0 %817 }
 0xb3e   :  { %821 = vst.msk [vmem:[#allocation6 + $0x6] sm:$0x3] %vm142_vm0, %v818_v18  ;;  %2751 = vmatmul.mubr.msk.f32.vlgmr.msra.gmra.mxu1 %vm406_vm2, %v818_v18 }
 0xb3f   :  { %2765 = vmatpush3.msra.mxu1 %v3385_v16  ;;  %2772 = vmatprep.mubr.msk.f32.mxu1 %vm3245_vm1, %v3243_v3 }
 0xb40   :  { %2766 = vmatprep.subr.mxu1 %v3243_v3 }
 0xb41   :  { %2767 = vmatpush3.msra.mxu1 %v3390_v17 }
 0xb42   :  { %2768 = vmatprep.subr.mxu1 %v3243_v3 }
 0xb43   :  { %2769 = vmatpush3.msra.mxu1 %v3400_v22 }
 0xb44   :  { %2770 = vmatprep.subr.mxu1 %v3243_v3 }
 0xb45   :  { %2771 = vmatpush3.msra.mxu1 %v3408_v26  ;;  %v1252_v52 = vld [vmem:[#allocation6 + $0x6] sm:$0x3] }
 0xb46   :  { %v1272_v55 = vcombine.low %v1251_v54, %v1252_v52 }
 0xb48   :  { %v1286_v58 = vrot.slane %v1272_v55, %v3378_v8 }
 0xb4a   :  { %v1287_v61 = vcombine.low %v1279_v59, %v1286_v58 }
 0xbfe   :  { %v892_v20 = vpop.f32.mrf.mxu1 }
 0xbff   :  { %v896_v21 = vadd.f32 %v892_v20, %v823_v19  ;;  %v1132_v20 = vld [vmem:[#allocation5 + $0xe] sm:$0x3] }
 0xc00   :  { %v2752_v23 = vpop.f32.mrf.mxu1 }
 0xc01   :  { %2949 = vtanh.f32 %v896_v21  ;;  %v897_v25 = vmul.f32 0.5, %v896_v21 }
 0xc03   :  { %2951 = vtanh.f32 %v897_v25 }
 0xc0e   :  { %v2950_v24 = vpop.eup %2949 }
 0xc0f   :  { %904 = vrot.lane.b32.xlu1 %v2950_v24, %s3246_s2 }
 0xc10   :  { %v2952_v27 = vpop.eup %2951 }
 0xc11   :  { %v899_v28 = vmul.f32 0.5, %v2952_v27 }
 0xc13   :  { %v900_v29 = vadd.f32 0.5, %v899_v28 }
 0xc15   :  { %v902_v32 = vmul.f32 %v900_v29, %v809_v12 }
 0xc81   :  { %v905_v30 = vpop.permute.xlu1 %904 }
 0xc82   :  { %v907_v31 = vmul.f32 %v905_v30, %v900_v29 }
 0xc84   :  { %909 = vrot.lane.b32.xlu0 %v907_v31, %s3246_s2 }
 0xcf6   :  { %v910_v33 = vpop.permute.xlu0 %909 }
 0xcf7   :  { %v912_v34 = vadd.f32 %v910_v33, %v902_v32 }
 0xcf9   :  { %2953 = vtanh.f32 %v912_v34 }
 0xd06   :  { %v2954_v35 = vpop.eup %2953 }
 0xd07   :  { %915 = vrot.lane.b32.xlu1 %v2954_v35, %s3246_s2 }
 0xd79   :  { %v916_v36 = vpop.permute.xlu1 %915 }
 0xd7a   :  { %v918_v37 = vmul.f32 %v916_v36, %v900_v29 }
 0xd7c   :  { %920 = vrot.lane.b32.xlu0 %v918_v37, %s3247_s29  ;;  %v1243_v37 = vld [vmem:[#allocation13 + $0x18] sm:$0xff] }
 0xd7d   :  { %2786 = vmatprep.subr.mxu1 %v1243_v37 }
 0xdee   :  { %v921_v38 = vpop.permute.xlu0 %920 }
 0xdef   :  { %924 = vst.msk [vmem:[#allocation6 + $0x8] sm:$0x3] %vm142_vm0, %v921_v38  ;;  %2762 = vmatmul.mubr.msk.f32.vlgmr.msra.gmra.mxu0 %vm406_vm2, %v921_v38  ;;  %v1242_v38 = vld [vmem:[#allocation13 + $0x10] sm:$0xff] }
 0xdf0   :  { %2776 = vmatpush3.msra.mxu0 %v3385_v16  ;;  %2783 = vmatprep.mubr.msk.f32.mxu0 %vm3245_vm1, %v3243_v3 }
 0xdf1   :  { %2777 = vmatprep.subr.mxu0 %v3243_v3 }
 0xdf2   :  { %2778 = vmatpush3.msra.mxu0 %v3390_v17 }
 0xdf3   :  { %2779 = vmatprep.subr.mxu0 %v3243_v3 }
 0xdf4   :  { %2780 = vmatpush3.msra.mxu0 %v3400_v22 }
 0xdf5   :  { %2781 = vmatprep.subr.mxu0 %v3243_v3 }
 0xdf6   :  { %2782 = vmatpush3.msra.mxu0 %v3408_v26 }
 0xdf7   :  { %2797 = vmatprep.subr.mxu0 %v3243_v3 }
 0xeaf   :  { %v995_v40 = vpop.f32.mrf.mxu0 }
 0xeb0   :  { %v999_v16 = vadd.f32 %v995_v40, %v926_v39  ;;  %v1241_v39 = vld [vmem:[#allocation13 + $0x8] sm:$0xff]  ;;  %v1240_v40 = vld [vmem:[#allocation13] sm:$0xff] }
 0xeb1   :  { %v2763_v41 = vpop.f32.mrf.mxu0 }
 0xeb2   :  { %2955 = vtanh.f32 %v999_v16  ;;  %v1000_v43 = vmul.f32 0.5, %v999_v16 }
 0xeb4   :  { %2957 = vtanh.f32 %v1000_v43  ;;  %v3555_v43 = vld [vmem:[#allocation15 + $0x10] sm:$0xff] }
 0xebf   :  { %v2956_v42 = vpop.eup %2955 }
 0xec0   :  { %1007 = vrot.lane.b32.xlu1 %v2956_v42, %s3246_s2  ;;  %v3553_v42 = vld [vmem:[#allocation15 + $0x18] sm:$0xff] }
 0xec1   :  { %v2958_v17 = vpop.eup %2957 }
 0xec2   :  { %v1002_v44 = vmul.f32 0.5, %v2958_v17  ;;  %v1439_v17 = vld [vmem:[#allocation3 + $0x2] sm:$0x3] }
 0xec4   :  { %v1003_v45 = vadd.f32 0.5, %v1002_v44  ;;  %v3559_v44 = vld [vmem:[#allocation15 + $0x8] sm:$0xff] }
 0xec6   :  { %v1005_v26 = vmul.f32 %v1003_v45, %v912_v34 }
 0xf32   :  { %v1008_v22 = vpop.permute.xlu1 %1007 }
 0xf33   :  { %v1010_v46 = vmul.f32 %v1008_v22, %v1003_v45  ;;  %v1437_v22 = vld [vmem:[#allocation2 + $0x2] sm:$0x3] }
 0xf35   :  { %1012 = vrot.lane.b32.xlu0 %v1010_v46, %s3246_s2 }
 0xfa7   :  { %v1013_v47 = vpop.permute.xlu0 %1012 }
 0xfa8   :  { %v1015_v48 = vadd.f32 %v1013_v47, %v1005_v26  ;;  %v1253_v47 = vld [vmem:[#allocation6 + $0x8] sm:$0x3] }
 0xfaa   :  { %2959 = vtanh.f32 %v1015_v48 }
 0xfb7   :  { %v2960_v49 = vpop.eup %2959 }
 0xfb8   :  { %1018 = vrot.lane.b32.xlu1 %v2960_v49, %s3246_s2 }
0x102a   :  { %v1019_v50 = vpop.permute.xlu1 %1018 }
0x102b   :  { %v1021_v51 = vmul.f32 %v1019_v50, %v1003_v45  ;;  %v3564_v45 = vld [vmem:[#allocation15] sm:$0xff] }
0x102d   :  { %1023 = vrot.lane.b32.xlu0 %v1021_v51, %s3247_s29 }
0x109f   :  { %v1024_v60 = vpop.permute.xlu0 %1023 }
0x10a0   :  { %1027 = vst.msk [vmem:[#allocation6 + $0xa] sm:$0x3] %vm142_vm0, %v1024_v60  ;;  %2773 = vmatmul.mubr.msk.f32.vlgmr.msra.gmra.mxu1 %vm406_vm2, %v1024_v60 }
0x10a1   :  { %2794 = vmatprep.mubr.msk.f32.mxu1 %vm406_vm2, %v1287_v61  ;;  %2787 = vmatpush3.msra.mxu1 %v1243_v37 }
0x10a2   :  { %2788 = vmatprep.subr.mxu1 %v1242_v38 }
0x10a3   :  { %2789 = vmatpush3.msra.mxu1 %v1242_v38 }
0x10a4   :  { %2790 = vmatprep.subr.mxu1 %v1241_v39 }
0x10a5   :  { %2791 = vmatpush3.msra.mxu1 %v1241_v39 }
0x10a6   :  { %2792 = vmatprep.subr.mxu1 %v1240_v40 }
0x10a7   :  { %2793 = vmatpush3.msra.mxu1 %v1240_v40  ;;  %v1254_v26 = vld [vmem:[#allocation6 + $0xa] sm:$0x3] }
0x10a8   :  { %2808 = vmatprep.subr.mxu1 %v3243_v3 }
0x1160   :  { %v1098_v63 = vpop.f32.mrf.mxu1 }
0x1161   :  { %v1102_v0 = vadd.f32 %v1098_v63, %v1029_v62 }
0x1162   :  { %v2774_v1 = vpop.f32.mrf.mxu1 }
0x1163   :  { %2961 = vtanh.f32 %v1102_v0  ;;  %v1103_v4 = vmul.f32 0.5, %v1102_v0 }
0x1165   :  { %2963 = vtanh.f32 %v1103_v4 }
0x1170   :  { %v2962_v2 = vpop.eup %2961 }
0x1171   :  { %1110 = vrot.lane.b32.xlu1 %v2962_v2, %s3246_s2 }
0x1172   :  { %v2964_v5 = vpop.eup %2963 }
0x1173   :  { %v1105_v6 = vmul.f32 0.5, %v2964_v5 }
0x1175   :  { %v1106_v7 = vadd.f32 0.5, %v1105_v6 }
0x1177   :  { %v1108_v11 = vmul.f32 %v1106_v7, %v1015_v48  ;;  %v1288_v48 = vcombine.low %v1253_v47, %v1254_v26 }
0x1179   :  { %v1296_v52 = vrot.slane %v1288_v48, %v3378_v8 }
0x11e3   :  { %v1111_v9 = vpop.permute.xlu1 %1110 }
0x11e4   :  { %v1113_v10 = vmul.f32 %v1111_v9, %v1106_v7 }
0x11e6   :  { %1115 = vrot.lane.b32.xlu0 %v1113_v10, %s3246_s2 }
0x1258   :  { %v1116_v12 = vpop.permute.xlu0 %1115 }
0x1259   :  { %v1118_v13 = vadd.f32 %v1116_v12, %v1108_v11 }
0x125b   :  { %2965 = vtanh.f32 %v1118_v13 }
0x1268   :  { %v2966_v14 = vpop.eup %2965 }
0x1269   :  { %1121 = vrot.lane.b32.xlu1 %v2966_v14, %s3246_s2 }
0x12db   :  { %v1122_v15 = vpop.permute.xlu1 %1121 }
0x12dc   :  { %v1124_v18 = vmul.f32 %v1122_v15, %v1106_v7 }
0x12de   :  { %1126 = vrot.lane.b32.xlu0 %v1124_v18, %s3247_s29 }
0x1350   :  { %v1127_v19 = vpop.permute.xlu0 %1126 }
0x1351   :  { %1130 = vst.msk [vmem:[#allocation6 + $0xc] sm:$0x3] %vm142_vm0, %v1127_v19  ;;  %2784 = vmatmul.mubr.msk.f32.vlgmr.msra.gmra.mxu0 %vm406_vm2, %v1127_v19 }
0x1352   :  { %2805 = vmatprep.mubr.msk.f32.mxu0 %vm3245_vm1, %v3243_v3  ;;  %2798 = vmatpush3.msra.mxu0 %v3553_v42 }
0x1353   :  { %2799 = vmatprep.subr.mxu0 %v3243_v3 }
0x1354   :  { %2800 = vmatpush3.msra.mxu0 %v3555_v43 }
0x1355   :  { %2801 = vmatprep.subr.mxu0 %v3243_v3 }
0x1356   :  { %2802 = vmatpush3.msra.mxu0 %v3559_v44 }
0x1357   :  { %2803 = vmatprep.subr.mxu0 %v3243_v3 }
0x1358   :  { %2804 = vmatpush3.msra.mxu0 %v3564_v45  ;;  %v1255_v49 = vld [vmem:[#allocation6 + $0xc] sm:$0x3] }
0x1359   :  { %2806 = vmatmul.mubr.msk.f32.vlgmr.msra.gmra.mxu0 %vm406_vm2, %v1437_v22  ;;  %2819 = vmatprep.subr.mxu0 %v3243_v3 }
0x135a   :  { %2820 = vmatpush3.msra.mxu0 %v3553_v42  ;;  %2827 = vmatprep.mubr.msk.f32.mxu0 %vm3245_vm1, %v3243_v3 }
0x135b   :  { %2821 = vmatprep.subr.mxu0 %v3243_v3 }
0x135c   :  { %2822 = vmatpush3.msra.mxu0 %v3555_v43 }
0x135d   :  { %2823 = vmatprep.subr.mxu0 %v3243_v3 }
0x135e   :  { %2824 = vmatpush3.msra.mxu0 %v3559_v44 }
0x135f   :  { %2825 = vmatprep.subr.mxu0 %v3243_v3 }
0x1360   :  { %2826 = vmatpush3.msra.mxu0 %v3564_v45 }
0x1361   :  { %2841 = vmatprep.subr.mxu0 %v3243_v3 }
0x1411   :  { %v1201_v21 = vpop.f32.mrf.mxu0 }
0x1412   :  { %v1205_v23 = vadd.f32 %v1201_v21, %v1132_v20 }
0x1413   :  { %v2785_v24 = vpop.f32.mrf.mxu0 }
0x1414   :  { %2967 = vtanh.f32 %v1205_v23  ;;  %v1206_v27 = vmul.f32 0.5, %v1205_v23 }
0x1416   :  { %2969 = vtanh.f32 %v1206_v27 }
0x1419   :  { %v1510_v55 = vpop.f32.mrf.mxu0 }
0x141b   :  { %v2807_v56 = vpop.f32.mrf.mxu0 }
0x1421   :  { %v2968_v25 = vpop.eup %2967 }
0x1422   :  { %1213 = vrot.lane.b32.xlu1 %v2968_v25, %s3246_s2 }
0x1423   :  { %v2970_v28 = vpop.eup %2969 }
0x1424   :  { %v1208_v29 = vmul.f32 0.5, %v2970_v28 }
0x1426   :  { %v1209_v30 = vadd.f32 0.5, %v1208_v29 }
0x1428   :  { %v1211_v33 = vmul.f32 %v1209_v30, %v1118_v13 }
0x1494   :  { %v1214_v31 = vpop.permute.xlu1 %1213 }
0x1495   :  { %v1216_v32 = vmul.f32 %v1214_v31, %v1209_v30 }
0x1497   :  { %1218 = vrot.lane.b32.xlu0 %v1216_v32, %s3246_s2 }
0x1509   :  { %v1219_v34 = vpop.permute.xlu0 %1218 }
0x150a   :  { %v3547_v35 = vadd.f32 %v1219_v34, %v1211_v33 }
0x150c   :  { %2971 = vtanh.f32 %v3547_v35 }
0x1519   :  { %v2972_v36 = vpop.eup %2971 }
0x151a   :  { %1224 = vrot.lane.b32.xlu1 %v2972_v36, %s3246_s2 }
0x158c   :  { %v1225_v16 = vpop.permute.xlu1 %1224 }
0x158d   :  { %v1227_v41 = vmul.f32 %v1225_v16, %v1209_v30 }
0x158f   :  { %1229 = vrot.lane.b32.xlu0 %v1227_v41, %s3247_s29 }
0x1593   :  { %1521 = vrot.lane.b32.xlu0 %v1439_v17, %s3246_s2 }
0x1601   :  { %v1230_v46 = vpop.permute.xlu0 %1229 }
0x1602   :  { %1233 = vst.msk [vmem:[#allocation6 + $0xe] sm:$0x3] %vm142_vm0, %v1230_v46  ;;  %1234 = vst.msk [vmem:[#allocation2] sm:$0x3] %vm142_vm0, %v1230_v46 }
0x1609   :  { %v1256_v50 = vld [vmem:[#allocation6 + $0xe] sm:$0x3] }
0x160a   :  { %v1289_v51 = vcombine.low %v1255_v49, %v1256_v50 }
0x160c   :  { %v1303_v53 = vrot.slane %v1289_v51, %v3378_v8 }
0x160e   :  { %v1304_v54 = vcombine.low %v1296_v52, %v1303_v53 }
0x1610   :  { %2795 = vmatmul.mubr.msk.f32.vlgmr.msra.gmra.mxu1 %vm406_vm2, %v1304_v54 }
0x1611   :  { %2809 = vmatpush3.msra.mxu1 %v3553_v42  ;;  %2816 = vmatprep.mubr.msk.f32.mxu1 %vm3245_vm1, %v3243_v3 }
0x1612   :  { %2810 = vmatprep.subr.mxu1 %v3243_v3 }
0x1613   :  { %2811 = vmatpush3.msra.mxu1 %v3555_v43 }
0x1614   :  { %2812 = vmatprep.subr.mxu1 %v3243_v3 }
0x1615   :  { %2813 = vmatpush3.msra.mxu1 %v3559_v44 }
0x1616   :  { %2814 = vmatprep.subr.mxu1 %v3243_v3 }
0x1617   :  { %2815 = vmatpush3.msra.mxu1 %v3564_v45 }
0x1618   :  { %2830 = vmatprep.subr.mxu1 %v3243_v3 }
0x16d0   :  { %v2796_v58 = vpop.f32.mrf.mxu1 }
0x16d1   :  { %v1381_v59 = vadd.f32 %v2796_v58, %v2571_v57 }
0x16d2   :  { %v1375_v60 = vpop.f32.mrf.mxu1 }
0x16d3   :  { %v1403_v61 = vcombine.high %v1381_v59, %v1381_v59  ;;  %v1410_v62 = vrot.slane %v1381_v59, %v3378_v8  ;;  %2576 = vst.sshfl [vmem:[#allocation5 + $0x8] sm:$0x3 pattern:$0x76325410] %v1381_v59  ;;  %v1376_v63 = vadd.f32 %v2571_v57, %v1375_v60 }
0x16d5   :  { %v1417_v0 = vrot.slane %v1403_v61, %v3378_v8  ;;  %v1418_v1 = vcombine.high %v1410_v62, %v1410_v62  ;;  %2577 = vst.sshfl [vmem:[#allocation5 + $0xc] sm:$0x3 pattern:$0x76325410] %v1403_v61  ;;  %v1386_v2 = vcombine.high %v1376_v63, %v1376_v63  ;;  %v1393_v4 = vrot.slane %v1376_v63, %v3378_v8 }
0x16d6   :  { %2574 = vst.sshfl [vmem:[#allocation5] sm:$0x3 pattern:$0x76325410] %v1376_v63 }
0x16d7   :  { %v1419_v5 = vcombine.high %v1417_v0, %v1417_v0  ;;  %1433 = vst [vmem:[#allocation5 + $0xa] sm:$0x3] %v1418_v1  ;;  %v1400_v6 = vrot.slane %v1386_v2, %v3378_v8  ;;  %v1401_v7 = vcombine.high %v1393_v4, %v1393_v4  ;;  %2575 = vst.sshfl [vmem:[#allocation5 + $0x4] sm:$0x3 pattern:$0x76325410] %v1386_v2  ;;  %v1522_v8 = vpop.permute.xlu0 %1521 }
0x16d9   :  { %1435 = vst [vmem:[#allocation5 + $0xe] sm:$0x3] %v1419_v5  ;;  %v1402_v9 = vcombine.high %v1400_v6, %v1400_v6  ;;  %1429 = vst [vmem:[#allocation5 + $0x2] sm:$0x3] %v1401_v7 }
0x16db   :  { %1431 = vst [vmem:[#allocation5 + $0x6] sm:$0x3] %v1402_v9 }
0x16dd   :  { %v1440_v10 = vld [vmem:[#allocation5] sm:$0x3] }
0x16de   :  { %v1514_v11 = vadd.f32 %v1510_v55, %v1440_v10  ;;  %v1642_v49 = vld [vmem:[#allocation5 + $0x4] sm:$0x3] }
0x16e0   :  { %2973 = vtanh.f32 %v1514_v11  ;;  %v1515_v13 = vmul.f32 0.5, %v1514_v11  ;;  %v1542_v30 = vld [vmem:[#allocation5 + $0x2] sm:$0x3] }
0x16e2   :  { %2975 = vtanh.f32 %v1515_v13  ;;  %v1742_v6 = vld [vmem:[#allocation5 + $0x6] sm:$0x3] }
0x16ed   :  { %v2974_v12 = vpop.eup %2973 }
0x16ee   :  { %1526 = vrot.lane.b32.xlu1 %v2974_v12, %s3246_s2 }
0x16ef   :  { %v2976_v14 = vpop.eup %2975 }
0x16f0   :  { %v1517_v15 = vmul.f32 0.5, %v2976_v14 }
0x16f2   :  { %v1518_v18 = vadd.f32 0.5, %v1517_v15 }
0x16f4   :  { %v1524_v21 = vmul.f32 %v1522_v8, %v1518_v18 }
0x1760   :  { %v1527_v19 = vpop.permute.xlu1 %1526 }
0x1761   :  { %v1529_v20 = vmul.f32 %v1527_v19, %v1518_v18 }
0x1763   :  { %1531 = vrot.lane.b32.xlu1 %v1529_v20, %s3246_s2 }
0x17d5   :  { %v1532_v23 = vpop.permute.xlu1 %1531 }
0x17d6   :  { %v1534_v24 = vadd.f32 %v1532_v23, %v1524_v21 }
0x17d8   :  { %2977 = vtanh.f32 %v1534_v24 }
0x17e5   :  { %v2978_v25 = vpop.eup %2977 }
0x17e6   :  { %1537 = vrot.lane.b32.xlu0 %v2978_v25, %s3246_s2 }
0x1858   :  { %v1538_v27 = vpop.permute.xlu0 %1537 }
0x1859   :  { %v3603_v28 = vmul.f32 %v1538_v27, %v1518_v18 }
0x185b   :  { %1544 = vrot.lane.b32.xlu1 %v3603_v28, %s3247_s29 }
0x18cd   :  { %v1545_v29 = vpop.permute.xlu1 %1544 }
0x18ce   :  { %2817 = vmatmul.mubr.msk.f32.vlgmr.msra.gmra.mxu1 %vm406_vm2, %v1545_v29  ;;  %v1842_v29 = vld [vmem:[#allocation5 + $0x8] sm:$0x3] }
0x18cf   :  { %2831 = vmatpush3.msra.mxu1 %v3553_v42  ;;  %2838 = vmatprep.mubr.msk.f32.mxu1 %vm3245_vm1, %v3243_v3 }
0x18d0   :  { %2832 = vmatprep.subr.mxu1 %v3243_v3 }
0x18d1   :  { %2833 = vmatpush3.msra.mxu1 %v3555_v43 }
0x18d2   :  { %2834 = vmatprep.subr.mxu1 %v3243_v3 }
0x18d3   :  { %2835 = vmatpush3.msra.mxu1 %v3559_v44 }
0x18d4   :  { %2836 = vmatprep.subr.mxu1 %v3243_v3 }
0x18d5   :  { %2837 = vmatpush3.msra.mxu1 %v3564_v45 }
0x18d6   :  { %2852 = vmatprep.subr.mxu1 %v3243_v3 }
0x198e   :  { %v1614_v31 = vpop.f32.mrf.mxu1 }
0x198f   :  { %v1618_v32 = vadd.f32 %v1614_v31, %v1542_v30 }
0x1990   :  { %v2818_v33 = vpop.f32.mrf.mxu1 }
0x1991   :  { %2979 = vtanh.f32 %v1618_v32  ;;  %v1619_v36 = vmul.f32 0.5, %v1618_v32 }
0x1993   :  { %2981 = vtanh.f32 %v1619_v36 }
0x199e   :  { %v2980_v34 = vpop.eup %2979 }
0x199f   :  { %1626 = vrot.lane.b32.xlu0 %v2980_v34, %s3246_s2 }
0x19a0   :  { %v2982_v37 = vpop.eup %2981 }
0x19a1   :  { %v1621_v38 = vmul.f32 0.5, %v2982_v37 }
0x19a3   :  { %v1622_v39 = vadd.f32 0.5, %v1621_v38 }
0x19a5   :  { %v1624_v41 = vmul.f32 %v1622_v39, %v1534_v24 }
0x1a11   :  { %v1627_v40 = vpop.permute.xlu0 %1626 }
0x1a12   :  { %v1629_v16 = vmul.f32 %v1627_v40, %v1622_v39 }
0x1a14   :  { %1631 = vrot.lane.b32.xlu1 %v1629_v16, %s3246_s2 }
0x1a86   :  { %v1632_v17 = vpop.permute.xlu1 %1631 }
0x1a87   :  { %v1634_v22 = vadd.f32 %v1632_v17, %v1624_v41 }
0x1a89   :  { %2983 = vtanh.f32 %v1634_v22 }
0x1a96   :  { %v2984_v46 = vpop.eup %2983 }
0x1a97   :  { %1637 = vrot.lane.b32.xlu0 %v2984_v46, %s3246_s2 }
0x1b09   :  { %v1638_v26 = vpop.permute.xlu0 %1637 }
0x1b0a   :  { %v1640_v47 = vmul.f32 %v1638_v26, %v1622_v39 }
0x1b0c   :  { %1644 = vrot.lane.b32.xlu1 %v1640_v47, %s3247_s29  ;;  %v1641_v1 = vadd.f32 %v1640_v47, %v3603_v28 }
0x1b7e   :  { %v1645_v48 = vpop.permute.xlu1 %1644 }
0x1b7f   :  { %2828 = vmatmul.mubr.msk.f32.vlgmr.msra.gmra.mxu0 %vm406_vm2, %v1645_v48 }
0x1b80   :  { %2842 = vmatpush3.msra.mxu0 %v3553_v42  ;;  %2849 = vmatprep.mubr.msk.f32.mxu0 %vm3245_vm1, %v3243_v3 }
0x1b81   :  { %2843 = vmatprep.subr.mxu0 %v3243_v3 }
0x1b82   :  { %2844 = vmatpush3.msra.mxu0 %v3555_v43 }
0x1b83   :  { %2845 = vmatprep.subr.mxu0 %v3243_v3 }
0x1b84   :  { %2846 = vmatpush3.msra.mxu0 %v3559_v44 }
0x1b85   :  { %2847 = vmatprep.subr.mxu0 %v3243_v3 }
0x1b86   :  { %2848 = vmatpush3.msra.mxu0 %v3564_v45 }
0x1b87   :  { %2863 = vmatprep.subr.mxu0 %v3243_v3 }
0x1c3f   :  { %v1714_v50 = vpop.f32.mrf.mxu0 }
0x1c40   :  { %v1718_v51 = vadd.f32 %v1714_v50, %v1642_v49  ;;  %v1942_v49 = vld [vmem:[#allocation5 + $0xa] sm:$0x3] }
0x1c41   :  { %v2829_v52 = vpop.f32.mrf.mxu0 }
0x1c42   :  { %2985 = vtanh.f32 %v1718_v51  ;;  %v1719_v54 = vmul.f32 0.5, %v1718_v51 }
0x1c44   :  { %2987 = vtanh.f32 %v1719_v54 }
0x1c4f   :  { %v2986_v53 = vpop.eup %2985 }
0x1c50   :  { %1726 = vrot.lane.b32.xlu0 %v2986_v53, %s3246_s2 }
0x1c51   :  { %v2988_v55 = vpop.eup %2987 }
0x1c52   :  { %v1721_v56 = vmul.f32 0.5, %v2988_v55 }
0x1c54   :  { %v1722_v57 = vadd.f32 0.5, %v1721_v56 }
0x1c56   :  { %v1724_v60 = vmul.f32 %v1722_v57, %v1634_v22 }
0x1cc2   :  { %v1727_v58 = vpop.permute.xlu0 %1726 }
0x1cc3   :  { %v1729_v59 = vmul.f32 %v1727_v58, %v1722_v57 }
0x1cc5   :  { %1731 = vrot.lane.b32.xlu1 %v1729_v59, %s3246_s2 }
0x1d37   :  { %v1732_v61 = vpop.permute.xlu1 %1731 }
0x1d38   :  { %v1734_v62 = vadd.f32 %v1732_v61, %v1724_v60 }
0x1d3a   :  { %2989 = vtanh.f32 %v1734_v62 }
0x1d47   :  { %v2990_v63 = vpop.eup %2989 }
0x1d48   :  { %1737 = vrot.lane.b32.xlu0 %v2990_v63, %s3246_s2 }
0x1dba   :  { %v1738_v0 = vpop.permute.xlu0 %1737 }
0x1dbb   :  { %v1740_v2 = vmul.f32 %v1738_v0, %v1722_v57  ;;  %v2042_v0 = vld [vmem:[#allocation5 + $0xc] sm:$0x3] }
0x1dbd   :  { %v1741_v4 = vadd.f32 %v1740_v2, %v1641_v1  ;;  %1744 = vrot.lane.b32.xlu1 %v1740_v2, %s3247_s29 }
0x1e2f   :  { %v1745_v5 = vpop.permute.xlu1 %1744 }
0x1e30   :  { %2839 = vmatmul.mubr.msk.f32.vlgmr.msra.gmra.mxu1 %vm406_vm2, %v1745_v5 }
0x1e31   :  { %2853 = vmatpush3.msra.mxu1 %v3553_v42  ;;  %2860 = vmatprep.mubr.msk.f32.mxu1 %vm3245_vm1, %v3243_v3 }
0x1e32   :  { %2854 = vmatprep.subr.mxu1 %v3243_v3 }
0x1e33   :  { %2855 = vmatpush3.msra.mxu1 %v3555_v43 }
0x1e34   :  { %2856 = vmatprep.subr.mxu1 %v3243_v3 }
0x1e35   :  { %2857 = vmatpush3.msra.mxu1 %v3559_v44 }
0x1e36   :  { %2858 = vmatprep.subr.mxu1 %v3243_v3 }
0x1e37   :  { %2859 = vmatpush3.msra.mxu1 %v3564_v45 }
0x1e38   :  { %2874 = vmatprep.subr.mxu1 %v3243_v3 }
0x1ef0   :  { %v1814_v7 = vpop.f32.mrf.mxu1 }
0x1ef1   :  { %v1818_v9 = vadd.f32 %v1814_v7, %v1742_v6 }
0x1ef2   :  { %v2840_v10 = vpop.f32.mrf.mxu1 }
0x1ef3   :  { %2991 = vtanh.f32 %v1818_v9  ;;  %v1819_v12 = vmul.f32 0.5, %v1818_v9 }
0x1ef5   :  { %2993 = vtanh.f32 %v1819_v12 }
0x1f00   :  { %v2992_v11 = vpop.eup %2991 }
0x1f01   :  { %1826 = vrot.lane.b32.xlu0 %v2992_v11, %s3246_s2 }
0x1f02   :  { %v2994_v13 = vpop.eup %2993 }
0x1f03   :  { %v1821_v14 = vmul.f32 0.5, %v2994_v13 }
0x1f05   :  { %v1822_v15 = vadd.f32 0.5, %v1821_v14 }
0x1f07   :  { %v1824_v20 = vmul.f32 %v1822_v15, %v1734_v62 }
0x1f73   :  { %v1827_v18 = vpop.permute.xlu0 %1826 }
0x1f74   :  { %v1829_v19 = vmul.f32 %v1827_v18, %v1822_v15 }
0x1f76   :  { %1831 = vrot.lane.b32.xlu1 %v1829_v19, %s3246_s2 }
0x1fe8   :  { %v1832_v8 = vpop.permute.xlu1 %1831 }
0x1fe9   :  { %v1834_v21 = vadd.f32 %v1832_v8, %v1824_v20 }
0x1feb   :  { %2995 = vtanh.f32 %v1834_v21 }
0x1ff8   :  { %v2996_v23 = vpop.eup %2995 }
0x1ff9   :  { %1837 = vrot.lane.b32.xlu0 %v2996_v23, %s3246_s2  ;;  %v2142_v23 = vld [vmem:[#allocation5 + $0xe] sm:$0x3] }
0x206b   :  { %v1838_v24 = vpop.permute.xlu0 %1837 }
0x206c   :  { %v1840_v25 = vmul.f32 %v1838_v24, %v1822_v15 }
0x206e   :  { %v1841_v27 = vadd.f32 %v1840_v25, %v1741_v4  ;;  %1844 = vrot.lane.b32.xlu1 %v1840_v25, %s3247_s29 }
0x20e0   :  { %v1845_v28 = vpop.permute.xlu1 %1844 }
0x20e1   :  { %2850 = vmatmul.mubr.msk.f32.vlgmr.msra.gmra.mxu0 %vm406_vm2, %v1845_v28 }
0x20e2   :  { %2864 = vmatpush3.msra.mxu0 %v3553_v42  ;;  %2871 = vmatprep.mubr.msk.f32.mxu0 %vm3245_vm1, %v3243_v3 }
0x20e3   :  { %2865 = vmatprep.subr.mxu0 %v3243_v3 }
0x20e4   :  { %2866 = vmatpush3.msra.mxu0 %v3555_v43 }
0x20e5   :  { %2867 = vmatprep.subr.mxu0 %v3243_v3 }
0x20e6   :  { %2868 = vmatpush3.msra.mxu0 %v3559_v44 }
0x20e7   :  { %2869 = vmatprep.subr.mxu0 %v3243_v3 }
0x20e8   :  { %2870 = vmatpush3.msra.mxu0 %v3564_v45 }
0x20e9   :  { %2885 = vmatprep.subr.mxu0 %v3243_v3 }
0x21a1   :  { %v1914_v30 = vpop.f32.mrf.mxu0 }
0x21a2   :  { %v1918_v31 = vadd.f32 %v1914_v30, %v1842_v29 }
0x21a3   :  { %v2851_v32 = vpop.f32.mrf.mxu0 }
0x21a4   :  { %2997 = vtanh.f32 %v1918_v31  ;;  %v1919_v34 = vmul.f32 0.5, %v1918_v31 }
0x21a6   :  { %2999 = vtanh.f32 %v1919_v34 }
0x21b1   :  { %v2998_v33 = vpop.eup %2997 }
0x21b2   :  { %1926 = vrot.lane.b32.xlu0 %v2998_v33, %s3246_s2 }
0x21b3   :  { %v3000_v36 = vpop.eup %2999 }
0x21b4   :  { %v1921_v37 = vmul.f32 0.5, %v3000_v36 }
0x21b6   :  { %v1922_v38 = vadd.f32 0.5, %v1921_v37 }
0x21b8   :  { %v1924_v16 = vmul.f32 %v1922_v38, %v1834_v21 }
0x2224   :  { %v1927_v39 = vpop.permute.xlu0 %1926 }
0x2225   :  { %v1929_v40 = vmul.f32 %v1927_v39, %v1922_v38 }
0x2227   :  { %1931 = vrot.lane.b32.xlu1 %v1929_v40, %s3246_s2  ;;  %v2266_v40 = vld [vmem:[%s3753_s7 + $0x18] sm:$0xff] }
0x2299   :  { %v1932_v41 = vpop.permute.xlu1 %1931 }
0x229a   :  { %v1934_v17 = vadd.f32 %v1932_v41, %v1924_v16  ;;  %v2265_v16 = vld [vmem:[%s3753_s7 + $0x10] sm:$0xff]  ;;  %v2264_v41 = vld [vmem:[%s3753_s7 + $0x8] sm:$0xff] }
0x229c   :  { %3001 = vtanh.f32 %v1934_v17 }
0x22a9   :  { %v3002_v22 = vpop.eup %3001 }
0x22aa   :  { %1937 = vrot.lane.b32.xlu0 %v3002_v22, %s3246_s2 }
0x231c   :  { %v1938_v46 = vpop.permute.xlu0 %1937 }
0x231d   :  { %v1940_v26 = vmul.f32 %v1938_v46, %v1922_v38  ;;  %v2349_v46 = vld [vmem:[%s3755_s9] sm:$0xff] }
0x231f   :  { %v1941_v47 = vadd.f32 %v1940_v26, %v1841_v27  ;;  %1944 = vrot.lane.b32.xlu1 %v1940_v26, %s3247_s29 }
0x2391   :  { %v1945_v48 = vpop.permute.xlu1 %1944 }
0x2392   :  { %2861 = vmatmul.mubr.msk.f32.vlgmr.msra.gmra.mxu1 %vm406_vm2, %v1945_v48 }
0x2393   :  { %2875 = vmatpush3.msra.mxu1 %v3553_v42  ;;  %2882 = vmatprep.mubr.msk.f32.mxu1 %vm3245_vm1, %v3243_v3 }
0x2394   :  { %2876 = vmatprep.subr.mxu1 %v3243_v3 }
0x2395   :  { %2877 = vmatpush3.msra.mxu1 %v3555_v43 }
0x2396   :  { %2878 = vmatprep.subr.mxu1 %v3243_v3 }
0x2397   :  { %2879 = vmatpush3.msra.mxu1 %v3559_v44 }
0x2398   :  { %2880 = vmatprep.subr.mxu1 %v3243_v3 }
0x2399   :  { %2881 = vmatpush3.msra.mxu1 %v3564_v45 }
0x239a   :  { %2896 = vmatprep.subr.mxu1 %v3243_v3 }
0x2452   :  { %v2014_v50 = vpop.f32.mrf.mxu1 }
0x2453   :  { %v2018_v42 = vadd.f32 %v2014_v50, %v1942_v49  ;;  %v2252_v49 = vld [vmem:[#allocation4] sm:$0x3] }
0x2454   :  { %v2862_v51 = vpop.f32.mrf.mxu1 }
0x2455   :  { %3003 = vtanh.f32 %v2018_v42  ;;  %v2019_v53 = vmul.f32 0.5, %v2018_v42 }
0x2457   :  { %3005 = vtanh.f32 %v2019_v53  ;;  %v2432_v53 = vld [vmem:[%s3757_s11] sm:$0xff] }
0x2462   :  { %v3004_v52 = vpop.eup %3003 }
0x2463   :  { %2026 = vrot.lane.b32.xlu0 %v3004_v52, %s3246_s2 }
0x2464   :  { %v3006_v43 = vpop.eup %3005 }
0x2465   :  { %v2021_v54 = vmul.f32 0.5, %v3006_v43  ;;  %v2586_v43 = vld [vmem:[#allocation18] ss:$0 sm:$0xff] }
0x2467   :  { %v2022_v55 = vadd.f32 0.5, %v2021_v54 }
0x2469   :  { %v2024_v45 = vmul.f32 %v2022_v55, %v1934_v17 }
0x24d5   :  { %v2027_v44 = vpop.permute.xlu0 %2026 }
0x24d6   :  { %v2029_v56 = vmul.f32 %v2027_v44, %v2022_v55 }
0x24d8   :  { %2031 = vrot.lane.b32.xlu1 %v2029_v56, %s3246_s2 }
0x254a   :  { %v2032_v57 = vpop.permute.xlu1 %2031 }
0x254b   :  { %v2034_v58 = vadd.f32 %v2032_v57, %v2024_v45 }
0x254d   :  { %3007 = vtanh.f32 %v2034_v58 }
0x255a   :  { %v3008_v59 = vpop.eup %3007 }
0x255b   :  { %2037 = vrot.lane.b32.xlu0 %v3008_v59, %s3246_s2 }
0x25cd   :  { %v2038_v60 = vpop.permute.xlu0 %2037 }
0x25ce   :  { %v2040_v61 = vmul.f32 %v2038_v60, %v2022_v55 }
0x25d0   :  { %v2041_v62 = vadd.f32 %v2040_v61, %v1941_v47  ;;  %2044 = vrot.lane.b32.xlu1 %v2040_v61, %s3247_s29 }
0x2642   :  { %v2045_v63 = vpop.permute.xlu1 %2044 }
0x2643   :  { %2872 = vmatmul.mubr.msk.f32.vlgmr.msra.gmra.mxu0 %vm406_vm2, %v2045_v63 }
0x2644   :  { %2893 = vmatprep.mubr.msk.f32.mxu0 %vm3245_vm1, %v3243_v3  ;;  %2886 = vmatpush3.msra.mxu0 %v2266_v40 }
0x2645   :  { %2887 = vmatprep.subr.mxu0 %v3243_v3 }
0x2646   :  { %2888 = vmatpush3.msra.mxu0 %v2265_v16 }
0x2647   :  { %2889 = vmatprep.subr.mxu0 %v3243_v3 }
0x2648   :  { %2890 = vmatpush3.msra.mxu0 %v2264_v41 }
0x2649   :  { %2891 = vmatprep.subr.mxu0 %v3243_v3 }
0x2703   :  { %v2114_v1 = vpop.f32.mrf.mxu0 }
0x2704   :  { %v2118_v2 = vadd.f32 %v2114_v1, %v2042_v0 }
0x2705   :  { %v2873_v4 = vpop.f32.mrf.mxu0 }
0x2706   :  { %3009 = vtanh.f32 %v2118_v2  ;;  %v2119_v6 = vmul.f32 0.5, %v2118_v2 }
0x2708   :  { %3011 = vtanh.f32 %v2119_v6 }
0x2713   :  { %v3010_v5 = vpop.eup %3009 }
0x2714   :  { %2126 = vrot.lane.b32.xlu0 %v3010_v5, %s3246_s2 }
0x2715   :  { %v3012_v7 = vpop.eup %3011 }
0x2716   :  { %v2121_v9 = vmul.f32 0.5, %v3012_v7 }
0x2718   :  { %v2122_v10 = vadd.f32 0.5, %v2121_v9 }
0x271a   :  { %v2124_v13 = vmul.f32 %v2122_v10, %v2034_v58 }
0x2786   :  { %v2127_v11 = vpop.permute.xlu0 %2126 }
0x2787   :  { %v2129_v12 = vmul.f32 %v2127_v11, %v2122_v10 }
0x2789   :  { %2131 = vrot.lane.b32.xlu1 %v2129_v12, %s3246_s2 }
0x27fb   :  { %v2132_v14 = vpop.permute.xlu1 %2131 }
0x27fc   :  { %v2134_v15 = vadd.f32 %v2132_v14, %v2124_v13 }
0x27fe   :  { %3013 = vtanh.f32 %v2134_v15 }
0x280b   :  { %v3014_v18 = vpop.eup %3013 }
0x280c   :  { %2137 = vrot.lane.b32.xlu0 %v3014_v18, %s3246_s2 }
0x287e   :  { %v2138_v19 = vpop.permute.xlu0 %2137 }
0x287f   :  { %v2140_v20 = vmul.f32 %v2138_v19, %v2122_v10 }
0x2881   :  { %v2141_v8 = vadd.f32 %v2140_v20, %v2041_v62  ;;  %2144 = vrot.lane.b32.xlu1 %v2140_v20, %s3247_s29 }
0x28f3   :  { %v2145_v21 = vpop.permute.xlu1 %2144 }
0x28f4   :  { %2883 = vmatmul.mubr.msk.f32.vlgmr.msra.gmra.mxu1 %vm406_vm2, %v2145_v21 }
0x28f5   :  { %2898 = vmatprep.mubr.msk.f32.mxu1 %vm3245_vm1, %v3243_v3  ;;  %2897 = vmatpush3.msra.mxu1 %v2349_v46 }
0x29b4   :  { %v2214_v24 = vpop.f32.mrf.mxu1 }
0x29b5   :  { %v2218_v25 = vadd.f32 %v2214_v24, %v2142_v23 }
0x29b6   :  { %v2884_v27 = vpop.f32.mrf.mxu1 }
0x29b7   :  { %3015 = vtanh.f32 %v2218_v25  ;;  %v2219_v29 = vmul.f32 0.5, %v2218_v25 }
0x29b9   :  { %3017 = vtanh.f32 %v2219_v29 }
0x29c4   :  { %v3016_v28 = vpop.eup %3015 }
0x29c5   :  { %2226 = vrot.lane.b32.xlu0 %v3016_v28, %s3246_s2 }
0x29c6   :  { %v3018_v30 = vpop.eup %3017 }
0x29c7   :  { %v2221_v31 = vmul.f32 0.5, %v3018_v30 }
0x29c9   :  { %v2222_v32 = vadd.f32 0.5, %v2221_v31 }
0x29cb   :  { %v2224_v36 = vmul.f32 %v2222_v32, %v2134_v15 }
0x2a37   :  { %v2227_v33 = vpop.permute.xlu0 %2226 }
0x2a38   :  { %v2229_v34 = vmul.f32 %v2227_v33, %v2222_v32 }
0x2a3a   :  { %2231 = vrot.lane.b32.xlu1 %v2229_v34, %s3246_s2 }
0x2aac   :  { %v2232_v37 = vpop.permute.xlu1 %2231 }
0x2aad   :  { %v2234_v38 = vadd.f32 %v2232_v37, %v2224_v36 }
0x2aaf   :  { %3019 = vtanh.f32 %v2234_v38 }
0x2abc   :  { %v3020_v39 = vpop.eup %3019 }
0x2abd   :  { %2237 = vrot.lane.b32.xlu0 %v3020_v39, %s3246_s2 }
0x2ac1   :  { %1236 = vrot.lane.b32.xlu0 %v3547_v35, %s3248_s6  ;;  %v2263_v35 = vld [vmem:[%s3753_s7] sm:$0xff] }
0x2ac2   :  { %2892 = vmatpush3.msra.mxu0 %v2263_v35 }
0x2ac3   :  { %2901 = vmatprep.subr.mxu0 %v3243_v3 }
0x2ac5   :  { %2248 = vrot.lane.b32.xlu0 %v2234_v38, %s3248_s6 }
0x2b2f   :  { %v2238_v17 = vpop.permute.xlu0 %2237 }
0x2b30   :  { %v2240_v22 = vmul.f32 %v2238_v17, %v2222_v32 }
0x2b32   :  { %v2241_v26 = vadd.f32 %v2240_v22, %v2141_v8 }
0x2b33   :  { %v1237_v47 = vpop.permute.xlu0 %1236 }
0x2b34   :  { %1239 = vst.msk [vmem:[#allocation3] sm:$0x3] %vm142_vm0, %v1237_v47  ;;  %2254 = vrot.lane.b32.xlu1 %v2241_v26, %s3247_s29 }
0x2b37   :  { %v2249_v48 = vpop.permute.xlu0 %2248 }
0x2b38   :  { %2251 = vst.msk [vmem:[#allocation3 + $0x2] sm:$0x3] %vm142_vm0, %v2249_v48  ;;  %2243 = vrot.lane.b32.xlu1 %v2240_v22, %s3247_s29 }
0x2ba6   :  { %v2255_v50 = vpop.permute.xlu1 %2254 }
0x2ba7   :  { %v2257_v42 = vadd.f32 %v2255_v50, %v2252_v49 }
0x2ba9   :  { %2258 = vst.msk [vmem:[#allocation4] sm:$0x3] %vm142_vm0, %v2257_v42 }
0x2baa   :  { %v2244_v51 = vpop.permute.xlu1 %2243 }
0x2bab   :  { %2246 = vst.msk [vmem:[#allocation2 + $0x2] sm:$0x3] %vm142_vm0, %v2244_v51 }
0x2bb0   :  { %v2262_v52 = vld [vmem:[#allocation4] sm:$0x3] }
0x2bb1   :  { %2894 = vmatmul.mubr.msk.f32.vlgmr.msra.gmra.mxu0 %vm406_vm2, %v2262_v52 }
0x2bb2   :  { %2903 = vmatprep.mubr.msk.f32.mxu0 %vm3245_vm1, %v3243_v3  ;;  %2902 = vmatpush3.msra.mxu0 %v2432_v53 }
0x2c71   :  { %v2343_v54 = vpop.f32.mrf.mxu0 }
0x2c72   :  { %v2344_v55 = vadd.f32 %v2586_v43, %v2343_v54 }
0x2c73   :  { %v2895_v44 = vpop.f32.mrf.mxu0 }
0x2c74   :  { %2899 = vmatmul.mubr.msk.f32.vlgmr.msra.gmra.mxu1 %vm2357_vm4, %v2344_v55  ;;  %2904 = vmatmul.mubr.msk.f32.vlgmr.msra.gmra.mxu0 %vm2357_vm4, %v2344_v55  ;;  %2348 = vst.msk [vmem:[#allocation19] sm:$0x3] %vm2347_vm5, %v2344_v55 }
0x2c75   :  { %3172 = shalt.err (!%p3169_p11)
}
0x2c76   :  { %2520 = dma.vmem_to_hbm [thread:$0]  %s2518_s4, 32, %s3759_s13, [#allocation9]   ;;  %v2588_v3 = vld [vmem:[%s3756_s10] ss:$0 sm:$0xff] }
0x2c77   :  { %v2590_v56 = vld [vmem:[%s3758_s12] ss:$0 sm:$0xff]  ;;  %s3250_s27 = smov [#allocation20]   ;;  %s3251_s2 = smov [#allocation22]  }
0x2c78   :  { %s2527_s28 = sshll.u32 %s3250_s27, 4  ;;  %s2537_s29 = sshll.u32 %s3251_s2, 4  ;;  %s2528_s28 = int_to_ptr.vmem [resolvable:$true] %s2527_s28  ;;  %s2538_s29 = int_to_ptr.vmem [resolvable:$true] %s2537_s29 }
0x2c79   :  { %s3181_s10 = scalar_lea.vmem %s2528_s28, 32  ;;  %p3186_p13 = scmp.lt.s32.totalorder %s2528_s28, %s2528_s28 }
0x2c7a   :  { %p3182_p12 = scmp.ne.s32.totalorder %s2528_s28, %s3181_s10  ;;  %p3187_p0 = scmp.lt.s32.totalorder %s3181_s10, %s3181_s10 }
0x2c7c   :  { %p3188_p1 = por %p3187_p0, %p3186_p13 }
0x2c7e   :  { %p3189_p2 = pnand %p3188_p1, %p3182_p12 }
0x2d34   :  { %v2427_v45 = vpop.f32.mrf.mxu1  ;;  %v2506_v57 = vpop.f32.mrf.mxu0 }
0x2d35   :  { %v2428_v58 = vadd.f32 %v2588_v3, %v2427_v45  ;;  %v2507_v59 = vadd.f32 %v2590_v56, %v2506_v57 }
0x2d36   :  { %v2900_v60 = vpop.f32.mrf.mxu1  ;;  %v2905_v61 = vpop.f32.mrf.mxu0 }
0x2d37   :  { %2431 = vst.msk [vmem:[#allocation20] sm:$0x3] %vm2347_vm5, %v2428_v58  ;;  %2510 = vst.msk [vmem:[#allocation22] sm:$0x3] %vm2347_vm5, %v2507_v59 }
0x2d38   :  { %3192 = shalt.err (!%p3189_p2)
}
0x2d39   :  { %2530 = dma.vmem_to_hbm [thread:$0]  %s2528_s28, 32, %s3760_s14, [#allocation21]  }
0x2d3a   :  { %s3201_s6 = scalar_lea.vmem %s2538_s29, 32  ;;  %p3206_p4 = scmp.lt.s32.totalorder %s2538_s29, %s2538_s29 }
0x2d3b   :  { %p3202_p3 = scmp.ne.s32.totalorder %s2538_s29, %s3201_s6  ;;  %p3207_p5 = scmp.lt.s32.totalorder %s3201_s6, %s3201_s6 }
0x2d3d   :  { %p3208_p6 = por %p3207_p5, %p3206_p4 }
0x2d3f   :  { %p3209_p7 = pnand %p3208_p6, %p3202_p3 }
0x2d41   :  { %3212 = shalt.err (!%p3209_p7)
}
0x2d42   :  { %2540 = dma.vmem_to_hbm [thread:$0]  %s2538_s29, 32, %s3761_s15, [#allocation21]  }
0x2d43   :  { %3229 = dma.done.wait [#allocation9], 32  }
0x2d44   :  { %3230 = vsyncadd [#allocation9], 4294967264 }
0x2d45   :  { %3231 = dma.done.wait [#allocation21], 64  }
0x2d46   :  { %3232 = vsyncadd [#allocation21], 4294967232 }
0x2d47   :  { %2550 = vsyncpa [#allocation8], 1 }
0x2d48   :  { %2551 = vsyncpa [#allocation11], 1 }
0x2d49   :  { %2552 = vsyncpa [#allocation14], 1 }
0x2d4a   :  { %2553 = vsyncpa [#allocation17], 1 }
0x2d4b   :  { %2554 = vsyncpa [#allocation9], 1 }
0x2d4c   :  { %2555 = vsyncpa [#allocation21], 1 }

</bundles_post_ra>
